<compile_context>
chip_gen: v7x
topology: tpu7x:2x2x1
jax: 0.10.0
libtpu: 0.0.40
codegen_flags: <defaults>
</compile_context>

<pallas_src>
import jax
import jax.numpy as jnp
from jax.experimental import pallas as pl
from jax.experimental.pallas import tpu as pltpu


_LANES = 128
_VMEM = pl.BlockSpec(memory_space=pltpu.MemorySpace.VMEM)


# ----------------------------------------------------------------------------
# Pallas kernels
# ----------------------------------------------------------------------------
def _conv_relu_pool_kernel(p_ref, w_ref, b_ref, o_ref, acc_ref):
    """o = relu(max_{4 pool offsets}(P_ab @ W) + b).

    p_ref  : [4*M, K]   im2col patches, the 4 pool offsets stacked along M
    w_ref  : [K, 128]   conv weights (im2col order), OC zero-padded to 128
    b_ref  : [1, 128]
    o_ref  : [M, 128]   pooled activations (lane-dense store)
    acc_ref: [4*M, 128] f32 scratch holding the single matmul result
    """
    acc_ref[...] = jnp.dot(p_ref[...], w_ref[...],
                           preferred_element_type=jnp.float32)
    m = acc_ref.shape[0] // 4
    pooled = acc_ref[0 * m:1 * m, :]
    pooled = jnp.maximum(pooled, acc_ref[1 * m:2 * m, :])
    pooled = jnp.maximum(pooled, acc_ref[2 * m:3 * m, :])
    pooled = jnp.maximum(pooled, acc_ref[3 * m:4 * m, :])
    o_ref[...] = jnp.maximum(pooled + b_ref[...], 0.0).astype(o_ref.dtype)


def _conv2_mlp_kernel(p_ref, cw_ref, cb_ref, fw1_ref, fb1_ref, fw2_ref,
                      fb2_ref, fw3_ref, fb3_ref, o_ref,
                      acc_ref, pool_ref, x1_ref):
    """conv2 + ReLU + 2x2 maxpool fused with fc1+ReLU -> fc2+ReLU -> fc3.

    p_ref   : [4*M, K2]      conv2 im2col patches, rows ordered (ph, pw, n)
    cw_ref  : [K2, 128]      conv2 weights, cb_ref: [1, 128]
    fw1_ref : [25*128, 128]  fc1 weights pre-scattered to (ph, pw, c_pad) rows
    fw2/fw3 : [128, 128]     fc2 / fc3 weights (padded); biases [1, 128]
    o_ref   : [N, 128]       padded logits
    scratch : acc [4*M,128], pool [M,128], x1 [N, 25*128]
    """
    # conv2: one matmul over all 4 pool offsets, then max / bias / relu.
    acc_ref[...] = jnp.dot(p_ref[...], cw_ref[...],
                           preferred_element_type=jnp.float32)
    m = acc_ref.shape[0] // 4
    pooled = acc_ref[0 * m:1 * m, :]
    pooled = jnp.maximum(pooled, acc_ref[1 * m:2 * m, :])
    pooled = jnp.maximum(pooled, acc_ref[2 * m:3 * m, :])
    pooled = jnp.maximum(pooled, acc_ref[3 * m:4 * m, :])
    pool_ref[...] = jnp.maximum(pooled + cb_ref[...], 0.0)

    # On-chip flatten: rows are (ph, pw, n), so pooled position p for all N
    # images is the contiguous row block [p*N, (p+1)*N); place it at lane
    # offset p*128 of the per-image fc1 input (aligned 128-lane stores).
    n_img = o_ref.shape[0]
    n_pos = m // n_img
    for p in range(n_pos):
        x1_ref[:, p * _LANES:(p + 1) * _LANES] = (
            pool_ref[p * n_img:(p + 1) * n_img, :])

    # fc1 + ReLU / fc2 + ReLU / fc3 (hidden dims padded to 128 lanes).
    h = jnp.dot(x1_ref[...], fw1_ref[...],
                preferred_element_type=jnp.float32) + fb1_ref[...]
    h = jnp.maximum(h, 0.0)
    h = jnp.dot(h, fw2_ref[...],
                preferred_element_type=jnp.float32) + fb2_ref[...]
    h = jnp.maximum(h, 0.0)
    o = jnp.dot(h, fw3_ref[...],
                preferred_element_type=jnp.float32) + fb3_ref[...]
    o_ref[...] = o.astype(o_ref.dtype)


# ----------------------------------------------------------------------------
# pallas_call wrappers (single resident block; tiny operands fit VMEM easily)
# ----------------------------------------------------------------------------
def _conv_relu_pool(p_all, w, b):
    m4, k = p_all.shape
    m = m4 // 4
    n = w.shape[1]
    cost = pl.CostEstimate(
        flops=2 * m4 * k * n,
        transcendentals=0,
        bytes_accessed=4 * (m4 * k + k * n + n + m * n),
    )
    return pl.pallas_call(
        _conv_relu_pool_kernel,
        out_shape=jax.ShapeDtypeStruct((m, n), jnp.float32),
        in_specs=[_VMEM] * 3,
        out_specs=_VMEM,
        scratch_shapes=[pltpu.VMEM((m4, n), jnp.float32)],
        cost_estimate=cost,
    )(p_all, w, b)


def _conv2_mlp(p_all, qp, n_img):
    m4, k2 = p_all.shape
    m = m4 // 4
    n_pos = m // n_img
    k1 = qp["f1_w"].shape[0]
    cost = pl.CostEstimate(
        flops=2 * (m4 * k2 * _LANES
                   + n_img * (k1 * _LANES + 2 * _LANES * _LANES)),
        transcendentals=0,
        bytes_accessed=4 * (m4 * k2 + k2 * _LANES + k1 * _LANES
                            + 2 * _LANES * _LANES + 4 * _LANES
                            + n_img * _LANES),
    )
    return pl.pallas_call(
        _conv2_mlp_kernel,
        out_shape=jax.ShapeDtypeStruct((n_img, _LANES), jnp.float32),
        in_specs=[_VMEM] * 9,
        out_specs=_VMEM,
        scratch_shapes=[pltpu.VMEM((m4, _LANES), jnp.float32),
                        pltpu.VMEM((m, _LANES), jnp.float32),
                        pltpu.VMEM((n_img, n_pos * _LANES), jnp.float32)],
        cost_estimate=cost,
    )(p_all, qp["c2_w"], qp["c2_b"], qp["f1_w"], qp["f1_b"],
      qp["f2_w"], qp["f2_b"], qp["f3_w"], qp["f3_b"])


# ----------------------------------------------------------------------------
# Pool-fused im2col (boundary glue: strided slices + concat, NHWC)
# ----------------------------------------------------------------------------
def _pool_patches(xh, kh, kw, pos_major=False):
    """xh: [N, H, W, C] NHWC (already channel-sliced).

    Builds the im2col patch matrix for each of the 4 (a, b) offsets of a fused
    2x2/2 maxpool and concatenates them along M -> [4*N*PH*PW, kh*kw*C].
    pos_major=False: rows within each offset block ordered (n, ph, pw).
    pos_major=True : rows ordered (ph, pw, n) so the fused conv2+MLP kernel can
    assemble each image's fc1 row from contiguous row blocks.
    """
    n, h, w, c = xh.shape
    oh, ow = h - kh + 1, w - kw + 1
    ph, pw = oh // 2, ow // 2
    if pos_major:
        xh = jnp.transpose(xh, (1, 2, 0, 3))          # [H, W, N, C]
    mats = []
    for a in range(2):
        for b in range(2):
            if pos_major:
                chunks = [xh[a + i:a + i + 2 * ph - 1:2,
                             b + j:b + j + 2 * pw - 1:2, :, :]
                          for i in range(kh) for j in range(kw)]
            else:
                chunks = [xh[:, a + i:a + i + 2 * ph - 1:2,
                              b + j:b + j + 2 * pw - 1:2, :]
                          for i in range(kh) for j in range(kw)]
            p = jnp.concatenate(chunks, axis=-1)
            mats.append(p.reshape(n * ph * pw, kh * kw * c))
    return jnp.concatenate(mats, axis=0), (ph, pw)


# ----------------------------------------------------------------------------
# Parameters: PyTorch layout init + one-time conversion to kernel layout
# ----------------------------------------------------------------------------
def _init_params(key):
    def uni(k, shape, fan_in):
        bound = 1.0 / jnp.sqrt(float(fan_in))
        return jax.random.uniform(k, shape, jnp.float32, -bound, bound)

    keys = jax.random.split(key, 10)
    p = {}
    p["conv1_w"] = uni(keys[0], (6, 3, 5, 5), 3 * 5 * 5)
    p["conv1_b"] = uni(keys[1], (6,), 3 * 5 * 5)
    p["conv2_w"] = uni(keys[2], (16, 6, 5, 5), 6 * 5 * 5)
    p["conv2_b"] = uni(keys[3], (16,), 6 * 5 * 5)
    p["fc1_w"] = uni(keys[4], (120, 400), 400)
    p["fc1_b"] = uni(keys[5], (120,), 400)
    p["fc2_w"] = uni(keys[6], (84, 120), 120)
    p["fc2_b"] = uni(keys[7], (84,), 120)
    p["fc3_w"] = uni(keys[8], (10, 84), 84)
    p["fc3_b"] = uni(keys[9], (10,), 84)
    return p


def prepare_params(p):
    """One-time conversion to kernel layout.

    conv weights -> [KH*KW*IC, 128] im2col order, OC zero-padded to 128 lanes.
    fc1 weight   -> [25*128, 128]: row index = (ph*5 + pw)*128 + c with the
                    real 16 channels scattered into the 128-lane slots the
                    fused kernel produces on-chip; padded rows/cols are zero.
    fc2/fc3      -> pre-transposed and padded to [128, 128]; biases [1, 128].
    """
    def pad_cols(w):
        return jnp.pad(w, ((0, 0), (0, _LANES - w.shape[1])))

    def pad_bias(b):
        return jnp.pad(b, (0, _LANES - b.shape[0])).reshape(1, _LANES)

    q = {}
    q["c1_w"] = pad_cols(p["conv1_w"].transpose(2, 3, 1, 0).reshape(75, 6))
    q["c1_b"] = pad_bias(p["conv1_b"])
    q["c2_w"] = pad_cols(p["conv2_w"].transpose(2, 3, 1, 0).reshape(150, 16))
    q["c2_b"] = pad_bias(p["conv2_b"])
    f1 = p["fc1_w"].reshape(120, 16, 5, 5).transpose(2, 3, 1, 0)  # (ph,pw,c,j)
    f1 = jnp.pad(f1, ((0, 0), (0, 0), (0, _LANES - 16), (0, 0)))
    q["f1_w"] = pad_cols(f1.reshape(25 * _LANES, 120))
    q["f1_b"] = pad_bias(p["fc1_b"])
    q["f2_w"] = jnp.pad(p["fc2_w"].T, ((0, _LANES - 120), (0, _LANES - 84)))
    q["f2_b"] = pad_bias(p["fc2_b"])
    q["f3_w"] = jnp.pad(p["fc3_w"].T, ((0, _LANES - 84), (0, _LANES - 10)))
    q["f3_b"] = pad_bias(p["fc3_b"])
    return q


# ----------------------------------------------------------------------------
# Forward pass (mirrors SimpleCNN.forward)
# ----------------------------------------------------------------------------
def simple_cnn_forward(qp, x):
    """x: [N, 3, 32, 32] (NCHW, as in PyTorch) -> logits [N, 10]."""
    n = x.shape[0]
    xh = jnp.transpose(x, (0, 2, 3, 1))               # boundary NCHW -> NHWC

    # conv1(3->6) + ReLU + pool : one matmul over 4 pool offsets.
    p1, (ph, pw) = _pool_patches(xh, 5, 5)
    h = _conv_relu_pool(p1, qp["c1_w"], qp["c1_b"])   # [N*14*14, 128]
    h = h.reshape(n, ph, pw, _LANES)

    # conv2(6->16) + ReLU + pool + fc1/fc2/fc3, fused in ONE kernel.
    # Channel slice hoisted out of the 25-tap loop; rows ordered (ph, pw, n).
    p2, _ = _pool_patches(h[..., :6], 5, 5, pos_major=True)
    out = _conv2_mlp(p2, qp, n)                       # [N, 128] padded logits
    return out[:, :10]


# Pure-JAX reference (PyTorch semantics) for correctness checking.
def _reference_forward(params, x):
    def conv(x, w, b):
        y = jax.lax.conv_general_dilated(
            x, w, (1, 1), "VALID",
            dimension_numbers=("NCHW", "OIHW", "NCHW"))
        return jax.nn.relu(y + b.reshape(1, -1, 1, 1))

    def pool(x):
        n, c, h, w = x.shape
        return jnp.max(x.reshape(n, c, h // 2, 2, w // 2, 2), axis=(3, 5))

    x = pool(conv(x, params["conv1_w"], params["conv1_b"]))
    x = pool(conv(x, params["conv2_w"], params["conv2_b"]))
    x = x.reshape(-1, 400)
    x = jax.nn.relu(x @ params["fc1_w"].T + params["fc1_b"])
    x = jax.nn.relu(x @ params["fc2_w"].T + params["fc2_b"])
    return x @ params["fc3_w"].T + params["fc3_b"]


if __name__ == "__main__":
    key = jax.random.PRNGKey(0)
    k_x, k_p = jax.random.split(key)
    # 32x32x3 input is required by fc1 (16*5*5); batch = 2.
    x = jax.random.normal(k_x, (2, 3, 32, 32), jnp.float32)
    params = _init_params(k_p)
    qparams = prepare_params(params)          # one-time weight layout transform

    fwd = jax.jit(simple_cnn_forward)
    out = jax.block_until_ready(fwd(qparams, x))
    assert out.shape == (2, 10), out.shape

    ref = _reference_forward(params, x)
    assert jnp.allclose(out, ref, atol=1e-4, rtol=1e-4), (
        "mismatch vs reference, max abs diff = "
        f"{float(jnp.max(jnp.abs(out - ref)))}")

    print("KERNEL_OK")
</pallas_src>

<mosaic_0001>
module attributes {stable_mosaic.version = 11 : i64} {
  func.func @_conv_relu_pool_kernel(%arg0: memref<1568x75xf32, #tpu.memory_space<vmem>>, %arg1: memref<75x128xf32, #tpu.memory_space<vmem>>, %arg2: memref<1x128xf32, #tpu.memory_space<vmem>>, %arg3: memref<392x128xf32, #tpu.memory_space<vmem>>, %arg4: memref<1568x128xf32, #tpu.memory_space<vmem>>) attributes {dimension_semantics = [], scalar_prefetch = 0 : i64, scratch_operands = 1 : i64, tpu.core_type = #tpu.core_type<tc>} {
    %c0 = arith.constant 0 : index
    %c0_0 = arith.constant 0 : index
    %0 = vector.load %arg0[%c0, %c0_0] : memref<1568x75xf32, #tpu.memory_space<vmem>>, vector<1568x75xf32>
    %c0_1 = arith.constant 0 : index
    %c0_2 = arith.constant 0 : index
    %1 = vector.load %arg1[%c0_1, %c0_2] : memref<75x128xf32, #tpu.memory_space<vmem>>, vector<75x128xf32>
    %cst = arith.constant dense<0.000000e+00> : vector<1568x128xf32>
    %2 = tpu.matmul %0, %1, %cst {dimension_numbers = #tpu.dot_dimension_numbers<[1], [0], [0], [1], [0, 0, 1, 1], [], []>} : vector<1568x75xf32>, vector<75x128xf32>, vector<1568x128xf32> -> vector<1568x128xf32>
    %c0_3 = arith.constant 0 : index
    %c0_4 = arith.constant 0 : index
    %3 = vector.load %arg4[%c0_3, %c0_4] : memref<1568x128xf32, #tpu.memory_space<vmem>>, vector<1568x128xf32>
    tpu.vector_store %arg4[%c0_3, %c0_4], %2 {strides = array<i32>} : memref<1568x128xf32, #tpu.memory_space<vmem>>, vector<1568x128xf32>,
    %c0_5 = arith.constant 0 : index
    %c0_6 = arith.constant 0 : index
    %4 = vector.load %arg4[%c0_5, %c0_6] : memref<1568x128xf32, #tpu.memory_space<vmem>>, vector<392x128xf32>
    %c392 = arith.constant 392 : index
    %c0_7 = arith.constant 0 : index
    %5 = vector.load %arg4[%c392, %c0_7] : memref<1568x128xf32, #tpu.memory_space<vmem>>, vector<392x128xf32>
    %6 = arith.maximumf %4, %5 : vector<392x128xf32>
    %c784 = arith.constant 784 : index
    %c0_8 = arith.constant 0 : index
    %7 = vector.load %arg4[%c784, %c0_8] : memref<1568x128xf32, #tpu.memory_space<vmem>>, vector<392x128xf32>
    %8 = arith.maximumf %6, %7 : vector<392x128xf32>
    %c1176 = arith.constant 1176 : index
    %c0_9 = arith.constant 0 : index
    %9 = vector.load %arg4[%c1176, %c0_9] : memref<1568x128xf32, #tpu.memory_space<vmem>>, vector<392x128xf32>
    %10 = arith.maximumf %8, %9 : vector<392x128xf32>
    %c0_10 = arith.constant 0 : index
    %c0_11 = arith.constant 0 : index
    %11 = vector.load %arg2[%c0_10, %c0_11] : memref<1x128xf32, #tpu.memory_space<vmem>>, vector<1x128xf32>
    %12 = vector.broadcast %11 : vector<1x128xf32> to vector<392x128xf32>
    %13 = arith.addf %10, %12 : vector<392x128xf32>
    %cst_12 = arith.constant 0.000000e+00 : f32
    %14 = vector.broadcast %cst_12 : f32 to vector<392x128xf32>
    %15 = arith.maximumf %13, %14 : vector<392x128xf32>
    %c0_13 = arith.constant 0 : index
    %c0_14 = arith.constant 0 : index
    %16 = vector.load %arg3[%c0_13, %c0_14] : memref<392x128xf32, #tpu.memory_space<vmem>>, vector<392x128xf32>
    tpu.vector_store %arg3[%c0_13, %c0_14], %15 {strides = array<i32>} : memref<392x128xf32, #tpu.memory_space<vmem>>, vector<392x128xf32>,
    return
  }
}

module attributes {stable_mosaic.version = 11 : i64} {
  func.func @_conv2_mlp_kernel(%arg0: memref<200x150xf32, #tpu.memory_space<vmem>>, %arg1: memref<150x128xf32, #tpu.memory_space<vmem>>, %arg2: memref<1x128xf32, #tpu.memory_space<vmem>>, %arg3: memref<3200x128xf32, #tpu.memory_space<vmem>>, %arg4: memref<1x128xf32, #tpu.memory_space<vmem>>, %arg5: memref<128x128xf32, #tpu.memory_space<vmem>>, %arg6: memref<1x128xf32, #tpu.memory_space<vmem>>, %arg7: memref<128x128xf32, #tpu.memory_space<vmem>>, %arg8: memref<1x128xf32, #tpu.memory_space<vmem>>, %arg9: memref<2x128xf32, #tpu.memory_space<vmem>>, %arg10: memref<200x128xf32, #tpu.memory_space<vmem>>, %arg11: memref<50x128xf32, #tpu.memory_space<vmem>>, %arg12: memref<2x3200xf32, #tpu.memory_space<vmem>>) attributes {dimension_semantics = [], scalar_prefetch = 0 : i64, scratch_operands = 3 : i64, tpu.core_type = #tpu.core_type<tc>} {
    %c0 = arith.constant 0 : index
    %c0_0 = arith.constant 0 : index
    %0 = vector.load %arg0[%c0, %c0_0] : memref<200x150xf32, #tpu.memory_space<vmem>>, vector<200x150xf32>
    %c0_1 = arith.constant 0 : index
    %c0_2 = arith.constant 0 : index
    %1 = vector.load %arg1[%c0_1, %c0_2] : memref<150x128xf32, #tpu.memory_space<vmem>>, vector<150x128xf32>
    %cst = arith.constant dense<0.000000e+00> : vector<200x128xf32>
    %2 = tpu.matmul %0, %1, %cst {dimension_numbers = #tpu.dot_dimension_numbers<[1], [0], [0], [1], [0, 0, 1, 1], [], []>} : vector<200x150xf32>, vector<150x128xf32>, vector<200x128xf32> -> vector<200x128xf32>
    %c0_3 = arith.constant 0 : index
    %c0_4 = arith.constant 0 : index
    %3 = vector.load %arg10[%c0_3, %c0_4] : memref<200x128xf32, #tpu.memory_space<vmem>>, vector<200x128xf32>
    tpu.vector_store %arg10[%c0_3, %c0_4], %2 {strides = array<i32>} : memref<200x128xf32, #tpu.memory_space<vmem>>, vector<200x128xf32>,
    %c0_5 = arith.constant 0 : index
    %c0_6 = arith.constant 0 : index
    %4 = vector.load %arg10[%c0_5, %c0_6] : memref<200x128xf32, #tpu.memory_space<vmem>>, vector<50x128xf32>
    %c50 = arith.constant 50 : index
    %c0_7 = arith.constant 0 : index
    %5 = vector.load %arg10[%c50, %c0_7] : memref<200x128xf32, #tpu.memory_space<vmem>>, vector<50x128xf32>
    %6 = arith.maximumf %4, %5 : vector<50x128xf32>
    %c100 = arith.constant 100 : index
    %c0_8 = arith.constant 0 : index
    %7 = vector.load %arg10[%c100, %c0_8] : memref<200x128xf32, #tpu.memory_space<vmem>>, vector<50x128xf32>
    %8 = arith.maximumf %6, %7 : vector<50x128xf32>
    %c150 = arith.constant 150 : index
    %c0_9 = arith.constant 0 : index
    %9 = vector.load %arg10[%c150, %c0_9] : memref<200x128xf32, #tpu.memory_space<vmem>>, vector<50x128xf32>
    %10 = arith.maximumf %8, %9 : vector<50x128xf32>
    %c0_10 = arith.constant 0 : index
    %c0_11 = arith.constant 0 : index
    %11 = vector.load %arg2[%c0_10, %c0_11] : memref<1x128xf32, #tpu.memory_space<vmem>>, vector<1x128xf32>
    %12 = vector.broadcast %11 : vector<1x128xf32> to vector<50x128xf32>
    %13 = arith.addf %10, %12 : vector<50x128xf32>
    %cst_12 = arith.constant 0.000000e+00 : f32
    %14 = vector.broadcast %cst_12 : f32 to vector<50x128xf32>
    %15 = arith.maximumf %13, %14 : vector<50x128xf32>
    %c0_13 = arith.constant 0 : index
    %c0_14 = arith.constant 0 : index
    %16 = vector.load %arg11[%c0_13, %c0_14] : memref<50x128xf32, #tpu.memory_space<vmem>>, vector<50x128xf32>
    tpu.vector_store %arg11[%c0_13, %c0_14], %15 {strides = array<i32>} : memref<50x128xf32, #tpu.memory_space<vmem>>, vector<50x128xf32>,
    %c0_15 = arith.constant 0 : index
    %c0_16 = arith.constant 0 : index
    %17 = vector.load %arg11[%c0_15, %c0_16] : memref<50x128xf32, #tpu.memory_space<vmem>>, vector<2x128xf32>
    %c0_17 = arith.constant 0 : index
    %c0_18 = arith.constant 0 : index
    %18 = vector.load %arg12[%c0_17, %c0_18] : memref<2x3200xf32, #tpu.memory_space<vmem>>, vector<2x128xf32>
    tpu.vector_store %arg12[%c0_17, %c0_18], %17 {strides = array<i32>} : memref<2x3200xf32, #tpu.memory_space<vmem>>, vector<2x128xf32>,
    %c2 = arith.constant 2 : index
    %c0_19 = arith.constant 0 : index
    %19 = vector.load %arg11[%c2, %c0_19] : memref<50x128xf32, #tpu.memory_space<vmem>>, vector<2x128xf32>
    %c0_20 = arith.constant 0 : index
    %c128 = arith.constant 128 : index
    %20 = vector.load %arg12[%c0_20, %c128] : memref<2x3200xf32, #tpu.memory_space<vmem>>, vector<2x128xf32>
    tpu.vector_store %arg12[%c0_20, %c128], %19 {strides = array<i32>} : memref<2x3200xf32, #tpu.memory_space<vmem>>, vector<2x128xf32>,
    %c4 = arith.constant 4 : index
    %c0_21 = arith.constant 0 : index
    %21 = vector.load %arg11[%c4, %c0_21] : memref<50x128xf32, #tpu.memory_space<vmem>>, vector<2x128xf32>
    %c0_22 = arith.constant 0 : index
    %c256 = arith.constant 256 : index
    %22 = vector.load %arg12[%c0_22, %c256] : memref<2x3200xf32, #tpu.memory_space<vmem>>, vector<2x128xf32>
    tpu.vector_store %arg12[%c0_22, %c256], %21 {strides = array<i32>} : memref<2x3200xf32, #tpu.memory_space<vmem>>, vector<2x128xf32>,
    %c6 = arith.constant 6 : index
    %c0_23 = arith.constant 0 : index
    %23 = vector.load %arg11[%c6, %c0_23] : memref<50x128xf32, #tpu.memory_space<vmem>>, vector<2x128xf32>
    %c0_24 = arith.constant 0 : index
    %c384 = arith.constant 384 : index
    %24 = vector.load %arg12[%c0_24, %c384] : memref<2x3200xf32, #tpu.memory_space<vmem>>, vector<2x128xf32>
    tpu.vector_store %arg12[%c0_24, %c384], %23 {strides = array<i32>} : memref<2x3200xf32, #tpu.memory_space<vmem>>, vector<2x128xf32>,
    %c8 = arith.constant 8 : index
    %c0_25 = arith.constant 0 : index
    %25 = vector.load %arg11[%c8, %c0_25] : memref<50x128xf32, #tpu.memory_space<vmem>>, vector<2x128xf32>
    %c0_26 = arith.constant 0 : index
    %c512 = arith.constant 512 : index
    %26 = vector.load %arg12[%c0_26, %c512] : memref<2x3200xf32, #tpu.memory_space<vmem>>, vector<2x128xf32>
    tpu.vector_store %arg12[%c0_26, %c512], %25 {strides = array<i32>} : memref<2x3200xf32, #tpu.memory_space<vmem>>, vector<2x128xf32>,
    %c10 = arith.constant 10 : index
    %c0_27 = arith.constant 0 : index
    %27 = vector.load %arg11[%c10, %c0_27] : memref<50x128xf32, #tpu.memory_space<vmem>>, vector<2x128xf32>
    %c0_28 = arith.constant 0 : index
    %c640 = arith.constant 640 : index
    %28 = vector.load %arg12[%c0_28, %c640] : memref<2x3200xf32, #tpu.memory_space<vmem>>, vector<2x128xf32>
    tpu.vector_store %arg12[%c0_28, %c640], %27 {strides = array<i32>} : memref<2x3200xf32, #tpu.memory_space<vmem>>, vector<2x128xf32>,
    %c12 = arith.constant 12 : index
    %c0_29 = arith.constant 0 : index
    %29 = vector.load %arg11[%c12, %c0_29] : memref<50x128xf32, #tpu.memory_space<vmem>>, vector<2x128xf32>
    %c0_30 = arith.constant 0 : index
    %c768 = arith.constant 768 : index
    %30 = vector.load %arg12[%c0_30, %c768] : memref<2x3200xf32, #tpu.memory_space<vmem>>, vector<2x128xf32>
    tpu.vector_store %arg12[%c0_30, %c768], %29 {strides = array<i32>} : memref<2x3200xf32, #tpu.memory_space<vmem>>, vector<2x128xf32>,
    %c14 = arith.constant 14 : index
    %c0_31 = arith.constant 0 : index
    %31 = vector.load %arg11[%c14, %c0_31] : memref<50x128xf32, #tpu.memory_space<vmem>>, vector<2x128xf32>
    %c0_32 = arith.constant 0 : index
    %c896 = arith.constant 896 : index
    %32 = vector.load %arg12[%c0_32, %c896] : memref<2x3200xf32, #tpu.memory_space<vmem>>, vector<2x128xf32>
    tpu.vector_store %arg12[%c0_32, %c896], %31 {strides = array<i32>} : memref<2x3200xf32, #tpu.memory_space<vmem>>, vector<2x128xf32>,
    %c16 = arith.constant 16 : index
    %c0_33 = arith.constant 0 : index
    %33 = vector.load %arg11[%c16, %c0_33] : memref<50x128xf32, #tpu.memory_space<vmem>>, vector<2x128xf32>
    %c0_34 = arith.constant 0 : index
    %c1024 = arith.constant 1024 : index
    %34 = vector.load %arg12[%c0_34, %c1024] : memref<2x3200xf32, #tpu.memory_space<vmem>>, vector<2x128xf32>
    tpu.vector_store %arg12[%c0_34, %c1024], %33 {strides = array<i32>} : memref<2x3200xf32, #tpu.memory_space<vmem>>, vector<2x128xf32>,
    %c18 = arith.constant 18 : index
    %c0_35 = arith.constant 0 : index
    %35 = vector.load %arg11[%c18, %c0_35] : memref<50x128xf32, #tpu.memory_space<vmem>>, vector<2x128xf32>
    %c0_36 = arith.constant 0 : index
    %c1152 = arith.constant 1152 : index
    %36 = vector.load %arg12[%c0_36, %c1152] : memref<2x3200xf32, #tpu.memory_space<vmem>>, vector<2x128xf32>
    tpu.vector_store %arg12[%c0_36, %c1152], %35 {strides = array<i32>} : memref<2x3200xf32, #tpu.memory_space<vmem>>, vector<2x128xf32>,
    %c20 = arith.constant 20 : index
    %c0_37 = arith.constant 0 : index
    %37 = vector.load %arg11[%c20, %c0_37] : memref<50x128xf32, #tpu.memory_space<vmem>>, vector<2x128xf32>
    %c0_38 = arith.constant 0 : index
    %c1280 = arith.constant 1280 : index
    %38 = vector.load %arg12[%c0_38, %c1280] : memref<2x3200xf32, #tpu.memory_space<vmem>>, vector<2x128xf32>
    tpu.vector_store %arg12[%c0_38, %c1280], %37 {strides = array<i32>} : memref<2x3200xf32, #tpu.memory_space<vmem>>, vector<2x128xf32>,
    %c22 = arith.constant 22 : index
    %c0_39 = arith.constant 0 : index
    %39 = vector.load %arg11[%c22, %c0_39] : memref<50x128xf32, #tpu.memory_space<vmem>>, vector<2x128xf32>
    %c0_40 = arith.constant 0 : index
    %c1408 = arith.constant 1408 : index
    %40 = vector.load %arg12[%c0_40, %c1408] : memref<2x3200xf32, #tpu.memory_space<vmem>>, vector<2x128xf32>
    tpu.vector_store %arg12[%c0_40, %c1408], %39 {strides = array<i32>} : memref<2x3200xf32, #tpu.memory_space<vmem>>, vector<2x128xf32>,
    %c24 = arith.constant 24 : index
    %c0_41 = arith.constant 0 : index
    %41 = vector.load %arg11[%c24, %c0_41] : memref<50x128xf32, #tpu.memory_space<vmem>>, vector<2x128xf32>
    %c0_42 = arith.constant 0 : index
    %c1536 = arith.constant 1536 : index
    %42 = vector.load %arg12[%c0_42, %c1536] : memref<2x3200xf32, #tpu.memory_space<vmem>>, vector<2x128xf32>
    tpu.vector_store %arg12[%c0_42, %c1536], %41 {strides = array<i32>} : memref<2x3200xf32, #tpu.memory_space<vmem>>, vector<2x128xf32>,
    %c26 = arith.constant 26 : index
    %c0_43 = arith.constant 0 : index
    %43 = vector.load %arg11[%c26, %c0_43] : memref<50x128xf32, #tpu.memory_space<vmem>>, vector<2x128xf32>
    %c0_44 = arith.constant 0 : index
    %c1664 = arith.constant 1664 : index
    %44 = vector.load %arg12[%c0_44, %c1664] : memref<2x3200xf32, #tpu.memory_space<vmem>>, vector<2x128xf32>
    tpu.vector_store %arg12[%c0_44, %c1664], %43 {strides = array<i32>} : memref<2x3200xf32, #tpu.memory_space<vmem>>, vector<2x128xf32>,
    %c28 = arith.constant 28 : index
    %c0_45 = arith.constant 0 : index
    %45 = vector.load %arg11[%c28, %c0_45] : memref<50x128xf32, #tpu.memory_space<vmem>>, vector<2x128xf32>
    %c0_46 = arith.constant 0 : index
    %c1792 = arith.constant 1792 : index
    %46 = vector.load %arg12[%c0_46, %c1792] : memref<2x3200xf32, #tpu.memory_space<vmem>>, vector<2x128xf32>
    tpu.vector_store %arg12[%c0_46, %c1792], %45 {strides = array<i32>} : memref<2x3200xf32, #tpu.memory_space<vmem>>, vector<2x128xf32>,
    %c30 = arith.constant 30 : index
    %c0_47 = arith.constant 0 : index
    %47 = vector.load %arg11[%c30, %c0_47] : memref<50x128xf32, #tpu.memory_space<vmem>>, vector<2x128xf32>
    %c0_48 = arith.constant 0 : index
    %c1920 = arith.constant 1920 : index
    %48 = vector.load %arg12[%c0_48, %c1920] : memref<2x3200xf32, #tpu.memory_space<vmem>>, vector<2x128xf32>
    tpu.vector_store %arg12[%c0_48, %c1920], %47 {strides = array<i32>} : memref<2x3200xf32, #tpu.memory_space<vmem>>, vector<2x128xf32>,
    %c32 = arith.constant 32 : index
    %c0_49 = arith.constant 0 : index
    %49 = vector.load %arg11[%c32, %c0_49] : memref<50x128xf32, #tpu.memory_space<vmem>>, vector<2x128xf32>
    %c0_50 = arith.constant 0 : index
    %c2048 = arith.constant 2048 : index
    %50 = vector.load %arg12[%c0_50, %c2048] : memref<2x3200xf32, #tpu.memory_space<vmem>>, vector<2x128xf32>
    tpu.vector_store %arg12[%c0_50, %c2048], %49 {strides = array<i32>} : memref<2x3200xf32, #tpu.memory_space<vmem>>, vector<2x128xf32>,
    %c34 = arith.constant 34 : index
    %c0_51 = arith.constant 0 : index
    %51 = vector.load %arg11[%c34, %c0_51] : memref<50x128xf32, #tpu.memory_space<vmem>>, vector<2x128xf32>
    %c0_52 = arith.constant 0 : index
    %c2176 = arith.constant 2176 : index
    %52 = vector.load %arg12[%c0_52, %c2176] : memref<2x3200xf32, #tpu.memory_space<vmem>>, vector<2x128xf32>
    tpu.vector_store %arg12[%c0_52, %c2176], %51 {strides = array<i32>} : memref<2x3200xf32, #tpu.memory_space<vmem>>, vector<2x128xf32>,
    %c36 = arith.constant 36 : index
    %c0_53 = arith.constant 0 : index
    %53 = vector.load %arg11[%c36, %c0_53] : memref<50x128xf32, #tpu.memory_space<vmem>>, vector<2x128xf32>
    %c0_54 = arith.constant 0 : index
    %c2304 = arith.constant 2304 : index
    %54 = vector.load %arg12[%c0_54, %c2304] : memref<2x3200xf32, #tpu.memory_space<vmem>>, vector<2x128xf32>
    tpu.vector_store %arg12[%c0_54, %c2304], %53 {strides = array<i32>} : memref<2x3200xf32, #tpu.memory_space<vmem>>, vector<2x128xf32>,
    %c38 = arith.constant 38 : index
    %c0_55 = arith.constant 0 : index
    %55 = vector.load %arg11[%c38, %c0_55] : memref<50x128xf32, #tpu.memory_space<vmem>>, vector<2x128xf32>
    %c0_56 = arith.constant 0 : index
    %c2432 = arith.constant 2432 : index
    %56 = vector.load %arg12[%c0_56, %c2432] : memref<2x3200xf32, #tpu.memory_space<vmem>>, vector<2x128xf32>
    tpu.vector_store %arg12[%c0_56, %c2432], %55 {strides = array<i32>} : memref<2x3200xf32, #tpu.memory_space<vmem>>, vector<2x128xf32>,
    %c40 = arith.constant 40 : index
    %c0_57 = arith.constant 0 : index
    %57 = vector.load %arg11[%c40, %c0_57] : memref<50x128xf32, #tpu.memory_space<vmem>>, vector<2x128xf32>
    %c0_58 = arith.constant 0 : index
    %c2560 = arith.constant 2560 : index
    %58 = vector.load %arg12[%c0_58, %c2560] : memref<2x3200xf32, #tpu.memory_space<vmem>>, vector<2x128xf32>
    tpu.vector_store %arg12[%c0_58, %c2560], %57 {strides = array<i32>} : memref<2x3200xf32, #tpu.memory_space<vmem>>, vector<2x128xf32>,
    %c42 = arith.constant 42 : index
    %c0_59 = arith.constant 0 : index
    %59 = vector.load %arg11[%c42, %c0_59] : memref<50x128xf32, #tpu.memory_space<vmem>>, vector<2x128xf32>
    %c0_60 = arith.constant 0 : index
    %c2688 = arith.constant 2688 : index
    %60 = vector.load %arg12[%c0_60, %c2688] : memref<2x3200xf32, #tpu.memory_space<vmem>>, vector<2x128xf32>
    tpu.vector_store %arg12[%c0_60, %c2688], %59 {strides = array<i32>} : memref<2x3200xf32, #tpu.memory_space<vmem>>, vector<2x128xf32>,
    %c44 = arith.constant 44 : index
    %c0_61 = arith.constant 0 : index
    %61 = vector.load %arg11[%c44, %c0_61] : memref<50x128xf32, #tpu.memory_space<vmem>>, vector<2x128xf32>
    %c0_62 = arith.constant 0 : index
    %c2816 = arith.constant 2816 : index
    %62 = vector.load %arg12[%c0_62, %c2816] : memref<2x3200xf32, #tpu.memory_space<vmem>>, vector<2x128xf32>
    tpu.vector_store %arg12[%c0_62, %c2816], %61 {strides = array<i32>} : memref<2x3200xf32, #tpu.memory_space<vmem>>, vector<2x128xf32>,
    %c46 = arith.constant 46 : index
    %c0_63 = arith.constant 0 : index
    %63 = vector.load %arg11[%c46, %c0_63] : memref<50x128xf32, #tpu.memory_space<vmem>>, vector<2x128xf32>
    %c0_64 = arith.constant 0 : index
    %c2944 = arith.constant 2944 : index
    %64 = vector.load %arg12[%c0_64, %c2944] : memref<2x3200xf32, #tpu.memory_space<vmem>>, vector<2x128xf32>
    tpu.vector_store %arg12[%c0_64, %c2944], %63 {strides = array<i32>} : memref<2x3200xf32, #tpu.memory_space<vmem>>, vector<2x128xf32>,
    %c48 = arith.constant 48 : index
    %c0_65 = arith.constant 0 : index
    %65 = vector.load %arg11[%c48, %c0_65] : memref<50x128xf32, #tpu.memory_space<vmem>>, vector<2x128xf32>
    %c0_66 = arith.constant 0 : index
    %c3072 = arith.constant 3072 : index
    %66 = vector.load %arg12[%c0_66, %c3072] : memref<2x3200xf32, #tpu.memory_space<vmem>>, vector<2x128xf32>
    tpu.vector_store %arg12[%c0_66, %c3072], %65 {strides = array<i32>} : memref<2x3200xf32, #tpu.memory_space<vmem>>, vector<2x128xf32>,
    %c0_67 = arith.constant 0 : index
    %c0_68 = arith.constant 0 : index
    %67 = vector.load %arg12[%c0_67, %c0_68] : memref<2x3200xf32, #tpu.memory_space<vmem>>, vector<2x3200xf32>
    %c0_69 = arith.constant 0 : index
    %c0_70 = arith.constant 0 : index
    %68 = vector.load %arg3[%c0_69, %c0_70] : memref<3200x128xf32, #tpu.memory_space<vmem>>, vector<3200x128xf32>
    %cst_71 = arith.constant dense<0.000000e+00> : vector<2x128xf32>
    %69 = tpu.matmul %67, %68, %cst_71 {dimension_numbers = #tpu.dot_dimension_numbers<[1], [0], [0], [1], [0, 0, 1, 1], [], []>} : vector<2x3200xf32>, vector<3200x128xf32>, vector<2x128xf32> -> vector<2x128xf32>
    %c0_72 = arith.constant 0 : index
    %c0_73 = arith.constant 0 : index
    %70 = vector.load %arg4[%c0_72, %c0_73] : memref<1x128xf32, #tpu.memory_space<vmem>>, vector<1x128xf32>
    %71 = vector.broadcast %70 : vector<1x128xf32> to vector<2x128xf32>
    %72 = arith.addf %69, %71 : vector<2x128xf32>
    %cst_74 = arith.constant 0.000000e+00 : f32
    %73 = vector.broadcast %cst_74 : f32 to vector<2x128xf32>
    %74 = arith.maximumf %72, %73 : vector<2x128xf32>
    %c0_75 = arith.constant 0 : index
    %c0_76 = arith.constant 0 : index
    %75 = vector.load %arg5[%c0_75, %c0_76] : memref<128x128xf32, #tpu.memory_space<vmem>>, vector<128x128xf32>
    %cst_77 = arith.constant dense<0.000000e+00> : vector<2x128xf32>
    %76 = tpu.matmul %74, %75, %cst_77 {dimension_numbers = #tpu.dot_dimension_numbers<[1], [0], [0], [1], [0, 0, 1, 1], [], []>} : vector<2x128xf32>, vector<128x128xf32>, vector<2x128xf32> -> vector<2x128xf32>
    %c0_78 = arith.constant 0 : index
    %c0_79 = arith.constant 0 : index
    %77 = vector.load %arg6[%c0_78, %c0_79] : memref<1x128xf32, #tpu.memory_space<vmem>>, vector<1x128xf32>
    %78 = vector.broadcast %77 : vector<1x128xf32> to vector<2x128xf32>
    %79 = arith.addf %76, %78 : vector<2x128xf32>
    %cst_80 = arith.constant 0.000000e+00 : f32
    %80 = vector.broadcast %cst_80 : f32 to vector<2x128xf32>
    %81 = arith.maximumf %79, %80 : vector<2x128xf32>
    %c0_81 = arith.constant 0 : index
    %c0_82 = arith.constant 0 : index
    %82 = vector.load %arg7[%c0_81, %c0_82] : memref<128x128xf32, #tpu.memory_space<vmem>>, vector<128x128xf32>
    %cst_83 = arith.constant dense<0.000000e+00> : vector<2x128xf32>
    %83 = tpu.matmul %81, %82, %cst_83 {dimension_numbers = #tpu.dot_dimension_numbers<[1], [0], [0], [1], [0, 0, 1, 1], [], []>} : vector<2x128xf32>, vector<128x128xf32>, vector<2x128xf32> -> vector<2x128xf32>
    %c0_84 = arith.constant 0 : index
    %c0_85 = arith.constant 0 : index
    %84 = vector.load %arg8[%c0_84, %c0_85] : memref<1x128xf32, #tpu.memory_space<vmem>>, vector<1x128xf32>
    %85 = vector.broadcast %84 : vector<1x128xf32> to vector<2x128xf32>
    %86 = arith.addf %83, %85 : vector<2x128xf32>
    %c0_86 = arith.constant 0 : index
    %c0_87 = arith.constant 0 : index
    %87 = vector.load %arg9[%c0_86, %c0_87] : memref<2x128xf32, #tpu.memory_space<vmem>>, vector<2x128xf32>
    tpu.vector_store %arg9[%c0_86, %c0_87], %86 {strides = array<i32>} : memref<2x128xf32, #tpu.memory_space<vmem>>, vector<2x128xf32>,
    return
  }
}

</mosaic_0001>

<bundles_post_ra>
// kernel: simple_cnn_forward.2
= control target key start
LH: loop header
LB: loop body
LE: loop exit
PB: predicated region body
PF: predicated region fallthrough
CT: control target
= control target key end

     0   :  { %vm220_vm0 = vcmask 613376   ;;  %vm809_vm1 = vcmask 1042432   ;;  %vm3306_vm2 = vmmov 1   ;;  %s4636_s1 = inlined_call_operand.vmem [shape: f32[75,128], index: 1, kind: input, shape index: {}]   ;;  %s4637_s0 = inlined_call_operand.vmem [shape: f32[1568,75], index: 0, kind: input, shape index: {}]   ;;  %s4638_s2 = inlined_call_operand.vmem [shape: f32[1,128], index: 2, kind: input, shape index: {}]   ;;  %s4639_s3 = inlined_call_operand.vmem [shape: f32[392,128], index: 3, kind: output, shape index: {}]  }
   0x1   :  { %v210_v0 = vld [vmem:[%s4636_s1] sm:$0xff]  ;;  %v211_v1 = vld [vmem:[%s4636_s1 + $0x8] sm:$0xff]  ;;  %v212_v2 = vld [vmem:[%s4636_s1 + $0x10] sm:$0xff] }
   0x2   :  { %v3273_v3 = vpack.c.bf16 %v211_v1, %v210_v0  ;;  %v213_v4 = vld [vmem:[%s4636_s1 + $0x18] sm:$0xff]  ;;  %v214_v6 = vld [vmem:[%s4636_s1 + $0x20] sm:$0xff]  ;;  %v215_v7 = vld [vmem:[%s4636_s1 + $0x28] sm:$0xff] }
   0x3   :  { %v3277_v5 = vpack.c.bf16 %v213_v4, %v212_v2  ;;  %v14_v8 = vld [vmem:[%s4637_s0] sm:$0xff]  ;;  %v112_v9 = vld [vmem:[%s4637_s0 + $0x310] sm:$0xff]  ;;  %v3281_v10 = vpack.c.bf16 %v215_v7, %v214_v6  ;;  %v217_v12 = vld [vmem:[%s4636_s1 + $0x38] sm:$0xff] }
   0x4   :  { %3274 = vmatprep.subr.bf16.mxu0 %v3273_v3  ;;  %3295 = vmatprep.subr.bf16.mxu1 %v3273_v3  ;;  %v216_v11 = vld [vmem:[%s4636_s1 + $0x30] sm:$0xff]  ;;  %v218_v14 = vld [vmem:[%s4636_s1 + $0x40] sm:$0xff]  ;;  %v219_v15 = vld [vmem:[%s4636_s1 + $0x48] sm:$0x7] }
   0x5   :  { %3276 = vmatpush3.bf16.msra.mxu0 %v3273_v3  ;;  %3300 = vmatpush3.bf16.msra.mxu1 %v3273_v3  ;;  %v3285_v13 = vpack.c.bf16 %v217_v12, %v216_v11  ;;  %v3289_v16 = vpack.c.bf16 %v219_v15, %v218_v14  ;;  %vm3290_vm3 = vmpackc.low %vm809_vm1, %vm3306_vm2  ;;  %v15_v17 = vld [vmem:[%s4637_s0 + $0x8] sm:$0xff]  ;;  %v113_v18 = vld [vmem:[%s4637_s0 + $0x318] sm:$0xff] }
   0x6   :  { %3278 = vmatprep.subr.bf16.mxu0 %v3277_v5  ;;  %3296 = vmatprep.subr.bf16.mxu1 %v3277_v5  ;;  %v16_v19 = vld [vmem:[%s4637_s0 + $0x10] sm:$0xff]  ;;  %v114_v20 = vld [vmem:[%s4637_s0 + $0x320] sm:$0xff]  ;;  %v17_v21 = vld [vmem:[%s4637_s0 + $0x18] sm:$0xff] }
   0x7   :  { %2979 = vmatprep.mubr.msk.f32.mxu0 %vm220_vm0, %v14_v8  ;;  %3126 = vmatprep.mubr.msk.f32.mxu1 %vm220_vm0, %v112_v9  ;;  %v115_v22 = vld [vmem:[%s4637_s0 + $0x328] sm:$0xff]  ;;  %v18_v23 = vld [vmem:[%s4637_s0 + $0x20] sm:$0xff]  ;;  %v116_v24 = vld [vmem:[%s4637_s0 + $0x330] sm:$0xff] }
   0x8   :  { %v19_v25 = vld [vmem:[%s4637_s0 + $0x28] sm:$0xff]  ;;  %v117_v26 = vld [vmem:[%s4637_s0 + $0x338] sm:$0xff]  ;;  %v20_v27 = vld [vmem:[%s4637_s0 + $0x30] sm:$0xff] }
   0x9   :  { %3280 = vmatpush3.bf16.msra.mxu0 %v3277_v5  ;;  %3301 = vmatpush3.bf16.msra.mxu1 %v3277_v5  ;;  %v118_v28 = vld [vmem:[%s4637_s0 + $0x340] sm:$0xff]  ;;  %v21_v29 = vld [vmem:[%s4637_s0 + $0x38] sm:$0xff]  ;;  %v119_v30 = vld [vmem:[%s4637_s0 + $0x348] sm:$0xff] }
   0xa   :  { %3282 = vmatprep.subr.bf16.mxu0 %v3281_v10  ;;  %3297 = vmatprep.subr.bf16.mxu1 %v3281_v10  ;;  %v22_v31 = vld [vmem:[%s4637_s0 + $0x40] sm:$0xff]  ;;  %v120_v32 = vld [vmem:[%s4637_s0 + $0x350] sm:$0xff]  ;;  %v23_v33 = vld [vmem:[%s4637_s0 + $0x48] sm:$0xff] }
   0xb   :  { %v121_v34 = vld [vmem:[%s4637_s0 + $0x358] sm:$0xff]  ;;  %v24_v35 = vld [vmem:[%s4637_s0 + $0x50] sm:$0xff]  ;;  %v122_v36 = vld [vmem:[%s4637_s0 + $0x360] sm:$0xff] }
   0xc   :  { %v25_v37 = vld [vmem:[%s4637_s0 + $0x58] sm:$0xff]  ;;  %v123_v38 = vld [vmem:[%s4637_s0 + $0x368] sm:$0xff]  ;;  %v26_v39 = vld [vmem:[%s4637_s0 + $0x60] sm:$0xff] }
   0xd   :  { %3284 = vmatpush3.bf16.msra.mxu0 %v3281_v10  ;;  %3302 = vmatpush3.bf16.msra.mxu1 %v3281_v10  ;;  %v124_v40 = vld [vmem:[%s4637_s0 + $0x370] sm:$0xff]  ;;  %v27_v41 = vld [vmem:[%s4637_s0 + $0x68] sm:$0xff]  ;;  %v125_v42 = vld [vmem:[%s4637_s0 + $0x378] sm:$0xff] }
   0xe   :  { %3286 = vmatprep.subr.bf16.mxu0 %v3285_v13  ;;  %3298 = vmatprep.subr.bf16.mxu1 %v3285_v13  ;;  %v28_v43 = vld [vmem:[%s4637_s0 + $0x70] sm:$0xff]  ;;  %v126_v44 = vld [vmem:[%s4637_s0 + $0x380] sm:$0xff]  ;;  %v29_v45 = vld [vmem:[%s4637_s0 + $0x78] sm:$0xff] }
   0xf   :  { %v127_v46 = vld [vmem:[%s4637_s0 + $0x388] sm:$0xff]  ;;  %v30_v47 = vld [vmem:[%s4637_s0 + $0x80] sm:$0xff]  ;;  %v128_v48 = vld [vmem:[%s4637_s0 + $0x390] sm:$0xff] }
  0x10   :  { %v31_v49 = vld [vmem:[%s4637_s0 + $0x88] sm:$0xff]  ;;  %v129_v50 = vld [vmem:[%s4637_s0 + $0x398] sm:$0xff]  ;;  %v32_v51 = vld [vmem:[%s4637_s0 + $0x90] sm:$0xff] }
  0x11   :  { %3288 = vmatpush3.bf16.msra.mxu0 %v3285_v13  ;;  %3303 = vmatpush3.bf16.msra.mxu1 %v3285_v13  ;;  %v130_v52 = vld [vmem:[%s4637_s0 + $0x3a0] sm:$0xff]  ;;  %v33_v53 = vld [vmem:[%s4637_s0 + $0x98] sm:$0xff]  ;;  %v131_v54 = vld [vmem:[%s4637_s0 + $0x3a8] sm:$0xff] }
  0x12   :  { %3291 = vmatprep.subr.msk.bf16.mxu0 %vm3290_vm3, %v3289_v16  ;;  %3299 = vmatprep.subr.msk.bf16.mxu1 %vm3290_vm3, %v3289_v16  ;;  %v34_v55 = vld [vmem:[%s4637_s0 + $0xa0] sm:$0xff]  ;;  %v132_v56 = vld [vmem:[%s4637_s0 + $0x3b0] sm:$0xff]  ;;  %v35_v57 = vld [vmem:[%s4637_s0 + $0xa8] sm:$0xff] }
  0x13   :  { %v133_v58 = vld [vmem:[%s4637_s0 + $0x3b8] sm:$0xff]  ;;  %v36_v59 = vld [vmem:[%s4637_s0 + $0xb0] sm:$0xff]  ;;  %v134_v60 = vld [vmem:[%s4637_s0 + $0x3c0] sm:$0xff] }
  0x14   :  { %v37_v61 = vld [vmem:[%s4637_s0 + $0xb8] sm:$0xff]  ;;  %v135_v62 = vld [vmem:[%s4637_s0 + $0x3c8] sm:$0xff]  ;;  %v38_v63 = vld [vmem:[%s4637_s0 + $0xc0] sm:$0xff] }
  0x15   :  { %3294 = vmatpush3.bf16.msk.msra.mxu0 %vm3290_vm3, %v3289_v16  ;;  %3304 = vmatpush3.bf16.msk.msra.mxu1 %vm3290_vm3, %v3289_v16  ;;  %v136_v0 = vld [vmem:[%s4637_s0 + $0x3d0] sm:$0xff]  ;;  %v39_v1 = vld [vmem:[%s4637_s0 + $0xc8] sm:$0xff]  ;;  %v137_v2 = vld [vmem:[%s4637_s0 + $0x3d8] sm:$0xff] }
  0x16   :  { %v40_v3 = vld [vmem:[%s4637_s0 + $0xd0] sm:$0xff]  ;;  %v138_v4 = vld [vmem:[%s4637_s0 + $0x3e0] sm:$0xff]  ;;  %v41_v5 = vld [vmem:[%s4637_s0 + $0xd8] sm:$0xff] }
  0x17   :  { %v139_v6 = vld [vmem:[%s4637_s0 + $0x3e8] sm:$0xff]  ;;  %v42_v7 = vld [vmem:[%s4637_s0 + $0xe0] sm:$0xff]  ;;  %v140_v8 = vld [vmem:[%s4637_s0 + $0x3f0] sm:$0xff] }
  0x18   :  { %2980 = vmatmul.mubr.msk.f32.vlgmr.msra.gmra.mrb[0].mxu0 %vm220_vm0, %v15_v17  ;;  %3127 = vmatmul.mubr.msk.f32.vlgmr.msra.gmra.mrb[0].mxu1 %vm220_vm0, %v113_v18  ;;  %v43_v9 = vld [vmem:[%s4637_s0 + $0xe8] sm:$0xff]  ;;  %v141_v10 = vld [vmem:[%s4637_s0 + $0x3f8] sm:$0xff]  ;;  %v44_v11 = vld [vmem:[%s4637_s0 + $0xf0] sm:$0xff] }
  0x19   :  { %2982 = vmatprep.mubr.msk.f32.mxu0 %vm220_vm0, %v16_v19  ;;  %3129 = vmatprep.mubr.msk.f32.mxu1 %vm220_vm0, %v114_v20  ;;  %v142_v12 = vld [vmem:[%s4637_s0 + $0x400] sm:$0xff]  ;;  %v45_v13 = vld [vmem:[%s4637_s0 + $0xf8] sm:$0xff]  ;;  %v143_v14 = vld [vmem:[%s4637_s0 + $0x408] sm:$0xff] }
  0x1a   :  { %v46_v15 = vld [vmem:[%s4637_s0 + $0x100] sm:$0xff]  ;;  %v144_v16 = vld [vmem:[%s4637_s0 + $0x410] sm:$0xff]  ;;  %v47_v17 = vld [vmem:[%s4637_s0 + $0x108] sm:$0xff] }
  0x1b   :  { %v145_v18 = vld [vmem:[%s4637_s0 + $0x418] sm:$0xff]  ;;  %v48_v19 = vld [vmem:[%s4637_s0 + $0x110] sm:$0xff]  ;;  %v146_v20 = vld [vmem:[%s4637_s0 + $0x420] sm:$0xff] }
  0x1c   :  { %2983 = vmatmul.mubr.msk.f32.gmra.mrb[2].mxu0 %vm220_vm0, %v17_v21  ;;  %3130 = vmatmul.mubr.msk.f32.gmra.mrb[2].mxu1 %vm220_vm0, %v115_v22  ;;  %v49_v21 = vld [vmem:[%s4637_s0 + $0x118] sm:$0xff]  ;;  %v147_v22 = vld [vmem:[%s4637_s0 + $0x428] sm:$0xff] }
  0x1d   :  { %2985 = vmatprep.mubr.msk.f32.mxu0 %vm220_vm0, %v18_v23  ;;  %3132 = vmatprep.mubr.msk.f32.mxu1 %vm220_vm0, %v116_v24  ;;  %v50_v23 = vld [vmem:[%s4637_s0 + $0x120] sm:$0xff]  ;;  %v148_v24 = vld [vmem:[%s4637_s0 + $0x430] sm:$0xff] }
  0x20   :  { %2986 = vmatmul.mubr.msk.f32.gmra.mrb[4].mxu0 %vm220_vm0, %v19_v25  ;;  %3133 = vmatmul.mubr.msk.f32.gmra.mrb[4].mxu1 %vm220_vm0, %v117_v26  ;;  %v51_v25 = vld [vmem:[%s4637_s0 + $0x128] sm:$0xff]  ;;  %v149_v26 = vld [vmem:[%s4637_s0 + $0x438] sm:$0xff] }
  0x21   :  { %2988 = vmatprep.mubr.msk.f32.mxu0 %vm220_vm0, %v20_v27  ;;  %3135 = vmatprep.mubr.msk.f32.mxu1 %vm220_vm0, %v118_v28  ;;  %v52_v27 = vld [vmem:[%s4637_s0 + $0x130] sm:$0xff]  ;;  %v150_v28 = vld [vmem:[%s4637_s0 + $0x440] sm:$0xff] }
  0x24   :  { %2989 = vmatmul.mubr.msk.f32.gmra.mrb[6].mxu0 %vm220_vm0, %v21_v29  ;;  %3136 = vmatmul.mubr.msk.f32.gmra.mrb[6].mxu1 %vm220_vm0, %v119_v30  ;;  %v53_v29 = vld [vmem:[%s4637_s0 + $0x138] sm:$0xff]  ;;  %v151_v30 = vld [vmem:[%s4637_s0 + $0x448] sm:$0xff] }
  0x25   :  { %2991 = vmatprep.mubr.msk.f32.mxu0 %vm220_vm0, %v22_v31  ;;  %3138 = vmatprep.mubr.msk.f32.mxu1 %vm220_vm0, %v120_v32  ;;  %v54_v31 = vld [vmem:[%s4637_s0 + $0x140] sm:$0xff]  ;;  %v152_v32 = vld [vmem:[%s4637_s0 + $0x450] sm:$0xff] }
  0x28   :  { %2992 = vmatmul.mubr.msk.f32.gmra.mrb[8].mxu0 %vm220_vm0, %v23_v33  ;;  %3139 = vmatmul.mubr.msk.f32.gmra.mrb[8].mxu1 %vm220_vm0, %v121_v34  ;;  %v55_v33 = vld [vmem:[%s4637_s0 + $0x148] sm:$0xff]  ;;  %v153_v34 = vld [vmem:[%s4637_s0 + $0x458] sm:$0xff] }
  0x29   :  { %2994 = vmatprep.mubr.msk.f32.mxu0 %vm220_vm0, %v24_v35  ;;  %3141 = vmatprep.mubr.msk.f32.mxu1 %vm220_vm0, %v122_v36  ;;  %v56_v35 = vld [vmem:[%s4637_s0 + $0x150] sm:$0xff]  ;;  %v154_v36 = vld [vmem:[%s4637_s0 + $0x460] sm:$0xff] }
  0x2c   :  { %2995 = vmatmul.mubr.msk.f32.gmra.mrb[10].mxu0 %vm220_vm0, %v25_v37  ;;  %3142 = vmatmul.mubr.msk.f32.gmra.mrb[10].mxu1 %vm220_vm0, %v123_v38  ;;  %v57_v37 = vld [vmem:[%s4637_s0 + $0x158] sm:$0xff]  ;;  %v155_v38 = vld [vmem:[%s4637_s0 + $0x468] sm:$0xff] }
  0x2d   :  { %2997 = vmatprep.mubr.msk.f32.mxu0 %vm220_vm0, %v26_v39  ;;  %3144 = vmatprep.mubr.msk.f32.mxu1 %vm220_vm0, %v124_v40  ;;  %v58_v39 = vld [vmem:[%s4637_s0 + $0x160] sm:$0xff]  ;;  %v156_v40 = vld [vmem:[%s4637_s0 + $0x470] sm:$0xff] }
  0x30   :  { %2998 = vmatmul.mubr.msk.f32.gmra.mrb[12].mxu0 %vm220_vm0, %v27_v41  ;;  %3145 = vmatmul.mubr.msk.f32.gmra.mrb[12].mxu1 %vm220_vm0, %v125_v42  ;;  %v59_v41 = vld [vmem:[%s4637_s0 + $0x168] sm:$0xff]  ;;  %v157_v42 = vld [vmem:[%s4637_s0 + $0x478] sm:$0xff] }
  0x31   :  { %3000 = vmatprep.mubr.msk.f32.mxu0 %vm220_vm0, %v28_v43  ;;  %3147 = vmatprep.mubr.msk.f32.mxu1 %vm220_vm0, %v126_v44  ;;  %v60_v43 = vld [vmem:[%s4637_s0 + $0x170] sm:$0xff]  ;;  %v158_v44 = vld [vmem:[%s4637_s0 + $0x480] sm:$0xff] }
  0x34   :  { %3001 = vmatmul.mubr.msk.f32.gmra.mrb[14].mxu0 %vm220_vm0, %v29_v45  ;;  %3148 = vmatmul.mubr.msk.f32.gmra.mrb[14].mxu1 %vm220_vm0, %v127_v46  ;;  %v61_v45 = vld [vmem:[%s4637_s0 + $0x178] sm:$0xff]  ;;  %v159_v46 = vld [vmem:[%s4637_s0 + $0x488] sm:$0xff] }
  0x35   :  { %3003 = vmatprep.mubr.msk.f32.mxu0 %vm220_vm0, %v30_v47  ;;  %3150 = vmatprep.mubr.msk.f32.mxu1 %vm220_vm0, %v128_v48  ;;  %v62_v47 = vld [vmem:[%s4637_s0 + $0x180] sm:$0xff]  ;;  %v160_v48 = vld [vmem:[%s4637_s0 + $0x490] sm:$0xff] }
  0x38   :  { %3004 = vmatmul.mubr.msk.f32.gmra.mrb[16].mxu0 %vm220_vm0, %v31_v49  ;;  %3151 = vmatmul.mubr.msk.f32.gmra.mrb[16].mxu1 %vm220_vm0, %v129_v50  ;;  %v63_v49 = vld [vmem:[%s4637_s0 + $0x188] sm:$0xff]  ;;  %v161_v50 = vld [vmem:[%s4637_s0 + $0x498] sm:$0xff] }
  0x39   :  { %3006 = vmatprep.mubr.msk.f32.mxu0 %vm220_vm0, %v32_v51  ;;  %3153 = vmatprep.mubr.msk.f32.mxu1 %vm220_vm0, %v130_v52  ;;  %v64_v51 = vld [vmem:[%s4637_s0 + $0x190] sm:$0xff]  ;;  %v162_v52 = vld [vmem:[%s4637_s0 + $0x4a0] sm:$0xff] }
  0x3c   :  { %3007 = vmatmul.mubr.msk.f32.gmra.mrb[18].mxu0 %vm220_vm0, %v33_v53  ;;  %3154 = vmatmul.mubr.msk.f32.gmra.mrb[18].mxu1 %vm220_vm0, %v131_v54  ;;  %v65_v53 = vld [vmem:[%s4637_s0 + $0x198] sm:$0xff]  ;;  %v163_v54 = vld [vmem:[%s4637_s0 + $0x4a8] sm:$0xff] }
  0x3d   :  { %3009 = vmatprep.mubr.msk.f32.mxu0 %vm220_vm0, %v34_v55  ;;  %3156 = vmatprep.mubr.msk.f32.mxu1 %vm220_vm0, %v132_v56  ;;  %v66_v55 = vld [vmem:[%s4637_s0 + $0x1a0] sm:$0xff]  ;;  %v164_v56 = vld [vmem:[%s4637_s0 + $0x4b0] sm:$0xff] }
  0x40   :  { %3010 = vmatmul.mubr.msk.f32.gmra.mrb[20].mxu0 %vm220_vm0, %v35_v57  ;;  %3157 = vmatmul.mubr.msk.f32.gmra.mrb[20].mxu1 %vm220_vm0, %v133_v58  ;;  %v67_v57 = vld [vmem:[%s4637_s0 + $0x1a8] sm:$0xff]  ;;  %v165_v58 = vld [vmem:[%s4637_s0 + $0x4b8] sm:$0xff] }
  0x41   :  { %3012 = vmatprep.mubr.msk.f32.mxu0 %vm220_vm0, %v36_v59  ;;  %3159 = vmatprep.mubr.msk.f32.mxu1 %vm220_vm0, %v134_v60  ;;  %v68_v59 = vld [vmem:[%s4637_s0 + $0x1b0] sm:$0xff]  ;;  %v166_v60 = vld [vmem:[%s4637_s0 + $0x4c0] sm:$0xff] }
  0x44   :  { %3013 = vmatmul.mubr.msk.f32.gmra.mrb[22].mxu0 %vm220_vm0, %v37_v61  ;;  %3160 = vmatmul.mubr.msk.f32.gmra.mrb[22].mxu1 %vm220_vm0, %v135_v62  ;;  %v69_v61 = vld [vmem:[%s4637_s0 + $0x1b8] sm:$0xff]  ;;  %v167_v62 = vld [vmem:[%s4637_s0 + $0x4c8] sm:$0xff] }
  0x45   :  { %3015 = vmatprep.mubr.msk.f32.mxu0 %vm220_vm0, %v38_v63  ;;  %3162 = vmatprep.mubr.msk.f32.mxu1 %vm220_vm0, %v136_v0  ;;  %v70_v63 = vld [vmem:[%s4637_s0 + $0x1c0] sm:$0xff]  ;;  %v168_v0 = vld [vmem:[%s4637_s0 + $0x4d0] sm:$0xff] }
  0x48   :  { %3016 = vmatmul.mubr.msk.f32.gmra.mrb[24].mxu0 %vm220_vm0, %v39_v1  ;;  %3163 = vmatmul.mubr.msk.f32.gmra.mrb[24].mxu1 %vm220_vm0, %v137_v2  ;;  %v71_v1 = vld [vmem:[%s4637_s0 + $0x1c8] sm:$0xff]  ;;  %v169_v2 = vld [vmem:[%s4637_s0 + $0x4d8] sm:$0xff] }
  0x49   :  { %3018 = vmatprep.mubr.msk.f32.mxu0 %vm220_vm0, %v40_v3  ;;  %3165 = vmatprep.mubr.msk.f32.mxu1 %vm220_vm0, %v138_v4  ;;  %v72_v3 = vld [vmem:[%s4637_s0 + $0x1d0] sm:$0xff]  ;;  %v170_v4 = vld [vmem:[%s4637_s0 + $0x4e0] sm:$0xff] }
  0x4c   :  { %3019 = vmatmul.mubr.msk.f32.gmra.mrb[26].mxu0 %vm220_vm0, %v41_v5  ;;  %3166 = vmatmul.mubr.msk.f32.gmra.mrb[26].mxu1 %vm220_vm0, %v139_v6  ;;  %v73_v5 = vld [vmem:[%s4637_s0 + $0x1d8] sm:$0xff]  ;;  %v171_v6 = vld [vmem:[%s4637_s0 + $0x4e8] sm:$0xff] }
  0x4d   :  { %3021 = vmatprep.mubr.msk.f32.mxu0 %vm220_vm0, %v42_v7  ;;  %3168 = vmatprep.mubr.msk.f32.mxu1 %vm220_vm0, %v140_v8  ;;  %v74_v7 = vld [vmem:[%s4637_s0 + $0x1e0] sm:$0xff]  ;;  %v172_v8 = vld [vmem:[%s4637_s0 + $0x4f0] sm:$0xff] }
  0x50   :  { %3022 = vmatmul.mubr.msk.f32.gmra.mrb[28].mxu0 %vm220_vm0, %v43_v9  ;;  %3169 = vmatmul.mubr.msk.f32.gmra.mrb[28].mxu1 %vm220_vm0, %v141_v10  ;;  %v75_v9 = vld [vmem:[%s4637_s0 + $0x1e8] sm:$0xff]  ;;  %v173_v10 = vld [vmem:[%s4637_s0 + $0x4f8] sm:$0xff] }
  0x51   :  { %3024 = vmatprep.mubr.msk.f32.mxu0 %vm220_vm0, %v44_v11  ;;  %3171 = vmatprep.mubr.msk.f32.mxu1 %vm220_vm0, %v142_v12  ;;  %v76_v11 = vld [vmem:[%s4637_s0 + $0x1f0] sm:$0xff]  ;;  %v174_v12 = vld [vmem:[%s4637_s0 + $0x500] sm:$0xff] }
  0x54   :  { %3025 = vmatmul.mubr.msk.f32.gmra.mrb[30].mxu0 %vm220_vm0, %v45_v13  ;;  %3172 = vmatmul.mubr.msk.f32.gmra.mrb[30].mxu1 %vm220_vm0, %v143_v14  ;;  %v77_v13 = vld [vmem:[%s4637_s0 + $0x1f8] sm:$0xff]  ;;  %v175_v14 = vld [vmem:[%s4637_s0 + $0x508] sm:$0xff] }
  0x55   :  { %3027 = vmatprep.mubr.msk.f32.mxu0 %vm220_vm0, %v46_v15  ;;  %3174 = vmatprep.mubr.msk.f32.mxu1 %vm220_vm0, %v144_v16  ;;  %v78_v15 = vld [vmem:[%s4637_s0 + $0x200] sm:$0xff]  ;;  %v176_v16 = vld [vmem:[%s4637_s0 + $0x510] sm:$0xff] }
  0x58   :  { %3028 = vmatmul.mubr.msk.f32.gmra.mrb[32].mxu0 %vm220_vm0, %v47_v17  ;;  %3175 = vmatmul.mubr.msk.f32.gmra.mrb[32].mxu1 %vm220_vm0, %v145_v18  ;;  %v79_v17 = vld [vmem:[%s4637_s0 + $0x208] sm:$0xff]  ;;  %v177_v18 = vld [vmem:[%s4637_s0 + $0x518] sm:$0xff] }
  0x59   :  { %3030 = vmatprep.mubr.msk.f32.mxu0 %vm220_vm0, %v48_v19  ;;  %3177 = vmatprep.mubr.msk.f32.mxu1 %vm220_vm0, %v146_v20  ;;  %v80_v19 = vld [vmem:[%s4637_s0 + $0x210] sm:$0xff]  ;;  %v178_v20 = vld [vmem:[%s4637_s0 + $0x520] sm:$0xff] }
  0x5c   :  { %3031 = vmatmul.mubr.msk.f32.gmra.mrb[34].mxu0 %vm220_vm0, %v49_v21  ;;  %3178 = vmatmul.mubr.msk.f32.gmra.mrb[34].mxu1 %vm220_vm0, %v147_v22  ;;  %v81_v21 = vld [vmem:[%s4637_s0 + $0x218] sm:$0xff]  ;;  %v179_v22 = vld [vmem:[%s4637_s0 + $0x528] sm:$0xff] }
  0x5d   :  { %3033 = vmatprep.mubr.msk.f32.mxu0 %vm220_vm0, %v50_v23  ;;  %3180 = vmatprep.mubr.msk.f32.mxu1 %vm220_vm0, %v148_v24  ;;  %v82_v23 = vld [vmem:[%s4637_s0 + $0x220] sm:$0xff]  ;;  %v180_v24 = vld [vmem:[%s4637_s0 + $0x530] sm:$0xff] }
  0x60   :  { %3034 = vmatmul.mubr.msk.f32.gmra.mrb[36].mxu0 %vm220_vm0, %v51_v25  ;;  %3181 = vmatmul.mubr.msk.f32.gmra.mrb[36].mxu1 %vm220_vm0, %v149_v26  ;;  %v83_v25 = vld [vmem:[%s4637_s0 + $0x228] sm:$0xff]  ;;  %v181_v26 = vld [vmem:[%s4637_s0 + $0x538] sm:$0xff] }
  0x61   :  { %3036 = vmatprep.mubr.msk.f32.mxu0 %vm220_vm0, %v52_v27  ;;  %3183 = vmatprep.mubr.msk.f32.mxu1 %vm220_vm0, %v150_v28  ;;  %v84_v27 = vld [vmem:[%s4637_s0 + $0x230] sm:$0xff]  ;;  %v182_v28 = vld [vmem:[%s4637_s0 + $0x540] sm:$0xff] }
  0x64   :  { %3037 = vmatmul.mubr.msk.f32.gmra.mrb[38].mxu0 %vm220_vm0, %v53_v29  ;;  %3184 = vmatmul.mubr.msk.f32.gmra.mrb[38].mxu1 %vm220_vm0, %v151_v30  ;;  %v85_v29 = vld [vmem:[%s4637_s0 + $0x238] sm:$0xff]  ;;  %v183_v30 = vld [vmem:[%s4637_s0 + $0x548] sm:$0xff] }
  0x65   :  { %3039 = vmatprep.mubr.msk.f32.mxu0 %vm220_vm0, %v54_v31  ;;  %3186 = vmatprep.mubr.msk.f32.mxu1 %vm220_vm0, %v152_v32  ;;  %v86_v31 = vld [vmem:[%s4637_s0 + $0x240] sm:$0xff]  ;;  %v184_v32 = vld [vmem:[%s4637_s0 + $0x550] sm:$0xff] }
  0x68   :  { %3040 = vmatmul.mubr.msk.f32.gmra.mrb[40].mxu0 %vm220_vm0, %v55_v33  ;;  %3187 = vmatmul.mubr.msk.f32.gmra.mrb[40].mxu1 %vm220_vm0, %v153_v34  ;;  %v87_v33 = vld [vmem:[%s4637_s0 + $0x248] sm:$0xff]  ;;  %v185_v34 = vld [vmem:[%s4637_s0 + $0x558] sm:$0xff] }
  0x69   :  { %3042 = vmatprep.mubr.msk.f32.mxu0 %vm220_vm0, %v56_v35  ;;  %3189 = vmatprep.mubr.msk.f32.mxu1 %vm220_vm0, %v154_v36  ;;  %v88_v35 = vld [vmem:[%s4637_s0 + $0x250] sm:$0xff]  ;;  %v186_v36 = vld [vmem:[%s4637_s0 + $0x560] sm:$0xff] }
  0x6c   :  { %3043 = vmatmul.mubr.msk.f32.gmra.mrb[42].mxu0 %vm220_vm0, %v57_v37  ;;  %3190 = vmatmul.mubr.msk.f32.gmra.mrb[42].mxu1 %vm220_vm0, %v155_v38  ;;  %v89_v37 = vld [vmem:[%s4637_s0 + $0x258] sm:$0xff]  ;;  %v187_v38 = vld [vmem:[%s4637_s0 + $0x568] sm:$0xff] }
  0x6d   :  { %3045 = vmatprep.mubr.msk.f32.mxu0 %vm220_vm0, %v58_v39  ;;  %3192 = vmatprep.mubr.msk.f32.mxu1 %vm220_vm0, %v156_v40  ;;  %v90_v39 = vld [vmem:[%s4637_s0 + $0x260] sm:$0xff]  ;;  %v188_v40 = vld [vmem:[%s4637_s0 + $0x570] sm:$0xff] }
  0x70   :  { %3046 = vmatmul.mubr.msk.f32.gmra.mrb[44].mxu0 %vm220_vm0, %v59_v41  ;;  %3193 = vmatmul.mubr.msk.f32.gmra.mrb[44].mxu1 %vm220_vm0, %v157_v42  ;;  %v91_v41 = vld [vmem:[%s4637_s0 + $0x268] sm:$0xff]  ;;  %v189_v42 = vld [vmem:[%s4637_s0 + $0x578] sm:$0xff] }
  0x71   :  { %3048 = vmatprep.mubr.msk.f32.mxu0 %vm220_vm0, %v60_v43  ;;  %3195 = vmatprep.mubr.msk.f32.mxu1 %vm220_vm0, %v158_v44  ;;  %v92_v43 = vld [vmem:[%s4637_s0 + $0x270] sm:$0xff]  ;;  %v190_v44 = vld [vmem:[%s4637_s0 + $0x580] sm:$0xff] }
  0x74   :  { %3049 = vmatmul.mubr.msk.f32.gmra.mrb[46].mxu0 %vm220_vm0, %v61_v45  ;;  %3196 = vmatmul.mubr.msk.f32.gmra.mrb[46].mxu1 %vm220_vm0, %v159_v46  ;;  %v93_v45 = vld [vmem:[%s4637_s0 + $0x278] sm:$0xff]  ;;  %v191_v46 = vld [vmem:[%s4637_s0 + $0x588] sm:$0xff] }
  0x75   :  { %3051 = vmatprep.mubr.msk.f32.mxu0 %vm220_vm0, %v62_v47  ;;  %3198 = vmatprep.mubr.msk.f32.mxu1 %vm220_vm0, %v160_v48  ;;  %v94_v47 = vld [vmem:[%s4637_s0 + $0x280] sm:$0xff]  ;;  %v192_v48 = vld [vmem:[%s4637_s0 + $0x590] sm:$0xff] }
  0x78   :  { %3052 = vmatmul.mubr.msk.f32.gmra.mrb[48].mxu0 %vm220_vm0, %v63_v49  ;;  %3199 = vmatmul.mubr.msk.f32.gmra.mrb[48].mxu1 %vm220_vm0, %v161_v50  ;;  %v95_v49 = vld [vmem:[%s4637_s0 + $0x288] sm:$0xff]  ;;  %v193_v50 = vld [vmem:[%s4637_s0 + $0x598] sm:$0xff] }
  0x79   :  { %3054 = vmatprep.mubr.msk.f32.mxu0 %vm220_vm0, %v64_v51  ;;  %3201 = vmatprep.mubr.msk.f32.mxu1 %vm220_vm0, %v162_v52  ;;  %v96_v51 = vld [vmem:[%s4637_s0 + $0x290] sm:$0xff]  ;;  %v194_v52 = vld [vmem:[%s4637_s0 + $0x5a0] sm:$0xff] }
  0x7c   :  { %3055 = vmatmul.mubr.msk.f32.gmra.mrb[50].mxu0 %vm220_vm0, %v65_v53  ;;  %3202 = vmatmul.mubr.msk.f32.gmra.mrb[50].mxu1 %vm220_vm0, %v163_v54  ;;  %v97_v53 = vld [vmem:[%s4637_s0 + $0x298] sm:$0xff]  ;;  %v195_v54 = vld [vmem:[%s4637_s0 + $0x5a8] sm:$0xff] }
  0x7d   :  { %3057 = vmatprep.mubr.msk.f32.mxu0 %vm220_vm0, %v66_v55  ;;  %3204 = vmatprep.mubr.msk.f32.mxu1 %vm220_vm0, %v164_v56  ;;  %v98_v55 = vld [vmem:[%s4637_s0 + $0x2a0] sm:$0xff]  ;;  %v196_v56 = vld [vmem:[%s4637_s0 + $0x5b0] sm:$0xff] }
  0x80   :  { %3058 = vmatmul.mubr.msk.f32.gmra.mrb[52].mxu0 %vm220_vm0, %v67_v57  ;;  %3205 = vmatmul.mubr.msk.f32.gmra.mrb[52].mxu1 %vm220_vm0, %v165_v58  ;;  %v99_v57 = vld [vmem:[%s4637_s0 + $0x2a8] sm:$0xff]  ;;  %v197_v58 = vld [vmem:[%s4637_s0 + $0x5b8] sm:$0xff] }
  0x81   :  { %3060 = vmatprep.mubr.msk.f32.mxu0 %vm220_vm0, %v68_v59  ;;  %3207 = vmatprep.mubr.msk.f32.mxu1 %vm220_vm0, %v166_v60  ;;  %v100_v59 = vld [vmem:[%s4637_s0 + $0x2b0] sm:$0xff]  ;;  %v198_v60 = vld [vmem:[%s4637_s0 + $0x5c0] sm:$0xff] }
  0x84   :  { %3061 = vmatmul.mubr.msk.f32.gmra.mrb[54].mxu0 %vm220_vm0, %v69_v61  ;;  %3208 = vmatmul.mubr.msk.f32.gmra.mrb[54].mxu1 %vm220_vm0, %v167_v62  ;;  %v101_v61 = vld [vmem:[%s4637_s0 + $0x2b8] sm:$0xff]  ;;  %v199_v62 = vld [vmem:[%s4637_s0 + $0x5c8] sm:$0xff] }
  0x85   :  { %3063 = vmatprep.mubr.msk.f32.mxu0 %vm220_vm0, %v70_v63  ;;  %3210 = vmatprep.mubr.msk.f32.mxu1 %vm220_vm0, %v168_v0  ;;  %v102_v63 = vld [vmem:[%s4637_s0 + $0x2c0] sm:$0xff]  ;;  %v200_v0 = vld [vmem:[%s4637_s0 + $0x5d0] sm:$0xff] }
  0x88   :  { %3064 = vmatmul.mubr.msk.f32.gmra.mrb[56].mxu0 %vm220_vm0, %v71_v1  ;;  %3211 = vmatmul.mubr.msk.f32.gmra.mrb[56].mxu1 %vm220_vm0, %v169_v2  ;;  %v103_v1 = vld [vmem:[%s4637_s0 + $0x2c8] sm:$0xff]  ;;  %v201_v2 = vld [vmem:[%s4637_s0 + $0x5d8] sm:$0xff] }
  0x89   :  { %3066 = vmatprep.mubr.msk.f32.mxu0 %vm220_vm0, %v72_v3  ;;  %3213 = vmatprep.mubr.msk.f32.mxu1 %vm220_vm0, %v170_v4  ;;  %v104_v3 = vld [vmem:[%s4637_s0 + $0x2d0] sm:$0xff]  ;;  %v202_v4 = vld [vmem:[%s4637_s0 + $0x5e0] sm:$0xff] }
  0x8c   :  { %3067 = vmatmul.mubr.msk.f32.gmra.mrb[58].mxu0 %vm220_vm0, %v73_v5  ;;  %3214 = vmatmul.mubr.msk.f32.gmra.mrb[58].mxu1 %vm220_vm0, %v171_v6  ;;  %v105_v5 = vld [vmem:[%s4637_s0 + $0x2d8] sm:$0xff]  ;;  %v203_v6 = vld [vmem:[%s4637_s0 + $0x5e8] sm:$0xff] }
  0x8d   :  { %3069 = vmatprep.mubr.msk.f32.mxu0 %vm220_vm0, %v74_v7  ;;  %3216 = vmatprep.mubr.msk.f32.mxu1 %vm220_vm0, %v172_v8  ;;  %v106_v7 = vld [vmem:[%s4637_s0 + $0x2e0] sm:$0xff]  ;;  %v204_v8 = vld [vmem:[%s4637_s0 + $0x5f0] sm:$0xff] }
  0x90   :  { %3070 = vmatmul.mubr.msk.f32.gmra.mrb[60].mxu0 %vm220_vm0, %v75_v9  ;;  %3217 = vmatmul.mubr.msk.f32.gmra.mrb[60].mxu1 %vm220_vm0, %v173_v10  ;;  %v107_v9 = vld [vmem:[%s4637_s0 + $0x2e8] sm:$0xff]  ;;  %v205_v10 = vld [vmem:[%s4637_s0 + $0x5f8] sm:$0xff] }
  0x91   :  { %3072 = vmatprep.mubr.msk.f32.mxu0 %vm220_vm0, %v76_v11  ;;  %3219 = vmatprep.mubr.msk.f32.mxu1 %vm220_vm0, %v174_v12  ;;  %v108_v11 = vld [vmem:[%s4637_s0 + $0x2f0] sm:$0xff]  ;;  %v206_v12 = vld [vmem:[%s4637_s0 + $0x600] sm:$0xff] }
  0x94   :  { %3073 = vmatmul.mubr.msk.f32.gmra.mrb[62].mxu0 %vm220_vm0, %v77_v13  ;;  %3220 = vmatmul.mubr.msk.f32.gmra.mrb[62].mxu1 %vm220_vm0, %v175_v14  ;;  %v109_v13 = vld [vmem:[%s4637_s0 + $0x2f8] sm:$0xff]  ;;  %v207_v14 = vld [vmem:[%s4637_s0 + $0x608] sm:$0xff] }
  0x95   :  { %3075 = vmatprep.mubr.msk.f32.mxu0 %vm220_vm0, %v78_v15  ;;  %3222 = vmatprep.mubr.msk.f32.mxu1 %vm220_vm0, %v176_v16  ;;  %v110_v15 = vld [vmem:[%s4637_s0 + $0x300] sm:$0xff]  ;;  %v208_v16 = vld [vmem:[%s4637_s0 + $0x610] sm:$0xff] }
  0x98   :  { %3076 = vmatmul.mubr.msk.f32.gmra.mrb[64].mxu0 %vm220_vm0, %v79_v17  ;;  %3223 = vmatmul.mubr.msk.f32.gmra.mrb[64].mxu1 %vm220_vm0, %v177_v18  ;;  %v111_v17 = vld [vmem:[%s4637_s0 + $0x308] sm:$0xff]  ;;  %v209_v18 = vld [vmem:[%s4637_s0 + $0x618] sm:$0xff] }
  0x99   :  { %3078 = vmatprep.mubr.msk.f32.mxu0 %vm220_vm0, %v80_v19  ;;  %3225 = vmatprep.mubr.msk.f32.mxu1 %vm220_vm0, %v178_v20 }
  0x9c   :  { %3079 = vmatmul.mubr.msk.f32.gmra.mrb[66].mxu0 %vm220_vm0, %v81_v21  ;;  %3226 = vmatmul.mubr.msk.f32.gmra.mrb[66].mxu1 %vm220_vm0, %v179_v22 }
  0x9d   :  { %3081 = vmatprep.mubr.msk.f32.mxu0 %vm220_vm0, %v82_v23  ;;  %3228 = vmatprep.mubr.msk.f32.mxu1 %vm220_vm0, %v180_v24 }
  0xa0   :  { %3082 = vmatmul.mubr.msk.f32.gmra.mrb[68].mxu0 %vm220_vm0, %v83_v25  ;;  %3229 = vmatmul.mubr.msk.f32.gmra.mrb[68].mxu1 %vm220_vm0, %v181_v26 }
  0xa1   :  { %3084 = vmatprep.mubr.msk.f32.mxu0 %vm220_vm0, %v84_v27  ;;  %3231 = vmatprep.mubr.msk.f32.mxu1 %vm220_vm0, %v182_v28 }
  0xa4   :  { %3085 = vmatmul.mubr.msk.f32.gmra.mrb[70].mxu0 %vm220_vm0, %v85_v29  ;;  %3232 = vmatmul.mubr.msk.f32.gmra.mrb[70].mxu1 %vm220_vm0, %v183_v30 }
  0xa5   :  { %3087 = vmatprep.mubr.msk.f32.mxu0 %vm220_vm0, %v86_v31  ;;  %3234 = vmatprep.mubr.msk.f32.mxu1 %vm220_vm0, %v184_v32 }
  0xa8   :  { %3088 = vmatmul.mubr.msk.f32.gmra.mrb[72].mxu0 %vm220_vm0, %v87_v33  ;;  %3235 = vmatmul.mubr.msk.f32.gmra.mrb[72].mxu1 %vm220_vm0, %v185_v34 }
  0xa9   :  { %3090 = vmatprep.mubr.msk.f32.mxu0 %vm220_vm0, %v88_v35  ;;  %3237 = vmatprep.mubr.msk.f32.mxu1 %vm220_vm0, %v186_v36 }
  0xac   :  { %3091 = vmatmul.mubr.msk.f32.gmra.mrb[74].mxu0 %vm220_vm0, %v89_v37  ;;  %3238 = vmatmul.mubr.msk.f32.gmra.mrb[74].mxu1 %vm220_vm0, %v187_v38 }
  0xad   :  { %3093 = vmatprep.mubr.msk.f32.mxu0 %vm220_vm0, %v90_v39  ;;  %3240 = vmatprep.mubr.msk.f32.mxu1 %vm220_vm0, %v188_v40 }
  0xb0   :  { %3094 = vmatmul.mubr.msk.f32.gmra.mrb[76].mxu0 %vm220_vm0, %v91_v41  ;;  %3241 = vmatmul.mubr.msk.f32.gmra.mrb[76].mxu1 %vm220_vm0, %v189_v42 }
  0xb1   :  { %3096 = vmatprep.mubr.msk.f32.mxu0 %vm220_vm0, %v92_v43  ;;  %3243 = vmatprep.mubr.msk.f32.mxu1 %vm220_vm0, %v190_v44 }
  0xb4   :  { %3097 = vmatmul.mubr.msk.f32.gmra.mrb[78].mxu0 %vm220_vm0, %v93_v45  ;;  %3244 = vmatmul.mubr.msk.f32.gmra.mrb[78].mxu1 %vm220_vm0, %v191_v46 }
  0xb5   :  { %3099 = vmatprep.mubr.msk.f32.mxu0 %vm220_vm0, %v94_v47  ;;  %3246 = vmatprep.mubr.msk.f32.mxu1 %vm220_vm0, %v192_v48 }
  0xb8   :  { %3100 = vmatmul.mubr.msk.f32.gmra.mrb[80].mxu0 %vm220_vm0, %v95_v49  ;;  %3247 = vmatmul.mubr.msk.f32.gmra.mrb[80].mxu1 %vm220_vm0, %v193_v50 }
  0xb9   :  { %3102 = vmatprep.mubr.msk.f32.mxu0 %vm220_vm0, %v96_v51  ;;  %3249 = vmatprep.mubr.msk.f32.mxu1 %vm220_vm0, %v194_v52 }
  0xbc   :  { %3103 = vmatmul.mubr.msk.f32.gmra.mrb[82].mxu0 %vm220_vm0, %v97_v53  ;;  %3250 = vmatmul.mubr.msk.f32.gmra.mrb[82].mxu1 %vm220_vm0, %v195_v54 }
  0xbd   :  { %3105 = vmatprep.mubr.msk.f32.mxu0 %vm220_vm0, %v98_v55  ;;  %3252 = vmatprep.mubr.msk.f32.mxu1 %vm220_vm0, %v196_v56 }
  0xc0   :  { %3106 = vmatmul.mubr.msk.f32.gmra.mrb[84].mxu0 %vm220_vm0, %v99_v57  ;;  %3253 = vmatmul.mubr.msk.f32.gmra.mrb[84].mxu1 %vm220_vm0, %v197_v58 }
  0xc1   :  { %3108 = vmatprep.mubr.msk.f32.mxu0 %vm220_vm0, %v100_v59  ;;  %3255 = vmatprep.mubr.msk.f32.mxu1 %vm220_vm0, %v198_v60 }
  0xc4   :  { %3109 = vmatmul.mubr.msk.f32.gmra.mrb[86].mxu0 %vm220_vm0, %v101_v61  ;;  %3256 = vmatmul.mubr.msk.f32.gmra.mrb[86].mxu1 %vm220_vm0, %v199_v62 }
  0xc5   :  { %3111 = vmatprep.mubr.msk.f32.mxu0 %vm220_vm0, %v102_v63  ;;  %3258 = vmatprep.mubr.msk.f32.mxu1 %vm220_vm0, %v200_v0 }
  0xc8   :  { %3112 = vmatmul.mubr.msk.f32.gmra.mrb[88].mxu0 %vm220_vm0, %v103_v1  ;;  %3259 = vmatmul.mubr.msk.f32.gmra.mrb[88].mxu1 %vm220_vm0, %v201_v2 }
  0xc9   :  { %3114 = vmatprep.mubr.msk.f32.mxu0 %vm220_vm0, %v104_v3  ;;  %3261 = vmatprep.mubr.msk.f32.mxu1 %vm220_vm0, %v202_v4 }
  0xcc   :  { %3115 = vmatmul.mubr.msk.f32.gmra.mrb[90].mxu0 %vm220_vm0, %v105_v5  ;;  %3262 = vmatmul.mubr.msk.f32.gmra.mrb[90].mxu1 %vm220_vm0, %v203_v6 }
  0xcd   :  { %3117 = vmatprep.mubr.msk.f32.mxu0 %vm220_vm0, %v106_v7  ;;  %3264 = vmatprep.mubr.msk.f32.mxu1 %vm220_vm0, %v204_v8 }
  0xd0   :  { %3118 = vmatmul.mubr.msk.f32.gmra.mrb[92].mxu0 %vm220_vm0, %v107_v9  ;;  %3265 = vmatmul.mubr.msk.f32.gmra.mrb[92].mxu1 %vm220_vm0, %v205_v10 }
  0xd1   :  { %3120 = vmatprep.mubr.msk.f32.mxu0 %vm220_vm0, %v108_v11  ;;  %3267 = vmatprep.mubr.msk.f32.mxu1 %vm220_vm0, %v206_v12 }
  0xd4   :  { %3121 = vmatmul.mubr.msk.f32.gmra.mrb[94].mxu0 %vm220_vm0, %v109_v13  ;;  %3268 = vmatmul.mubr.msk.f32.gmra.mrb[94].mxu1 %vm220_vm0, %v207_v14 }
  0xd5   :  { %3123 = vmatprep.mubr.msk.f32.mxu0 %vm220_vm0, %v110_v15  ;;  %3270 = vmatprep.mubr.msk.f32.mxu1 %vm220_vm0, %v208_v16 }
  0xd8   :  { %3124 = vmatmul.mubr.msk.f32.gmra.mrb[96].mxu0 %vm220_vm0, %v111_v17  ;;  %3271 = vmatmul.mubr.msk.f32.gmra.mrb[96].mxu1 %vm220_vm0, %v209_v18 }
  0xeb   :  { %v4141_v19 = vpop.f32.mrb[0].mxu0  ;;  %v4143_v20 = vpop.f32.mrb[0].mxu1 }
  0xec   :  { %v4145_v21 = vpop.f32.mrb[1].mxu0  ;;  %v4147_v22 = vpop.f32.mrb[1].mxu1 }
  0xef   :  { %v4149_v23 = vpop.f32.mrb[2].mxu0  ;;  %v4151_v24 = vpop.f32.mrb[2].mxu1 }
  0xf0   :  { %v4153_v25 = vpop.f32.mrb[3].mxu0  ;;  %v4155_v26 = vpop.f32.mrb[3].mxu1 }
  0xf3   :  { %v4157_v27 = vpop.f32.mrb[4].mxu0  ;;  %v4159_v28 = vpop.f32.mrb[4].mxu1 }
  0xf4   :  { %v4161_v29 = vpop.f32.mrb[5].mxu0  ;;  %v4163_v30 = vpop.f32.mrb[5].mxu1 }
  0xf7   :  { %v4165_v31 = vpop.f32.mrb[6].mxu0  ;;  %v4167_v32 = vpop.f32.mrb[6].mxu1 }
  0xf8   :  { %v4169_v33 = vpop.f32.mrb[7].mxu0  ;;  %v4171_v34 = vpop.f32.mrb[7].mxu1 }
  0xfb   :  { %v4173_v35 = vpop.f32.mrb[8].mxu0  ;;  %v4175_v36 = vpop.f32.mrb[8].mxu1 }
  0xfc   :  { %v4177_v37 = vpop.f32.mrb[9].mxu0  ;;  %v4179_v38 = vpop.f32.mrb[9].mxu1 }
  0xff   :  { %v4181_v39 = vpop.f32.mrb[10].mxu0  ;;  %v4183_v40 = vpop.f32.mrb[10].mxu1 }
 0x100   :  { %v4185_v41 = vpop.f32.mrb[11].mxu0  ;;  %v4187_v42 = vpop.f32.mrb[11].mxu1 }
 0x103   :  { %v4189_v43 = vpop.f32.mrb[12].mxu0  ;;  %v4191_v44 = vpop.f32.mrb[12].mxu1 }
 0x104   :  { %v4193_v45 = vpop.f32.mrb[13].mxu0  ;;  %v4195_v46 = vpop.f32.mrb[13].mxu1 }
 0x107   :  { %v4197_v47 = vpop.f32.mrb[14].mxu0  ;;  %v4199_v48 = vpop.f32.mrb[14].mxu1 }
 0x108   :  { %v4201_v49 = vpop.f32.mrb[15].mxu0  ;;  %v4203_v50 = vpop.f32.mrb[15].mxu1 }
 0x10b   :  { %v4205_v51 = vpop.f32.mrb[16].mxu0  ;;  %v4207_v52 = vpop.f32.mrb[16].mxu1 }
 0x10c   :  { %v4209_v53 = vpop.f32.mrb[17].mxu0  ;;  %v4211_v54 = vpop.f32.mrb[17].mxu1 }
 0x10f   :  { %v4213_v55 = vpop.f32.mrb[18].mxu0  ;;  %v4215_v56 = vpop.f32.mrb[18].mxu1 }
 0x110   :  { %v4217_v57 = vpop.f32.mrb[19].mxu0  ;;  %v4219_v58 = vpop.f32.mrb[19].mxu1 }
 0x113   :  { %v4221_v59 = vpop.f32.mrb[20].mxu0  ;;  %v4223_v60 = vpop.f32.mrb[20].mxu1 }
 0x114   :  { %v4225_v61 = vpop.f32.mrb[21].mxu0  ;;  %v4227_v62 = vpop.f32.mrb[21].mxu1 }
 0x117   :  { %v4229_v63 = vpop.f32.mrb[22].mxu0  ;;  %v4231_v0 = vpop.f32.mrb[22].mxu1 }
 0x118   :  { %4640 = vst [vmem:[#allocation3_spill] sm:$0xff] %v4229_v63  ;;  %4641 = vst [vmem:[#allocation4_spill] sm:$0xff] %v4231_v0  ;;  %v4233_v1 = vpop.f32.mrb[23].mxu0  ;;  %v4235_v2 = vpop.f32.mrb[23].mxu1 }
 0x11b   :  { %v4237_v3 = vpop.f32.mrb[24].mxu0  ;;  %v4239_v4 = vpop.f32.mrb[24].mxu1 }
 0x11c   :  { %4642 = vst [vmem:[#allocation5_spill] sm:$0xff] %v4237_v3  ;;  %4643 = vst [vmem:[#allocation6_spill] sm:$0xff] %v4239_v4  ;;  %v4241_v5 = vpop.f32.mrb[25].mxu0  ;;  %v4243_v6 = vpop.f32.mrb[25].mxu1 }
 0x11d   :  { %4644 = vst [vmem:[#allocation7_spill] sm:$0xff] %v4243_v6 }
 0x11f   :  { %v4245_v7 = vpop.f32.mrb[26].mxu0  ;;  %v4247_v8 = vpop.f32.mrb[26].mxu1 }
 0x120   :  { %4645 = vst [vmem:[#allocation8_spill] sm:$0xff] %v4245_v7  ;;  %4646 = vst [vmem:[#allocation9_spill] sm:$0xff] %v4247_v8  ;;  %v4249_v9 = vpop.f32.mrb[27].mxu0  ;;  %v4251_v10 = vpop.f32.mrb[27].mxu1 }
 0x121   :  { %4647 = vst [vmem:[#allocation10_spill] sm:$0xff] %v4249_v9  ;;  %4648 = vst [vmem:[#allocation11_spill] sm:$0xff] %v4251_v10 }
 0x123   :  { %v4253_v11 = vpop.f32.mrb[28].mxu0  ;;  %v4255_v12 = vpop.f32.mrb[28].mxu1 }
 0x124   :  { %4649 = vst [vmem:[#allocation12_spill] sm:$0xff] %v4253_v11  ;;  %4650 = vst [vmem:[#allocation13_spill] sm:$0xff] %v4255_v12  ;;  %v4257_v13 = vpop.f32.mrb[29].mxu0  ;;  %v4259_v14 = vpop.f32.mrb[29].mxu1 }
 0x125   :  { %4651 = vst [vmem:[#allocation14_spill] sm:$0xff] %v4257_v13  ;;  %4652 = vst [vmem:[#allocation15_spill] sm:$0xff] %v4259_v14 }
 0x127   :  { %v4261_v15 = vpop.f32.mrb[30].mxu0  ;;  %v4263_v16 = vpop.f32.mrb[30].mxu1 }
 0x128   :  { %4653 = vst [vmem:[#allocation16_spill] sm:$0xff] %v4261_v15  ;;  %4654 = vst [vmem:[#allocation17_spill] sm:$0xff] %v4263_v16  ;;  %v4265_v17 = vpop.f32.mrb[31].mxu0  ;;  %v4267_v18 = vpop.f32.mrb[31].mxu1 }
 0x129   :  { %4655 = vst [vmem:[#allocation18_spill] sm:$0xff] %v4265_v17  ;;  %4656 = vst [vmem:[#allocation19_spill] sm:$0xff] %v4267_v18 }
 0x12b   :  { %v4269_v8 = vpop.f32.mrb[32].mxu0  ;;  %v4271_v7 = vpop.f32.mrb[32].mxu1 }
 0x12c   :  { %4657 = vst [vmem:[#allocation20_spill] sm:$0xff] %v4269_v8  ;;  %4658 = vst [vmem:[#allocation21_spill] sm:$0xff] %v4271_v7  ;;  %v4273_v4 = vpop.f32.mrb[33].mxu0  ;;  %v4275_v11 = vpop.f32.mrb[33].mxu1 }
 0x12d   :  { %4659 = vst [vmem:[#allocation22_spill] sm:$0xff] %v4273_v4  ;;  %4660 = vst [vmem:[#allocation23_spill] sm:$0xff] %v4275_v11 }
 0x12f   :  { %v4277_v12 = vpop.f32.mrb[34].mxu0  ;;  %v4279_v13 = vpop.f32.mrb[34].mxu1 }
 0x130   :  { %4661 = vst [vmem:[#allocation24_spill] sm:$0xff] %v4277_v12  ;;  %4662 = vst [vmem:[#allocation25_spill] sm:$0xff] %v4279_v13  ;;  %v4281_v14 = vpop.f32.mrb[35].mxu0  ;;  %v4283_v15 = vpop.f32.mrb[35].mxu1 }
 0x131   :  { %4663 = vst [vmem:[#allocation26_spill] sm:$0xff] %v4281_v14  ;;  %4664 = vst [vmem:[#allocation27_spill] sm:$0xff] %v4283_v15 }
 0x133   :  { %v4285_v16 = vpop.f32.mrb[36].mxu0  ;;  %v4287_v17 = vpop.f32.mrb[36].mxu1 }
 0x134   :  { %4665 = vst [vmem:[#allocation28_spill] sm:$0xff] %v4285_v16  ;;  %4666 = vst [vmem:[#allocation29_spill] sm:$0xff] %v4287_v17  ;;  %v4289_v18 = vpop.f32.mrb[37].mxu0  ;;  %v4291_v8 = vpop.f32.mrb[37].mxu1 }
 0x135   :  { %4667 = vst [vmem:[#allocation30_spill] sm:$0xff] %v4289_v18  ;;  %4668 = vst [vmem:[#allocation31_spill] sm:$0xff] %v4291_v8 }
 0x137   :  { %v4293_v7 = vpop.f32.mrb[38].mxu0  ;;  %v4295_v4 = vpop.f32.mrb[38].mxu1 }
 0x138   :  { %4669 = vst [vmem:[#allocation32_spill] sm:$0xff] %v4293_v7  ;;  %4670 = vst [vmem:[#allocation33_spill] sm:$0xff] %v4295_v4  ;;  %v4297_v11 = vpop.f32.mrb[39].mxu0  ;;  %v4299_v12 = vpop.f32.mrb[39].mxu1 }
 0x139   :  { %4671 = vst [vmem:[#allocation34_spill] sm:$0xff] %v4297_v11  ;;  %4672 = vst [vmem:[#allocation35_spill] sm:$0xff] %v4299_v12 }
 0x13b   :  { %v4301_v13 = vpop.f32.mrb[40].mxu0  ;;  %v4303_v14 = vpop.f32.mrb[40].mxu1 }
 0x13c   :  { %4673 = vst [vmem:[#allocation36_spill] sm:$0xff] %v4301_v13  ;;  %4674 = vst [vmem:[#allocation37_spill] sm:$0xff] %v4303_v14  ;;  %v4305_v15 = vpop.f32.mrb[41].mxu0  ;;  %v4307_v16 = vpop.f32.mrb[41].mxu1 }
 0x13d   :  { %4675 = vst [vmem:[#allocation38_spill] sm:$0xff] %v4305_v15  ;;  %4676 = vst [vmem:[#allocation39_spill] sm:$0xff] %v4307_v16 }
 0x13f   :  { %v4309_v17 = vpop.f32.mrb[42].mxu0  ;;  %v4311_v18 = vpop.f32.mrb[42].mxu1 }
 0x140   :  { %4677 = vst [vmem:[#allocation40_spill] sm:$0xff] %v4309_v17  ;;  %4678 = vst [vmem:[#allocation41_spill] sm:$0xff] %v4311_v18  ;;  %v4313_v8 = vpop.f32.mrb[43].mxu0  ;;  %v4315_v7 = vpop.f32.mrb[43].mxu1 }
 0x141   :  { %4679 = vst [vmem:[#allocation42_spill] sm:$0xff] %v4313_v8  ;;  %4680 = vst [vmem:[#allocation43_spill] sm:$0xff] %v4315_v7 }
 0x143   :  { %v4317_v4 = vpop.f32.mrb[44].mxu0  ;;  %v4319_v11 = vpop.f32.mrb[44].mxu1 }
 0x144   :  { %4681 = vst [vmem:[#allocation44_spill] sm:$0xff] %v4317_v4  ;;  %4682 = vst [vmem:[#allocation45_spill] sm:$0xff] %v4319_v11  ;;  %v4321_v12 = vpop.f32.mrb[45].mxu0  ;;  %v4323_v13 = vpop.f32.mrb[45].mxu1 }
 0x145   :  { %4683 = vst [vmem:[#allocation46_spill] sm:$0xff] %v4321_v12  ;;  %4684 = vst [vmem:[#allocation47_spill] sm:$0xff] %v4323_v13 }
 0x147   :  { %v4325_v14 = vpop.f32.mrb[46].mxu0  ;;  %v4327_v15 = vpop.f32.mrb[46].mxu1 }
 0x148   :  { %4685 = vst [vmem:[#allocation48_spill] sm:$0xff] %v4325_v14  ;;  %4686 = vst [vmem:[#allocation49_spill] sm:$0xff] %v4327_v15  ;;  %v4329_v16 = vpop.f32.mrb[47].mxu0  ;;  %v4331_v17 = vpop.f32.mrb[47].mxu1  ;;  %v4342_v14 = vld [vmem:[%s4638_s2] ss:$0 sm:$0xff] }
 0x149   :  { %4687 = vst [vmem:[#allocation50_spill] sm:$0xff] %v4329_v16  ;;  %4688 = vst [vmem:[#allocation51_spill] sm:$0xff] %v4331_v17 }
 0x14b   :  { %v3053_v18 = vpop.f32.mrb[48].mxu0  ;;  %v3200_v8 = vpop.f32.mrb[48].mxu1 }
 0x14c   :  { %v2152_v7 = vmax.f32 %v4145_v21, %v3053_v18  ;;  %v4334_v10 = vpop.f32.mrb[49].mxu0  ;;  %v4336_v4 = vpop.f32.mrb[49].mxu1 }
 0x14d   :  { %4689 = vst [vmem:[#allocation52_spill] sm:$0xff] %v4334_v10  ;;  %4690 = vst [vmem:[#allocation53_spill] sm:$0xff] %v4336_v4 }
 0x14e   :  { %v2250_v11 = vmax.f32 %v2152_v7, %v4147_v22 }
 0x14f   :  { %v3056_v15 = vpop.f32.mrb[50].mxu0  ;;  %v3203_v13 = vpop.f32.mrb[50].mxu1 }
 0x150   :  { %v2348_v16 = vmax.f32 %v2250_v11, %v3200_v8  ;;  %v2154_v17 = vmax.f32 %v4153_v25, %v3056_v15  ;;  %v1129_v12 = vpop.f32.mrb[51].mxu0  ;;  %v1619_v3 = vpop.f32.mrb[51].mxu1 }
 0x151   :  { %v2153_v21 = vmax.f32 %v4141_v19, %v1129_v12 }
 0x152   :  { %v2404_v18 = vadd.f32 %v4342_v14, %v2348_v16  ;;  %v2252_v4 = vmax.f32 %v2154_v17, %v4155_v26 }
 0x153   :  { %v3059_v10 = vpop.f32.mrb[52].mxu0  ;;  %v2251_v22 = vmax.f32 %v2153_v21, %v4143_v20  ;;  %v3206_v7 = vpop.f32.mrb[52].mxu1 }
 0x154   :  { %v2453_v9 = vmax.f32 %v2404_v18, 0.0  ;;  %v2350_v0 = vmax.f32 %v2252_v4, %v3203_v13  ;;  %v2156_v6 = vmax.f32 %v4161_v29, %v3059_v10  ;;  %v1139_v63 = vpop.f32.mrb[53].mxu0  ;;  %v1629_v8 = vpop.f32.mrb[53].mxu1 }
 0x155   :  { %v2349_v11 = vmax.f32 %v2251_v22, %v1619_v3  ;;  %v2155_v25 = vmax.f32 %v4149_v23, %v1139_v63 }
 0x156   :  { %2502 = vst [vmem:[%s4639_s3] sm:$0xff] %v2453_v9  ;;  %v2406_v19 = vadd.f32 %v4342_v14, %v2350_v0  ;;  %v2254_v26 = vmax.f32 %v2156_v6, %v4163_v30 }
 0x157   :  { %v2405_v20 = vadd.f32 %v4342_v14, %v2349_v11  ;;  %v3062_v12 = vpop.f32.mrb[54].mxu0  ;;  %v2253_v4 = vmax.f32 %v2155_v25, %v4151_v24  ;;  %v3209_v13 = vpop.f32.mrb[54].mxu1 }
 0x158   :  { %v2455_v29 = vmax.f32 %v2406_v19, 0.0  ;;  %v2352_v10 = vmax.f32 %v2254_v26, %v3206_v7  ;;  %v2158_v3 = vmax.f32 %v4169_v33, %v3062_v12  ;;  %v1149_v15 = vpop.f32.mrb[55].mxu0  ;;  %v1639_v23 = vpop.f32.mrb[55].mxu1 }
 0x159   :  { %v2454_v63 = vmax.f32 %v2405_v20, 0.0  ;;  %v2351_v16 = vmax.f32 %v2253_v4, %v1629_v8  ;;  %v2157_v9 = vmax.f32 %v4157_v27, %v1149_v15 }
 0x15a   :  { %2504 = vst [vmem:[%s4639_s3 + $0x10] sm:$0xff] %v2455_v29  ;;  %v2408_v30 = vadd.f32 %v4342_v14, %v2352_v10  ;;  %v2256_v0 = vmax.f32 %v2158_v3, %v4171_v34 }
 0x15b   :  { %2503 = vst [vmem:[%s4639_s3 + $0x8] sm:$0xff] %v2454_v63  ;;  %v2407_v24 = vadd.f32 %v4342_v14, %v2351_v16  ;;  %v3065_v33 = vpop.f32.mrb[56].mxu0  ;;  %v2255_v6 = vmax.f32 %v2157_v9, %v4159_v28  ;;  %v3212_v17 = vpop.f32.mrb[56].mxu1 }
 0x15c   :  { %v2457_v21 = vmax.f32 %v2408_v30, 0.0  ;;  %v2354_v27 = vmax.f32 %v2256_v0, %v3209_v13  ;;  %v2160_v18 = vmax.f32 %v4177_v37, %v3065_v33  ;;  %v1159_v22 = vpop.f32.mrb[57].mxu0  ;;  %v1649_v7 = vpop.f32.mrb[57].mxu1 }
 0x15d   :  { %v2456_v8 = vmax.f32 %v2407_v24, 0.0  ;;  %v2353_v11 = vmax.f32 %v2255_v6, %v1639_v23  ;;  %v2159_v34 = vmax.f32 %v4165_v31, %v1159_v22 }
 0x15e   :  { %2506 = vst [vmem:[%s4639_s3 + $0x20] sm:$0xff] %v2457_v21  ;;  %v2410_v25 = vadd.f32 %v4342_v14, %v2354_v27  ;;  %v2258_v19 = vmax.f32 %v2160_v18, %v4179_v38 }
 0x15f   :  { %2505 = vst [vmem:[%s4639_s3 + $0x18] sm:$0xff] %v2456_v8  ;;  %v2409_v28 = vadd.f32 %v4342_v14, %v2353_v11  ;;  %v3068_v37 = vpop.f32.mrb[58].mxu0  ;;  %v2257_v26 = vmax.f32 %v2159_v34, %v4167_v32  ;;  %v3215_v20 = vpop.f32.mrb[58].mxu1 }
 0x160   :  { %v2459_v12 = vmax.f32 %v2410_v25, 0.0  ;;  %v2356_v31 = vmax.f32 %v2258_v19, %v3212_v17  ;;  %v2162_v4 = vmax.f32 %v4185_v41, %v3068_v37  ;;  %v1169_v13 = vpop.f32.mrb[59].mxu0  ;;  %v1659_v29 = vpop.f32.mrb[59].mxu1 }
 0x161   :  { %v2458_v10 = vmax.f32 %v2409_v28, 0.0  ;;  %v2355_v3 = vmax.f32 %v2257_v26, %v1649_v7  ;;  %v2161_v38 = vmax.f32 %v4173_v35, %v1169_v13 }
 0x162   :  { %2508 = vst [vmem:[%s4639_s3 + $0x30] sm:$0xff] %v2459_v12  ;;  %v2412_v15 = vadd.f32 %v4342_v14, %v2356_v31  ;;  %v2260_v23 = vmax.f32 %v2162_v4, %v4187_v42 }
 0x163   :  { %2507 = vst [vmem:[%s4639_s3 + $0x28] sm:$0xff] %v2458_v10  ;;  %v2411_v32 = vadd.f32 %v4342_v14, %v2355_v3  ;;  %v3071_v41 = vpop.f32.mrb[60].mxu0  ;;  %v2259_v63 = vmax.f32 %v2161_v38, %v4175_v36  ;;  %v3218_v16 = vpop.f32.mrb[60].mxu1 }
 0x164   :  { %v2461_v9 = vmax.f32 %v2412_v15, 0.0  ;;  %v2358_v35 = vmax.f32 %v2260_v23, %v3215_v20  ;;  %v2164_v30 = vmax.f32 %v4193_v45, %v3071_v41  ;;  %v1179_v0 = vpop.f32.mrb[61].mxu0  ;;  %v1669_v24 = vpop.f32.mrb[61].mxu1 }
 0x165   :  { %v2460_v33 = vmax.f32 %v2411_v32, 0.0  ;;  %v2357_v6 = vmax.f32 %v2259_v63, %v1659_v29  ;;  %v2163_v42 = vmax.f32 %v4181_v39, %v1179_v0 }
 0x166   :  { %2510 = vst [vmem:[%s4639_s3 + $0x40] sm:$0xff] %v2461_v9  ;;  %v2414_v17 = vadd.f32 %v4342_v14, %v2358_v35  ;;  %v2262_v21 = vmax.f32 %v2164_v30, %v4195_v46 }
 0x167   :  { %2509 = vst [vmem:[%s4639_s3 + $0x38] sm:$0xff] %v2460_v33  ;;  %v2413_v36 = vadd.f32 %v4342_v14, %v2357_v6  ;;  %v3074_v45 = vpop.f32.mrb[62].mxu0  ;;  %v2261_v27 = vmax.f32 %v2163_v42, %v4183_v40  ;;  %v3221_v18 = vpop.f32.mrb[62].mxu1 }
 0x168   :  { %v2463_v22 = vmax.f32 %v2414_v17, 0.0  ;;  %v2360_v39 = vmax.f32 %v2262_v21, %v3218_v16  ;;  %v2166_v7 = vmax.f32 %v4201_v49, %v3074_v45  ;;  %v1189_v8 = vpop.f32.mrb[63].mxu0  ;;  %v1679_v11 = vpop.f32.mrb[63].mxu1 }
 0x169   :  { %v2462_v34 = vmax.f32 %v2413_v36, 0.0  ;;  %v2359_v25 = vmax.f32 %v2261_v27, %v1669_v24  ;;  %v2165_v46 = vmax.f32 %v4189_v43, %v1189_v8 }
 0x16a   :  { %2512 = vst [vmem:[%s4639_s3 + $0x50] sm:$0xff] %v2463_v22  ;;  %v2416_v19 = vadd.f32 %v4342_v14, %v2360_v39  ;;  %v2264_v28 = vmax.f32 %v2166_v7, %v4203_v50 }
 0x16b   :  { %2511 = vst [vmem:[%s4639_s3 + $0x48] sm:$0xff] %v2462_v34  ;;  %v2415_v40 = vadd.f32 %v4342_v14, %v2359_v25  ;;  %v3077_v49 = vpop.f32.mrb[64].mxu0  ;;  %v2263_v37 = vmax.f32 %v2165_v46, %v4191_v44  ;;  %v3224_v26 = vpop.f32.mrb[64].mxu1 }
 0x16c   :  { %v2465_v20 = vmax.f32 %v2416_v19, 0.0  ;;  %v2362_v43 = vmax.f32 %v2264_v28, %v3221_v18  ;;  %v2168_v12 = vmax.f32 %v4209_v53, %v3077_v49  ;;  %v1199_v31 = vpop.f32.mrb[65].mxu0  ;;  %v1689_v4 = vpop.f32.mrb[65].mxu1 }
 0x16d   :  { %v2464_v13 = vmax.f32 %v2415_v40, 0.0  ;;  %v2361_v29 = vmax.f32 %v2263_v37, %v1679_v11  ;;  %v2167_v50 = vmax.f32 %v4197_v47, %v1199_v31  ;;  %v4691_v31 = vld [vmem:[#allocation3_spill] sm:$0xff] }
 0x16e   :  { %2514 = vst [vmem:[%s4639_s3 + $0x60] sm:$0xff] %v2465_v20  ;;  %v2418_v10 = vadd.f32 %v4342_v14, %v2362_v43  ;;  %v2266_v3 = vmax.f32 %v2168_v12, %v4211_v54 }
 0x16f   :  { %2513 = vst [vmem:[%s4639_s3 + $0x58] sm:$0xff] %v2464_v13  ;;  %v2417_v44 = vadd.f32 %v4342_v14, %v2361_v29  ;;  %v3080_v53 = vpop.f32.mrb[66].mxu0  ;;  %v2265_v38 = vmax.f32 %v2167_v50, %v4199_v48  ;;  %v3227_v15 = vpop.f32.mrb[66].mxu1  ;;  %v4692_v13 = vld [vmem:[#allocation7_spill] sm:$0xff]  ;;  %v4693_v50 = vld [vmem:[#allocation4_spill] sm:$0xff] }
 0x170   :  { %v2467_v23 = vmax.f32 %v2418_v10, 0.0  ;;  %v2364_v47 = vmax.f32 %v2266_v3, %v3224_v26  ;;  %v2170_v32 = vmax.f32 %v4217_v57, %v3080_v53  ;;  %v1209_v41 = vpop.f32.mrb[67].mxu0  ;;  %v1699_v63 = vpop.f32.mrb[67].mxu1 }
 0x171   :  { %v2466_v16 = vmax.f32 %v2417_v44, 0.0  ;;  %v2363_v9 = vmax.f32 %v2265_v38, %v1689_v4  ;;  %v2169_v54 = vmax.f32 %v4205_v51, %v1209_v41  ;;  %v4694_v38 = vld [vmem:[#allocation10_spill] sm:$0xff] }
 0x172   :  { %2516 = vst [vmem:[%s4639_s3 + $0x70] sm:$0xff] %v2467_v23  ;;  %v2420_v35 = vadd.f32 %v4342_v14, %v2364_v47  ;;  %v2268_v30 = vmax.f32 %v2170_v32, %v4219_v58 }
 0x173   :  { %2515 = vst [vmem:[%s4639_s3 + $0x68] sm:$0xff] %v2466_v16  ;;  %v2419_v48 = vadd.f32 %v4342_v14, %v2363_v9  ;;  %v3083_v57 = vpop.f32.mrb[68].mxu0  ;;  %v2267_v0 = vmax.f32 %v2169_v54, %v4207_v52  ;;  %v3230_v24 = vpop.f32.mrb[68].mxu1  ;;  %v4696_v54 = vld [vmem:[#allocation11_spill] sm:$0xff] }
 0x174   :  { %v2469_v33 = vmax.f32 %v2420_v35, 0.0  ;;  %v2366_v51 = vmax.f32 %v2268_v30, %v3227_v15  ;;  %v2172_v6 = vmax.f32 %v4225_v61, %v3083_v57  ;;  %v1219_v42 = vpop.f32.mrb[69].mxu0  ;;  %v1709_v17 = vpop.f32.mrb[69].mxu1  ;;  %v4697_v57 = vld [vmem:[#allocation6_spill] sm:$0xff] }
 0x175   :  { %v2468_v21 = vmax.f32 %v2419_v48, 0.0  ;;  %v2365_v36 = vmax.f32 %v2267_v0, %v1699_v63  ;;  %v2171_v58 = vmax.f32 %v4213_v55, %v1219_v42  ;;  %v4695_v63 = vld [vmem:[#allocation5_spill] sm:$0xff] }
 0x176   :  { %2518 = vst [vmem:[%s4639_s3 + $0x80] sm:$0xff] %v2469_v33  ;;  %v2422_v45 = vadd.f32 %v4342_v14, %v2366_v51  ;;  %v2270_v27 = vmax.f32 %v2172_v6, %v4227_v62  ;;  %v4698_v6 = vld [vmem:[#allocation14_spill] sm:$0xff] }
 0x177   :  { %2517 = vst [vmem:[%s4639_s3 + $0x78] sm:$0xff] %v2468_v21  ;;  %v2421_v52 = vadd.f32 %v4342_v14, %v2365_v36  ;;  %v3086_v61 = vpop.f32.mrb[70].mxu0  ;;  %v2269_v18 = vmax.f32 %v2171_v58, %v4215_v56  ;;  %v3233_v22 = vpop.f32.mrb[70].mxu1 }
 0x178   :  { %v2471_v39 = vmax.f32 %v2422_v45, 0.0  ;;  %v2368_v55 = vmax.f32 %v2270_v27, %v3230_v24  ;;  %v2174_v7 = vmax.f32 %v4233_v1, %v3086_v61  ;;  %v1229_v8 = vpop.f32.mrb[71].mxu0  ;;  %v1719_v11 = vpop.f32.mrb[71].mxu1  ;;  %v4699_v45 = vld [vmem:[#allocation8_spill] sm:$0xff]  ;;  %v4700_v61 = vld [vmem:[#allocation15_spill] sm:$0xff] }
 0x179   :  { %v2470_v34 = vmax.f32 %v2421_v52, 0.0  ;;  %v2367_v25 = vmax.f32 %v2269_v18, %v1709_v17  ;;  %v2173_v62 = vmax.f32 %v4221_v59, %v1229_v8 }
 0x17a   :  { %2520 = vst [vmem:[%s4639_s3 + $0x90] sm:$0xff] %v2471_v39  ;;  %v2424_v46 = vadd.f32 %v4342_v14, %v2368_v55  ;;  %v2272_v19 = vmax.f32 %v2174_v7, %v4235_v2  ;;  %v4701_v55 = vld [vmem:[#allocation9_spill] sm:$0xff] }
 0x17b   :  { %2519 = vst [vmem:[%s4639_s3 + $0x88] sm:$0xff] %v2470_v34  ;;  %v2423_v56 = vadd.f32 %v4342_v14, %v2367_v25  ;;  %v3089_v1 = vpop.f32.mrb[72].mxu0  ;;  %v2271_v28 = vmax.f32 %v2173_v62, %v4223_v60  ;;  %v3236_v40 = vpop.f32.mrb[72].mxu1  ;;  %v4702_v25 = vld [vmem:[#allocation18_spill] sm:$0xff] }
 0x17c   :  { %v2473_v49 = vmax.f32 %v2424_v46, 0.0  ;;  %v2370_v59 = vmax.f32 %v2272_v19, %v3233_v22  ;;  %v2176_v37 = vmax.f32 %v4241_v5, %v3089_v1  ;;  %v1239_v26 = vpop.f32.mrb[73].mxu0  ;;  %v1729_v20 = vpop.f32.mrb[73].mxu1 }
 0x17d   :  { %v2472_v43 = vmax.f32 %v2423_v56, 0.0  ;;  %v2369_v12 = vmax.f32 %v2271_v28, %v1719_v11  ;;  %v2175_v2 = vmax.f32 %v4691_v31, %v1239_v26  ;;  %v4703_v28 = vld [vmem:[#allocation12_spill] sm:$0xff] }
 0x17e   :  { %2522 = vst [vmem:[%s4639_s3 + $0xa0] sm:$0xff] %v2473_v49  ;;  %v2426_v4 = vadd.f32 %v4342_v14, %v2370_v59  ;;  %v2274_v29 = vmax.f32 %v2176_v37, %v4692_v13  ;;  %v4704_v59 = vld [vmem:[#allocation19_spill] sm:$0xff]  ;;  %v4706_v13 = vld [vmem:[#allocation22_spill] sm:$0xff] }
 0x17f   :  { %2521 = vst [vmem:[%s4639_s3 + $0x98] sm:$0xff] %v2472_v43  ;;  %v2425_v60 = vadd.f32 %v4342_v14, %v2369_v12  ;;  %v3092_v5 = vpop.f32.mrb[74].mxu0  ;;  %v2273_v10 = vmax.f32 %v2175_v2, %v4693_v50  ;;  %v3239_v3 = vpop.f32.mrb[74].mxu1  ;;  %v4705_v43 = vld [vmem:[#allocation13_spill] sm:$0xff] }
 0x180   :  { %v2475_v44 = vmax.f32 %v2426_v4, 0.0  ;;  %v2372_v53 = vmax.f32 %v2274_v29, %v3236_v40  ;;  %v2178_v15 = vmax.f32 %v4694_v38, %v3092_v5  ;;  %v1249_v23 = vpop.f32.mrb[75].mxu0  ;;  %v1739_v47 = vpop.f32.mrb[75].mxu1  ;;  %v4708_v38 = vld [vmem:[#allocation23_spill] sm:$0xff] }
 0x181   :  { %v2474_v32 = vmax.f32 %v2425_v60, 0.0  ;;  %v2371_v41 = vmax.f32 %v2273_v10, %v1729_v20  ;;  %v2177_v16 = vmax.f32 %v4695_v63, %v1249_v23 }
 0x182   :  { %2524 = vst [vmem:[%s4639_s3 + $0xb0] sm:$0xff] %v2475_v44  ;;  %v2428_v9 = vadd.f32 %v4342_v14, %v2372_v53  ;;  %v2276_v35 = vmax.f32 %v2178_v15, %v4696_v54  ;;  %v4710_v54 = vld [vmem:[#allocation26_spill] sm:$0xff] }
 0x183   :  { %2523 = vst [vmem:[%s4639_s3 + $0xa8] sm:$0xff] %v2474_v32  ;;  %v2427_v30 = vadd.f32 %v4342_v14, %v2371_v41  ;;  %v3095_v48 = vpop.f32.mrb[76].mxu0  ;;  %v2275_v0 = vmax.f32 %v2177_v16, %v4697_v57  ;;  %v3242_v24 = vpop.f32.mrb[76].mxu1  ;;  %v4709_v32 = vld [vmem:[#allocation17_spill] sm:$0xff] }
 0x184   :  { %v2477_v33 = vmax.f32 %v2428_v9, 0.0  ;;  %v2374_v51 = vmax.f32 %v2276_v35, %v3239_v3  ;;  %v2180_v42 = vmax.f32 %v4698_v6, %v3095_v48  ;;  %v1259_v17 = vpop.f32.mrb[77].mxu0  ;;  %v1749_v21 = vpop.f32.mrb[77].mxu1  ;;  %v4707_v3 = vld [vmem:[#allocation16_spill] sm:$0xff]  ;;  %v4712_v6 = vld [vmem:[#allocation27_spill] sm:$0xff] }
 0x185   :  { %v2476_v36 = vmax.f32 %v2427_v30, 0.0  ;;  %v2373_v58 = vmax.f32 %v2275_v0, %v1739_v47  ;;  %v2179_v27 = vmax.f32 %v4699_v45, %v1259_v17 }
 0x186   :  { %2526 = vst [vmem:[%s4639_s3 + $0xc0] sm:$0xff] %v2477_v33  ;;  %v2430_v52 = vadd.f32 %v4342_v14, %v2374_v51  ;;  %v2278_v18 = vmax.f32 %v2180_v42, %v4700_v61  ;;  %v4714_v61 = vld [vmem:[#allocation30_spill] sm:$0xff] }
 0x187   :  { %2525 = vst [vmem:[%s4639_s3 + $0xb8] sm:$0xff] %v2476_v36  ;;  %v2429_v22 = vadd.f32 %v4342_v14, %v2373_v58  ;;  %v3098_v39 = vpop.f32.mrb[78].mxu0  ;;  %v2277_v7 = vmax.f32 %v2179_v27, %v4701_v55  ;;  %v3245_v8 = vpop.f32.mrb[78].mxu1  ;;  %v4713_v36 = vld [vmem:[#allocation21_spill] sm:$0xff] }
 0x188   :  { %v2479_v11 = vmax.f32 %v2430_v52, 0.0  ;;  %v2376_v34 = vmax.f32 %v2278_v18, %v3242_v24  ;;  %v2182_v62 = vmax.f32 %v4702_v25, %v3098_v39  ;;  %v1269_v46 = vpop.f32.mrb[79].mxu0  ;;  %v1759_v19 = vpop.f32.mrb[79].mxu1  ;;  %v4711_v24 = vld [vmem:[#allocation20_spill] sm:$0xff]  ;;  %v4716_v25 = vld [vmem:[#allocation31_spill] sm:$0xff] }
 0x189   :  { %v2478_v56 = vmax.f32 %v2429_v22, 0.0  ;;  %v2375_v1 = vmax.f32 %v2277_v7, %v1749_v21  ;;  %v2181_v40 = vmax.f32 %v4703_v28, %v1269_v46 }
 0x18a   :  { %2528 = vst [vmem:[%s4639_s3 + $0xd0] sm:$0xff] %v2479_v11  ;;  %v2432_v49 = vadd.f32 %v4342_v14, %v2376_v34  ;;  %v2280_v37 = vmax.f32 %v2182_v62, %v4704_v59  ;;  %v4718_v59 = vld [vmem:[#allocation34_spill] sm:$0xff] }
 0x18b   :  { %2527 = vst [vmem:[%s4639_s3 + $0xc8] sm:$0xff] %v2478_v56  ;;  %v2431_v26 = vadd.f32 %v4342_v14, %v2375_v1  ;;  %v3101_v20 = vpop.f32.mrb[80].mxu0  ;;  %v2279_v12 = vmax.f32 %v2181_v40, %v4705_v43  ;;  %v3248_v31 = vpop.f32.mrb[80].mxu1  ;;  %v4717_v56 = vld [vmem:[#allocation25_spill] sm:$0xff] }
 0x18c   :  { %v2481_v2 = vmax.f32 %v2432_v49, 0.0  ;;  %v2378_v4 = vmax.f32 %v2280_v37, %v3245_v8  ;;  %v2184_v29 = vmax.f32 %v4706_v13, %v3101_v20  ;;  %v1279_v60 = vpop.f32.mrb[81].mxu0  ;;  %v1769_v5 = vpop.f32.mrb[81].mxu1  ;;  %v4715_v8 = vld [vmem:[#allocation24_spill] sm:$0xff]  ;;  %v4720_v13 = vld [vmem:[#allocation35_spill] sm:$0xff] }
 0x18d   :  { %v2480_v50 = vmax.f32 %v2431_v26, 0.0  ;;  %v2377_v10 = vmax.f32 %v2279_v12, %v1759_v19  ;;  %v2183_v44 = vmax.f32 %v4707_v3, %v1279_v60 }
 0x18e   :  { %2530 = vst [vmem:[%s4639_s3 + $0xe0] sm:$0xff] %v2481_v2  ;;  %v2434_v53 = vadd.f32 %v4342_v14, %v2378_v4  ;;  %v2282_v15 = vmax.f32 %v2184_v29, %v4708_v38  ;;  %v4722_v38 = vld [vmem:[#allocation38_spill] sm:$0xff] }
 0x18f   :  { %2529 = vst [vmem:[%s4639_s3 + $0xd8] sm:$0xff] %v2480_v50  ;;  %v2433_v23 = vadd.f32 %v4342_v14, %v2377_v10  ;;  %v3104_v47 = vpop.f32.mrb[82].mxu0  ;;  %v2281_v41 = vmax.f32 %v2183_v44, %v4709_v32  ;;  %v3251_v63 = vpop.f32.mrb[82].mxu1  ;;  %v4721_v50 = vld [vmem:[#allocation29_spill] sm:$0xff] }
 0x190   :  { %v2483_v16 = vmax.f32 %v2434_v53, 0.0  ;;  %v2380_v9 = vmax.f32 %v2282_v15, %v3248_v31  ;;  %v2186_v35 = vmax.f32 %v4710_v54, %v3104_v47  ;;  %v1289_v30 = vpop.f32.mrb[83].mxu0  ;;  %v1779_v48 = vpop.f32.mrb[83].mxu1  ;;  %v4719_v31 = vld [vmem:[#allocation28_spill] sm:$0xff]  ;;  %v4724_v54 = vld [vmem:[#allocation39_spill] sm:$0xff] }
 0x191   :  { %v2482_v57 = vmax.f32 %v2433_v23, 0.0  ;;  %v2379_v0 = vmax.f32 %v2281_v41, %v1769_v5  ;;  %v2185_v33 = vmax.f32 %v4711_v24, %v1289_v30 }
 0x192   :  { %2532 = vst [vmem:[%s4639_s3 + $0xf0] sm:$0xff] %v2483_v16  ;;  %v2436_v51 = vadd.f32 %v4342_v14, %v2380_v9  ;;  %v2284_v42 = vmax.f32 %v2186_v35, %v4712_v6  ;;  %v4726_v6 = vld [vmem:[#allocation42_spill] sm:$0xff] }
 0x193   :  { %2531 = vst [vmem:[%s4639_s3 + $0xe8] sm:$0xff] %v2482_v57  ;;  %v2435_v17 = vadd.f32 %v4342_v14, %v2379_v0  ;;  %v3107_v21 = vpop.f32.mrb[84].mxu0  ;;  %v2283_v58 = vmax.f32 %v2185_v33, %v4713_v36  ;;  %v3254_v45 = vpop.f32.mrb[84].mxu1  ;;  %v4725_v57 = vld [vmem:[#allocation33_spill] sm:$0xff] }
 0x194   :  { %v2485_v27 = vmax.f32 %v2436_v51, 0.0  ;;  %v2382_v52 = vmax.f32 %v2284_v42, %v3251_v63  ;;  %v2188_v18 = vmax.f32 %v4714_v61, %v3107_v21  ;;  %v1299_v22 = vpop.f32.mrb[85].mxu0  ;;  %v1789_v39 = vpop.f32.mrb[85].mxu1  ;;  %v4723_v63 = vld [vmem:[#allocation32_spill] sm:$0xff]  ;;  %v4728_v61 = vld [vmem:[#allocation43_spill] sm:$0xff] }
 0x195   :  { %v2484_v55 = vmax.f32 %v2435_v17, 0.0  ;;  %v2381_v7 = vmax.f32 %v2283_v58, %v1779_v48  ;;  %v2187_v11 = vmax.f32 %v4715_v8, %v1299_v22 }
 0x196   :  { %2534 = vst [vmem:[%s4639_s3 + $0x100] sm:$0xff] %v2485_v27  ;;  %v2438_v34 = vadd.f32 %v4342_v14, %v2382_v52  ;;  %v2286_v62 = vmax.f32 %v2188_v18, %v4716_v25  ;;  %v4730_v25 = vld [vmem:[#allocation46_spill] sm:$0xff] }
 0x197   :  { %2533 = vst [vmem:[%s4639_s3 + $0xf8] sm:$0xff] %v2484_v55  ;;  %v2437_v46 = vadd.f32 %v4342_v14, %v2381_v7  ;;  %v3110_v19 = vpop.f32.mrb[86].mxu0  ;;  %v2285_v1 = vmax.f32 %v2187_v11, %v4717_v56  ;;  %v3257_v28 = vpop.f32.mrb[86].mxu1  ;;  %v4729_v55 = vld [vmem:[#allocation37_spill] sm:$0xff] }
 0x198   :  { %v2487_v40 = vmax.f32 %v2438_v34, 0.0  ;;  %v2384_v49 = vmax.f32 %v2286_v62, %v3254_v45  ;;  %v2190_v37 = vmax.f32 %v4718_v59, %v3110_v19  ;;  %v1309_v26 = vpop.f32.mrb[87].mxu0  ;;  %v1799_v20 = vpop.f32.mrb[87].mxu1  ;;  %v4727_v45 = vld [vmem:[#allocation36_spill] sm:$0xff]  ;;  %v4732_v59 = vld [vmem:[#allocation47_spill] sm:$0xff] }
 0x199   :  { %v2486_v43 = vmax.f32 %v2437_v46, 0.0  ;;  %v2383_v12 = vmax.f32 %v2285_v1, %v1789_v39  ;;  %v2189_v2 = vmax.f32 %v4719_v31, %v1309_v26 }
 0x19a   :  { %2536 = vst [vmem:[%s4639_s3 + $0x110] sm:$0xff] %v2487_v40  ;;  %v2440_v4 = vadd.f32 %v4342_v14, %v2384_v49  ;;  %v2288_v29 = vmax.f32 %v2190_v37, %v4720_v13  ;;  %v4734_v13 = vld [vmem:[#allocation50_spill] sm:$0xff] }
 0x19b   :  { %2535 = vst [vmem:[%s4639_s3 + $0x108] sm:$0xff] %v2486_v43  ;;  %v2439_v60 = vadd.f32 %v4342_v14, %v2383_v12  ;;  %v3113_v5 = vpop.f32.mrb[88].mxu0  ;;  %v2287_v10 = vmax.f32 %v2189_v2, %v4721_v50  ;;  %v3260_v3 = vpop.f32.mrb[88].mxu1  ;;  %v4733_v43 = vld [vmem:[#allocation41_spill] sm:$0xff] }
 0x19c   :  { %v2489_v44 = vmax.f32 %v2440_v4, 0.0  ;;  %v2386_v53 = vmax.f32 %v2288_v29, %v3257_v28  ;;  %v2192_v15 = vmax.f32 %v4722_v38, %v3113_v5  ;;  %v1319_v23 = vpop.f32.mrb[89].mxu0  ;;  %v1809_v47 = vpop.f32.mrb[89].mxu1  ;;  %v4731_v28 = vld [vmem:[#allocation40_spill] sm:$0xff]  ;;  %v4736_v38 = vld [vmem:[#allocation51_spill] sm:$0xff] }
 0x19d   :  { %v2488_v32 = vmax.f32 %v2439_v60, 0.0  ;;  %v2385_v41 = vmax.f32 %v2287_v10, %v1799_v20  ;;  %v2191_v16 = vmax.f32 %v4723_v63, %v1319_v23 }
 0x19e   :  { %2538 = vst [vmem:[%s4639_s3 + $0x120] sm:$0xff] %v2489_v44  ;;  %v2442_v9 = vadd.f32 %v4342_v14, %v2386_v53  ;;  %v2290_v35 = vmax.f32 %v2192_v15, %v4724_v54  ;;  %v4738_v54 = vld [vmem:[#allocation52_spill] sm:$0xff] }
 0x19f   :  { %2537 = vst [vmem:[%s4639_s3 + $0x118] sm:$0xff] %v2488_v32  ;;  %v2441_v30 = vadd.f32 %v4342_v14, %v2385_v41  ;;  %v3116_v48 = vpop.f32.mrb[90].mxu0  ;;  %v2289_v0 = vmax.f32 %v2191_v16, %v4725_v57  ;;  %v3263_v24 = vpop.f32.mrb[90].mxu1  ;;  %v4737_v32 = vld [vmem:[#allocation45_spill] sm:$0xff] }
 0x1a0   :  { %v2491_v33 = vmax.f32 %v2442_v9, 0.0  ;;  %v2388_v51 = vmax.f32 %v2290_v35, %v3260_v3  ;;  %v2194_v42 = vmax.f32 %v4726_v6, %v3116_v48  ;;  %v1329_v17 = vpop.f32.mrb[91].mxu0  ;;  %v1819_v21 = vpop.f32.mrb[91].mxu1  ;;  %v4735_v3 = vld [vmem:[#allocation44_spill] sm:$0xff]  ;;  %v4740_v6 = vld [vmem:[#allocation53_spill] sm:$0xff] }
 0x1a1   :  { %v2490_v36 = vmax.f32 %v2441_v30, 0.0  ;;  %v2387_v58 = vmax.f32 %v2289_v0, %v1809_v47  ;;  %v2193_v27 = vmax.f32 %v4727_v45, %v1329_v17 }
 0x1a2   :  { %2540 = vst [vmem:[%s4639_s3 + $0x130] sm:$0xff] %v2491_v33  ;;  %v2444_v52 = vadd.f32 %v4342_v14, %v2388_v51  ;;  %v2292_v18 = vmax.f32 %v2194_v42, %v4728_v61 }
 0x1a3   :  { %2539 = vst [vmem:[%s4639_s3 + $0x128] sm:$0xff] %v2490_v36  ;;  %v2443_v22 = vadd.f32 %v4342_v14, %v2387_v58  ;;  %v3119_v39 = vpop.f32.mrb[92].mxu0  ;;  %v2291_v7 = vmax.f32 %v2193_v27, %v4729_v55  ;;  %v3266_v8 = vpop.f32.mrb[92].mxu1 }
 0x1a4   :  { %v2493_v11 = vmax.f32 %v2444_v52, 0.0  ;;  %v2390_v34 = vmax.f32 %v2292_v18, %v3263_v24  ;;  %v2196_v62 = vmax.f32 %v4730_v25, %v3119_v39  ;;  %v1339_v46 = vpop.f32.mrb[93].mxu0  ;;  %v1829_v19 = vpop.f32.mrb[93].mxu1  ;;  %v4739_v24 = vld [vmem:[#allocation48_spill] sm:$0xff] }
 0x1a5   :  { %v2492_v56 = vmax.f32 %v2443_v22, 0.0  ;;  %v2389_v1 = vmax.f32 %v2291_v7, %v1819_v21  ;;  %v2195_v40 = vmax.f32 %v4731_v28, %v1339_v46  ;;  %v4741_v21 = vld [vmem:[#allocation49_spill] sm:$0xff] }
 0x1a6   :  { %2542 = vst [vmem:[%s4639_s3 + $0x140] sm:$0xff] %v2493_v11  ;;  %v2446_v49 = vadd.f32 %v4342_v14, %v2390_v34  ;;  %v2294_v37 = vmax.f32 %v2196_v62, %v4732_v59 }
 0x1a7   :  { %2541 = vst [vmem:[%s4639_s3 + $0x138] sm:$0xff] %v2492_v56  ;;  %v2445_v26 = vadd.f32 %v4342_v14, %v2389_v1  ;;  %v3122_v20 = vpop.f32.mrb[94].mxu0  ;;  %v2293_v12 = vmax.f32 %v2195_v40, %v4733_v43  ;;  %v3269_v31 = vpop.f32.mrb[94].mxu1 }
 0x1a8   :  { %v2495_v2 = vmax.f32 %v2446_v49, 0.0  ;;  %v2392_v4 = vmax.f32 %v2294_v37, %v3266_v8  ;;  %v2198_v29 = vmax.f32 %v4734_v13, %v3122_v20  ;;  %v1349_v60 = vpop.f32.mrb[95].mxu0  ;;  %v1839_v5 = vpop.f32.mrb[95].mxu1 }
 0x1a9   :  { %v2494_v50 = vmax.f32 %v2445_v26, 0.0  ;;  %v2391_v10 = vmax.f32 %v2293_v12, %v1829_v19  ;;  %v2197_v44 = vmax.f32 %v4735_v3, %v1349_v60 }
 0x1aa   :  { %2544 = vst [vmem:[%s4639_s3 + $0x150] sm:$0xff] %v2495_v2  ;;  %v2448_v53 = vadd.f32 %v4342_v14, %v2392_v4  ;;  %v2296_v15 = vmax.f32 %v2198_v29, %v4736_v38 }
 0x1ab   :  { %2543 = vst [vmem:[%s4639_s3 + $0x148] sm:$0xff] %v2494_v50  ;;  %v2447_v23 = vadd.f32 %v4342_v14, %v2391_v10  ;;  %v3125_v47 = vpop.f32.mrb[96].mxu0  ;;  %v2295_v41 = vmax.f32 %v2197_v44, %v4737_v32  ;;  %v3272_v63 = vpop.f32.mrb[96].mxu1 }
 0x1ac   :  { %v2497_v16 = vmax.f32 %v2448_v53, 0.0  ;;  %v2394_v9 = vmax.f32 %v2296_v15, %v3269_v31  ;;  %v2200_v35 = vmax.f32 %v4738_v54, %v3125_v47  ;;  %v1359_v30 = vpop.f32.mrb[97].mxu0  ;;  %v1849_v48 = vpop.f32.mrb[97].mxu1 }
 0x1ad   :  { %v2496_v57 = vmax.f32 %v2447_v23, 0.0  ;;  %v2393_v0 = vmax.f32 %v2295_v41, %v1839_v5  ;;  %v2199_v33 = vmax.f32 %v4739_v24, %v1359_v30 }
 0x1ae   :  { %2546 = vst [vmem:[%s4639_s3 + $0x160] sm:$0xff] %v2497_v16  ;;  %v2450_v51 = vadd.f32 %v4342_v14, %v2394_v9  ;;  %v2298_v42 = vmax.f32 %v2200_v35, %v4740_v6 }
 0x1af   :  { %2545 = vst [vmem:[%s4639_s3 + $0x158] sm:$0xff] %v2496_v57  ;;  %v2449_v17 = vadd.f32 %v4342_v14, %v2393_v0  ;;  %v2297_v36 = vmax.f32 %v2199_v33, %v4741_v21 }
 0x1b0   :  { %v2499_v58 = vmax.f32 %v2450_v51, 0.0  ;;  %v2396_v45 = vmax.f32 %v2298_v42, %v3272_v63 }
 0x1b1   :  { %v2498_v27 = vmax.f32 %v2449_v17, 0.0  ;;  %v2395_v52 = vmax.f32 %v2297_v36, %v1849_v48 }
 0x1b2   :  { %2548 = vst [vmem:[%s4639_s3 + $0x170] sm:$0xff] %v2499_v58  ;;  %v2452_v61 = vadd.f32 %v4342_v14, %v2396_v45 }
 0x1b3   :  { %2547 = vst [vmem:[%s4639_s3 + $0x168] sm:$0xff] %v2498_v27  ;;  %v2451_v18 = vadd.f32 %v4342_v14, %v2395_v52 }
 0x1b4   :  { %v2501_v22 = vmax.f32 %v2452_v61, 0.0 }
 0x1b5   :  { %v2500_v39 = vmax.f32 %v2451_v18, 0.0 }
 0x1b6   :  { %2550 = vst [vmem:[%s4639_s3 + $0x180] sm:$0xff] %v2501_v22 }
 0x1b7   :  { %2549 = vst [vmem:[%s4639_s3 + $0x178] sm:$0xff] %v2500_v39 }

// kernel: simple_cnn_forward.3
= control target key start
LH: loop header
LB: loop body
LE: loop exit
PB: predicated region body
PF: predicated region fallthrough
CT: control target
= control target key end

     0   :  { %v3317_v3 = vmov 0.0|0.0   ;;  %vm102_vm0 = vcmask 179200   ;;  %s5073_s0 = inlined_call_operand.vmem [shape: f32[200,150], index: 0, kind: input, shape index: {}]   ;;  %s5074_s1 = inlined_call_operand.vmem [shape: f32[150,128], index: 1, kind: input, shape index: {}]   ;;  %s5075_s2 = inlined_call_operand.vmem [shape: f32[1,128], index: 2, kind: input, shape index: {}]   ;;  %s5076_s3 = inlined_call_operand.vmem [shape: f32[3200,128], index: 3, kind: input, shape index: {}]   ;;  %s5077_s4 = inlined_call_operand.vmem [shape: f32[1,128], index: 4, kind: input, shape index: {}]   ;;  %s5078_s5 = inlined_call_operand.vmem [shape: f32[128,128], index: 5, kind: input, shape index: {}]   ;;  %s5079_s6 = inlined_call_operand.vmem [shape: f32[1,128], index: 6, kind: input, shape index: {}]   ;;  %s5080_s7 = inlined_call_operand.vmem [shape: f32[128,128], index: 7, kind: input, shape index: {}]   ;;  %s5081_s8 = inlined_call_operand.vmem [shape: f32[1,128], index: 8, kind: input, shape index: {}]   ;;  %s5082_s9 = inlined_call_operand.hbm [shape: f32[2,128], index: 9, kind: output, shape index: {}]  }
   0x1   :  { %v83_v0 = vld [vmem:[%s5074_s1] sm:$0xff]  ;;  %v84_v1 = vld [vmem:[%s5074_s1 + $0x8] sm:$0xff]  ;;  %v85_v2 = vld [vmem:[%s5074_s1 + $0x10] sm:$0xff]  ;;  %2799 = vmatprep.subr.bf16.mxu0 %v3317_v3 }
   0x2   :  { %v2800_v4 = vpack.c.bf16 %v84_v1, %v83_v0  ;;  %v86_v5 = vld [vmem:[%s5074_s1 + $0x18] sm:$0xff]  ;;  %v87_v7 = vld [vmem:[%s5074_s1 + $0x20] sm:$0xff]  ;;  %v88_v8 = vld [vmem:[%s5074_s1 + $0x28] sm:$0xff] }
   0x3   :  { %v2803_v6 = vpack.c.bf16 %v86_v5, %v85_v2  ;;  %v34_v9 = vld [vmem:[%s5073_s0 + $0x8] sm:$0xff]  ;;  %v2806_v10 = vpack.c.bf16 %v88_v8, %v87_v7  ;;  %v89_v11 = vld [vmem:[%s5074_s1 + $0x30] sm:$0xff]  ;;  %v90_v12 = vld [vmem:[%s5074_s1 + $0x38] sm:$0xff] }
   0x4   :  { %2801 = vmatpush1.bf16.msra.mxu0 %v2800_v4  ;;  %2193 = vmatprep.mubr.msk.f32.mxu0 %vm102_vm0, %v34_v9  ;;  %v2809_v13 = vpack.c.bf16 %v90_v12, %v89_v11  ;;  %v91_v14 = vld [vmem:[%s5074_s1 + $0x40] sm:$0xff]  ;;  %v92_v15 = vld [vmem:[%s5074_s1 + $0x48] sm:$0xff]  ;;  %v93_v17 = vld [vmem:[%s5074_s1 + $0x50] sm:$0xff] }
   0x5   :  { %2802 = vmatprep.subr.bf16.mxu0 %v3317_v3  ;;  %v2812_v16 = vpack.c.bf16 %v92_v15, %v91_v14  ;;  %v94_v18 = vld [vmem:[%s5074_s1 + $0x58] sm:$0xff]  ;;  %v95_v20 = vld [vmem:[%s5074_s1 + $0x60] sm:$0xff]  ;;  %v96_v21 = vld [vmem:[%s5074_s1 + $0x68] sm:$0xff] }
   0x6   :  { %v2815_v19 = vpack.c.bf16 %v94_v18, %v93_v17  ;;  %v2818_v22 = vpack.c.bf16 %v96_v21, %v95_v20 }
   0x8   :  { %2804 = vmatpush1.bf16.msra.mxu0 %v2803_v6 }
   0x9   :  { %2805 = vmatprep.subr.bf16.mxu0 %v3317_v3 }
   0xc   :  { %2807 = vmatpush1.bf16.msra.mxu0 %v2806_v10 }
   0xd   :  { %2808 = vmatprep.subr.bf16.mxu0 %v3317_v3 }
  0x10   :  { %2810 = vmatpush1.bf16.msra.mxu0 %v2809_v13 }
  0x11   :  { %2811 = vmatprep.subr.bf16.mxu0 %v3317_v3 }
  0x14   :  { %2813 = vmatpush1.bf16.msra.mxu0 %v2812_v16 }
  0x15   :  { %2814 = vmatprep.subr.bf16.mxu0 %v3317_v3 }
  0x18   :  { %2816 = vmatpush1.bf16.msra.mxu0 %v2815_v19 }
  0x19   :  { %14 = vsyncpa [#allocation6], 0  ;;  %2817 = vmatprep.subr.bf16.mxu0 %v3317_v3  ;;  %v97_v23 = vld [vmem:[%s5074_s1 + $0x70] sm:$0xff]  ;;  %v98_v24 = vld [vmem:[%s5074_s1 + $0x78] sm:$0xff]  ;;  %v3318_v29 = vmov 0.0   ;;  %vm178_vm1 = vcmask 1045504  }
  0x1a   :  { %v2821_v25 = vpack.c.bf16 %v98_v24, %v97_v23  ;;  %v99_v26 = vld [vmem:[%s5074_s1 + $0x80] sm:$0xff]  ;;  %v100_v27 = vld [vmem:[%s5074_s1 + $0x88] sm:$0xff]  ;;  %v101_v30 = vld [vmem:[%s5074_s1 + $0x90] sm:$0x3f]  ;;  %vm3320_vm2 = vmmov 0   ;;  %s3321_s21 = smov [#allocation5]  }
  0x1b   :  { %v2824_v28 = vpack.c.bf16 %v100_v27, %v99_v26  ;;  %v33_v31 = vld [vmem:[%s5073_s0] sm:$0xff]  ;;  %v36_v32 = vld [vmem:[%s5073_s0 + $0x18] sm:$0xff]  ;;  %v35_v33 = vld [vmem:[%s5073_s0 + $0x10] sm:$0xff]  ;;  %s2184_s22 = sshll.u32 %s3321_s21, 4  ;;  %s2185_s22 = int_to_ptr.vmem [resolvable:$true] %s2184_s22 }
  0x1c   :  { %2819 = vmatpush1.bf16.msra.mxu0 %v2818_v22  ;;  %v38_v34 = vld [vmem:[%s5073_s0 + $0x28] sm:$0xff]  ;;  %v37_v35 = vld [vmem:[%s5073_s0 + $0x20] sm:$0xff]  ;;  %v40_v36 = vld [vmem:[%s5073_s0 + $0x38] sm:$0xff]  ;;  %p3298_p1 = scmp.lt.s32.totalorder %s2185_s22, %s2185_s22 }
  0x1d   :  { %2820 = vmatprep.subr.bf16.mxu0 %v3317_v3  ;;  %v39_v37 = vld [vmem:[%s5073_s0 + $0x30] sm:$0xff]  ;;  %v42_v38 = vld [vmem:[%s5073_s0 + $0x48] sm:$0xff]  ;;  %v41_v39 = vld [vmem:[%s5073_s0 + $0x40] sm:$0xff] }
  0x1e   :  { %v44_v40 = vld [vmem:[%s5073_s0 + $0x58] sm:$0xff]  ;;  %v43_v41 = vld [vmem:[%s5073_s0 + $0x50] sm:$0xff]  ;;  %v46_v42 = vld [vmem:[%s5073_s0 + $0x68] sm:$0xff] }
  0x1f   :  { %v45_v43 = vld [vmem:[%s5073_s0 + $0x60] sm:$0xff]  ;;  %v48_v44 = vld [vmem:[%s5073_s0 + $0x78] sm:$0xff]  ;;  %v47_v45 = vld [vmem:[%s5073_s0 + $0x70] sm:$0xff] }
  0x20   :  { %2822 = vmatpush1.bf16.msra.mxu0 %v2821_v25  ;;  %v50_v46 = vld [vmem:[%s5073_s0 + $0x88] sm:$0xff]  ;;  %v49_v47 = vld [vmem:[%s5073_s0 + $0x80] sm:$0xff]  ;;  %v52_v48 = vld [vmem:[%s5073_s0 + $0x98] sm:$0xff] }
  0x21   :  { %2823 = vmatprep.subr.bf16.mxu0 %v3317_v3  ;;  %v51_v49 = vld [vmem:[%s5073_s0 + $0x90] sm:$0xff]  ;;  %v54_v50 = vld [vmem:[%s5073_s0 + $0xa8] sm:$0xff]  ;;  %v53_v51 = vld [vmem:[%s5073_s0 + $0xa0] sm:$0xff] }
  0x22   :  { %v56_v52 = vld [vmem:[%s5073_s0 + $0xb8] sm:$0xff]  ;;  %v55_v53 = vld [vmem:[%s5073_s0 + $0xb0] sm:$0xff]  ;;  %v58_v54 = vld [vmem:[%s5073_s0 + $0xc8] sm:$0xff] }
  0x23   :  { %v57_v55 = vld [vmem:[%s5073_s0 + $0xc0] sm:$0xff]  ;;  %v60_v56 = vld [vmem:[%s5073_s0 + $0xd8] sm:$0xff]  ;;  %v59_v57 = vld [vmem:[%s5073_s0 + $0xd0] sm:$0xff] }
  0x24   :  { %2825 = vmatpush1.bf16.msra.mxu0 %v2824_v28  ;;  %v62_v58 = vld [vmem:[%s5073_s0 + $0xe8] sm:$0xff]  ;;  %v61_v59 = vld [vmem:[%s5073_s0 + $0xe0] sm:$0xff]  ;;  %v64_v60 = vld [vmem:[%s5073_s0 + $0xf8] sm:$0xff] }
  0x25   :  { %218 = vmatprep.subr.mxu0 %v3318_v29  ;;  %v63_v61 = vld [vmem:[%s5073_s0 + $0xf0] sm:$0xff]  ;;  %v66_v62 = vld [vmem:[%s5073_s0 + $0x108] sm:$0xff]  ;;  %v65_v63 = vld [vmem:[%s5073_s0 + $0x100] sm:$0xff] }
  0x26   :  { %v68_v0 = vld [vmem:[%s5073_s0 + $0x118] sm:$0xff]  ;;  %v67_v1 = vld [vmem:[%s5073_s0 + $0x110] sm:$0xff]  ;;  %v70_v2 = vld [vmem:[%s5073_s0 + $0x128] sm:$0xff] }
  0x27   :  { %v69_v4 = vld [vmem:[%s5073_s0 + $0x120] sm:$0xff]  ;;  %v72_v5 = vld [vmem:[%s5073_s0 + $0x138] sm:$0xff]  ;;  %v71_v6 = vld [vmem:[%s5073_s0 + $0x130] sm:$0xff] }
  0x28   :  { %2192 = vmatpush1.msk.msra.mxu0 %vm178_vm1, %v101_v30  ;;  %v74_v7 = vld [vmem:[%s5073_s0 + $0x148] sm:$0xff]  ;;  %v73_v8 = vld [vmem:[%s5073_s0 + $0x140] sm:$0xff]  ;;  %v76_v9 = vld [vmem:[%s5073_s0 + $0x158] sm:$0xff] }
  0x29   :  { %247 = vmatmul.mubr.f32.vlgmr.msra.gmra.mrb[0].mxu0 %v33_v31  ;;  %v75_v10 = vld [vmem:[%s5073_s0 + $0x150] sm:$0xff]  ;;  %v78_v11 = vld [vmem:[%s5073_s0 + $0x168] sm:$0xff]  ;;  %v77_v12 = vld [vmem:[%s5073_s0 + $0x160] sm:$0xff] }
  0x2a   :  { %2194 = vmatprep.mubr.msk.f32.mxu0 %vm102_vm0, %v36_v32  ;;  %v80_v13 = vld [vmem:[%s5073_s0 + $0x178] sm:$0xff]  ;;  %v79_v14 = vld [vmem:[%s5073_s0 + $0x170] sm:$0xff]  ;;  %v82_v15 = vld [vmem:[%s5073_s0 + $0x188] sm:$0xff] }
  0x2b   :  { %v81_v16 = vld [vmem:[%s5073_s0 + $0x180] sm:$0xff]  ;;  %v548_v18 = vld [vmem:[%s5076_s3 + $0x88] sm:$0xff]  ;;  %v549_v23 = vld [vmem:[%s5076_s3 + $0x90] sm:$0xff] }
  0x2c   :  { %v547_v17 = vld [vmem:[%s5076_s3 + $0x80] sm:$0xff]  ;;  %v532_v21 = vld [vmem:[%s5076_s3 + $0x8] sm:$0xff]  ;;  %v550_v24 = vld [vmem:[%s5076_s3 + $0x98] sm:$0xff] }
  0x2d   :  { %252 = vmatmul.mubr.f32.gmra.mrb[2].mxu0 %v35_v33  ;;  %v2826_v19 = vpack.c.bf16 %v548_v18, %v547_v17  ;;  %v531_v20 = vld [vmem:[%s5076_s3] sm:$0xff]  ;;  %v2830_v25 = vpack.c.bf16 %v550_v24, %v549_v23  ;;  %v533_v26 = vld [vmem:[%s5076_s3 + $0x10] sm:$0xff]  ;;  %v534_v27 = vld [vmem:[%s5076_s3 + $0x18] sm:$0xff] }
  0x2e   :  { %2195 = vmatprep.mubr.msk.f32.mxu0 %vm102_vm0, %v38_v34  ;;  %v2828_v22 = vpack.c.bf16 %v532_v21, %v531_v20  ;;  %v2832_v28 = vpack.c.bf16 %v534_v27, %v533_v26  ;;  %v551_v30 = vld [vmem:[%s5076_s3 + $0xa0] sm:$0xff]  ;;  %v552_v31 = vld [vmem:[%s5076_s3 + $0xa8] sm:$0xff]  ;;  %v561_v27 = vld [vmem:[%s5076_s3 + $0xf0] sm:$0xff] }
  0x2f   :  { %2827 = vmatprep.subr.bf16.mxu1 %v2826_v19  ;;  %v675_v32 = vld [vmem:[%s5076_s3 + $0x480] sm:$0xff]  ;;  %v2834_v33 = vpack.c.bf16 %v552_v31, %v551_v30  ;;  %v676_v34 = vld [vmem:[%s5076_s3 + $0x488] sm:$0xff]  ;;  %v685_v30 = vld [vmem:[%s5076_s3 + $0x4d0] sm:$0xff] }
  0x30   :  { %2829 = vmatpush3.bf16.msra.mxu1 %v2828_v22  ;;  %v683_v17 = vld [vmem:[%s5076_s3 + $0x4c0] sm:$0xff]  ;;  %v684_v19 = vld [vmem:[%s5076_s3 + $0x4c8] sm:$0xff] }
  0x31   :  { %257 = vmatmul.mubr.f32.gmra.mrb[4].mxu0 %v37_v35  ;;  %2831 = vmatprep.subr.bf16.mxu1 %v2830_v25  ;;  %v535_v35 = vld [vmem:[%s5076_s3 + $0x20] sm:$0xff]  ;;  %v544_v21 = vld [vmem:[%s5076_s3 + $0x68] sm:$0xff]  ;;  %v2970_v22 = vpack.c.bf16 %v684_v19, %v683_v17 }
  0x32   :  { %2196 = vmatprep.mubr.msk.f32.mxu0 %vm102_vm0, %v40_v36  ;;  %v2954_v36 = vpack.c.bf16 %v676_v34, %v675_v32  ;;  %v543_v20 = vld [vmem:[%s5076_s3 + $0x60] sm:$0xff]  ;;  %v668_v25 = vld [vmem:[%s5076_s3 + $0x448] sm:$0xff]  ;;  %v686_v32 = vld [vmem:[%s5076_s3 + $0x4d8] sm:$0xff] }
  0x33   :  { %v2852_v23 = vpack.c.bf16 %v544_v21, %v543_v20  ;;  %v667_v24 = vld [vmem:[%s5076_s3 + $0x440] sm:$0xff]  ;;  %v546_v34 = vld [vmem:[%s5076_s3 + $0x78] sm:$0xff] }
  0x34   :  { %2833 = vmatpush3.bf16.msra.mxu1 %v2832_v28  ;;  %2955 = vmatprep.subr.bf16.mxu0 %v2954_v36  ;;  %v2972_v26 = vpack.c.bf16 %v668_v25, %v667_v24  ;;  %v562_v28 = vld [vmem:[%s5076_s3 + $0xf8] sm:$0xff] }
  0x35   :  { %262 = vmatmul.mubr.f32.gmra.mrb[6].mxu0 %v39_v37  ;;  %v536_v37 = vld [vmem:[%s5076_s3 + $0x28] sm:$0xff]  ;;  %2835 = vmatprep.subr.bf16.mxu1 %v2834_v33  ;;  %v2854_v31 = vpack.c.bf16 %v562_v28, %v561_v27  ;;  %v545_v33 = vld [vmem:[%s5076_s3 + $0x70] sm:$0xff] }
  0x36   :  { %2197 = vmatprep.mubr.msk.f32.mxu0 %vm102_vm0, %v42_v38  ;;  %v659_v38 = vld [vmem:[%s5076_s3 + $0x400] sm:$0xff]  ;;  %v2856_v36 = vpack.c.bf16 %v546_v34, %v545_v33 }
  0x39   :  { %267 = vmatmul.mubr.f32.gmra.mrb[8].mxu0 %v41_v39  ;;  %v660_v39 = vld [vmem:[%s5076_s3 + $0x408] sm:$0xff] }
  0x3a   :  { %2198 = vmatprep.mubr.msk.f32.mxu0 %vm102_vm0, %v44_v40  ;;  %v2836_v40 = vpack.c.bf16 %v536_v37, %v535_v35  ;;  %v2974_v35 = vpack.c.bf16 %v686_v32, %v685_v30  ;;  %v669_v37 = vld [vmem:[%s5076_s3 + $0x450] sm:$0xff] }
  0x3c   :  { %2837 = vmatpush3.bf16.msra.mxu1 %v2836_v40  ;;  %v579_v40 = vld [vmem:[%s5076_s3 + $0x180] sm:$0xff] }
  0x3d   :  { %272 = vmatmul.mubr.f32.gmra.mrb[10].mxu0 %v43_v41  ;;  %v2956_v41 = vpack.c.bf16 %v660_v39, %v659_v38  ;;  %v670_v38 = vld [vmem:[%s5076_s3 + $0x458] sm:$0xff] }
  0x3e   :  { %2199 = vmatprep.mubr.msk.f32.mxu0 %vm102_vm0, %v46_v42  ;;  %v553_v42 = vld [vmem:[%s5076_s3 + $0xb0] sm:$0xff]  ;;  %v2976_v39 = vpack.c.bf16 %v670_v38, %v669_v37 }
  0x3f   :  { %2957 = vmatpush3.bf16.msra.mxu0 %v2956_v41  ;;  %v580_v41 = vld [vmem:[%s5076_s3 + $0x188] sm:$0xff] }
  0x41   :  { %277 = vmatmul.mubr.f32.gmra.mrb[12].mxu0 %v45_v43  ;;  %v554_v43 = vld [vmem:[%s5076_s3 + $0xb8] sm:$0xff] }
  0x42   :  { %2200 = vmatprep.mubr.msk.f32.mxu0 %vm102_vm0, %v48_v44  ;;  %v677_v44 = vld [vmem:[%s5076_s3 + $0x490] sm:$0xff] }
  0x45   :  { %282 = vmatmul.mubr.f32.gmra.mrb[14].mxu0 %v47_v45  ;;  %v2838_v45 = vpack.c.bf16 %v554_v43, %v553_v42  ;;  %v687_v42 = vld [vmem:[%s5076_s3 + $0x4e0] sm:$0xff]  ;;  %v2858_v43 = vpack.c.bf16 %v580_v41, %v579_v40 }
  0x46   :  { %2201 = vmatprep.mubr.msk.f32.mxu0 %vm102_vm0, %v50_v46  ;;  %v678_v46 = vld [vmem:[%s5076_s3 + $0x498] sm:$0xff] }
  0x47   :  { %2839 = vmatprep.subr.bf16.mxu1 %v2838_v45 }
  0x49   :  { %287 = vmatmul.mubr.f32.gmra.mrb[16].mxu0 %v49_v47  ;;  %v537_v47 = vld [vmem:[%s5076_s3 + $0x30] sm:$0xff] }
  0x4a   :  { %2202 = vmatprep.mubr.msk.f32.mxu0 %vm102_vm0, %v52_v48  ;;  %v538_v48 = vld [vmem:[%s5076_s3 + $0x38] sm:$0xff] }
  0x4d   :  { %292 = vmatmul.mubr.f32.gmra.mrb[18].mxu0 %v51_v49  ;;  %v2958_v49 = vpack.c.bf16 %v678_v46, %v677_v44  ;;  %v688_v44 = vld [vmem:[%s5076_s3 + $0x4e8] sm:$0xff]  ;;  %v671_v46 = vld [vmem:[%s5076_s3 + $0x460] sm:$0xff] }
  0x4e   :  { %2203 = vmatprep.mubr.msk.f32.mxu0 %vm102_vm0, %v54_v50  ;;  %v2840_v50 = vpack.c.bf16 %v538_v48, %v537_v47  ;;  %v2978_v45 = vpack.c.bf16 %v688_v44, %v687_v42  ;;  %v672_v47 = vld [vmem:[%s5076_s3 + $0x468] sm:$0xff] }
  0x4f   :  { %2959 = vmatprep.subr.bf16.mxu0 %v2958_v49  ;;  %v2980_v48 = vpack.c.bf16 %v672_v47, %v671_v46  ;;  %v689_v49 = vld [vmem:[%s5076_s3 + $0x4f0] sm:$0xff] }
  0x50   :  { %2841 = vmatpush3.bf16.msra.mxu1 %v2840_v50  ;;  %v690_v50 = vld [vmem:[%s5076_s3 + $0x4f8] sm:$0xff] }
  0x51   :  { %297 = vmatmul.mubr.f32.gmra.mrb[20].mxu0 %v53_v51  ;;  %v661_v51 = vld [vmem:[%s5076_s3 + $0x410] sm:$0xff] }
  0x52   :  { %2204 = vmatprep.mubr.msk.f32.mxu0 %vm102_vm0, %v56_v52  ;;  %v662_v52 = vld [vmem:[%s5076_s3 + $0x418] sm:$0xff] }
  0x55   :  { %302 = vmatmul.mubr.f32.gmra.mrb[22].mxu0 %v55_v53  ;;  %v2960_v53 = vpack.c.bf16 %v662_v52, %v661_v51  ;;  %v2982_v51 = vpack.c.bf16 %v690_v50, %v689_v49  ;;  %v673_v52 = vld [vmem:[%s5076_s3 + $0x470] sm:$0xff] }
  0x56   :  { %2205 = vmatprep.mubr.msk.f32.mxu0 %vm102_vm0, %v58_v54  ;;  %v555_v54 = vld [vmem:[%s5076_s3 + $0xc0] sm:$0xff] }
  0x57   :  { %2961 = vmatpush3.bf16.msra.mxu0 %v2960_v53  ;;  %v674_v53 = vld [vmem:[%s5076_s3 + $0x478] sm:$0xff] }
  0x59   :  { %307 = vmatmul.mubr.f32.gmra.mrb[24].mxu0 %v57_v55  ;;  %v556_v55 = vld [vmem:[%s5076_s3 + $0xc8] sm:$0xff] }
  0x5a   :  { %2206 = vmatprep.mubr.msk.f32.mxu0 %vm102_vm0, %v60_v56  ;;  %v679_v56 = vld [vmem:[%s5076_s3 + $0x4a0] sm:$0xff] }
  0x5d   :  { %312 = vmatmul.mubr.f32.gmra.mrb[26].mxu0 %v59_v57  ;;  %v2842_v57 = vpack.c.bf16 %v556_v55, %v555_v54  ;;  %v2984_v54 = vpack.c.bf16 %v674_v53, %v673_v52  ;;  %v739_v55 = vld [vmem:[%s5076_s3 + $0x680] sm:$0xff] }
  0x5e   :  { %2207 = vmatprep.mubr.msk.f32.mxu0 %vm102_vm0, %v62_v58  ;;  %v680_v58 = vld [vmem:[%s5076_s3 + $0x4a8] sm:$0xff] }
  0x5f   :  { %2843 = vmatprep.subr.bf16.mxu1 %v2842_v57 }
  0x61   :  { %317 = vmatmul.mubr.f32.gmra.mrb[28].mxu0 %v61_v59  ;;  %v539_v59 = vld [vmem:[%s5076_s3 + $0x40] sm:$0xff] }
  0x62   :  { %2208 = vmatprep.mubr.msk.f32.mxu0 %vm102_vm0, %v64_v60  ;;  %v540_v60 = vld [vmem:[%s5076_s3 + $0x48] sm:$0xff] }
  0x65   :  { %322 = vmatmul.mubr.f32.gmra.mrb[30].mxu0 %v63_v61  ;;  %v2962_v61 = vpack.c.bf16 %v680_v58, %v679_v56  ;;  %v740_v56 = vld [vmem:[%s5076_s3 + $0x688] sm:$0xff] }
  0x66   :  { %2209 = vmatprep.mubr.msk.f32.mxu0 %vm102_vm0, %v66_v62  ;;  %v2844_v62 = vpack.c.bf16 %v540_v60, %v539_v59  ;;  %v3018_v57 = vpack.c.bf16 %v740_v56, %v739_v55 }
  0x67   :  { %2963 = vmatprep.subr.bf16.mxu0 %v2962_v61 }
  0x68   :  { %2845 = vmatpush3.bf16.msra.mxu1 %v2844_v62 }
  0x69   :  { %327 = vmatmul.mubr.f32.gmra.mrb[32].mxu0 %v65_v63  ;;  %v663_v63 = vld [vmem:[%s5076_s3 + $0x420] sm:$0xff] }
  0x6a   :  { %2210 = vmatprep.mubr.msk.f32.mxu0 %vm102_vm0, %v68_v0  ;;  %v664_v0 = vld [vmem:[%s5076_s3 + $0x428] sm:$0xff] }
  0x6d   :  { %332 = vmatmul.mubr.f32.gmra.mrb[34].mxu0 %v67_v1  ;;  %v2964_v1 = vpack.c.bf16 %v664_v0, %v663_v63 }
  0x6e   :  { %2211 = vmatprep.mubr.msk.f32.mxu0 %vm102_vm0, %v70_v2  ;;  %v557_v2 = vld [vmem:[%s5076_s3 + $0xd0] sm:$0xff] }
  0x6f   :  { %2965 = vmatpush3.bf16.msra.mxu0 %v2964_v1 }
  0x71   :  { %337 = vmatmul.mubr.f32.gmra.mrb[36].mxu0 %v69_v4  ;;  %v558_v4 = vld [vmem:[%s5076_s3 + $0xd8] sm:$0xff] }
  0x72   :  { %2212 = vmatprep.mubr.msk.f32.mxu0 %vm102_vm0, %v72_v5  ;;  %v681_v5 = vld [vmem:[%s5076_s3 + $0x4b0] sm:$0xff] }
  0x75   :  { %342 = vmatmul.mubr.f32.gmra.mrb[38].mxu0 %v71_v6  ;;  %v2846_v6 = vpack.c.bf16 %v558_v4, %v557_v2 }
  0x76   :  { %2213 = vmatprep.mubr.msk.f32.mxu0 %vm102_vm0, %v74_v7  ;;  %v682_v7 = vld [vmem:[%s5076_s3 + $0x4b8] sm:$0xff] }
  0x77   :  { %2847 = vmatprep.subr.bf16.mxu1 %v2846_v6 }
  0x79   :  { %347 = vmatmul.mubr.f32.gmra.mrb[40].mxu0 %v73_v8  ;;  %v541_v8 = vld [vmem:[%s5076_s3 + $0x50] sm:$0xff] }
  0x7a   :  { %2214 = vmatprep.mubr.msk.f32.mxu0 %vm102_vm0, %v76_v9  ;;  %v542_v9 = vld [vmem:[%s5076_s3 + $0x58] sm:$0xff] }
  0x7d   :  { %352 = vmatmul.mubr.f32.gmra.mrb[42].mxu0 %v75_v10  ;;  %v2966_v10 = vpack.c.bf16 %v682_v7, %v681_v5 }
  0x7e   :  { %2215 = vmatprep.mubr.msk.f32.mxu0 %vm102_vm0, %v78_v11  ;;  %v2848_v11 = vpack.c.bf16 %v542_v9, %v541_v8 }
  0x7f   :  { %2967 = vmatprep.subr.bf16.mxu0 %v2966_v10 }
  0x80   :  { %2849 = vmatpush3.bf16.msra.mxu1 %v2848_v11 }
  0x81   :  { %357 = vmatmul.mubr.f32.gmra.mrb[44].mxu0 %v77_v12  ;;  %v665_v12 = vld [vmem:[%s5076_s3 + $0x430] sm:$0xff] }
  0x82   :  { %2216 = vmatprep.mubr.msk.f32.mxu0 %vm102_vm0, %v80_v13  ;;  %v666_v13 = vld [vmem:[%s5076_s3 + $0x438] sm:$0xff] }
  0x85   :  { %362 = vmatmul.mubr.f32.gmra.mrb[46].mxu0 %v79_v14  ;;  %v2968_v14 = vpack.c.bf16 %v666_v13, %v665_v12 }
  0x86   :  { %2217 = vmatprep.mubr.msk.f32.mxu0 %vm102_vm0, %v82_v15  ;;  %v559_v15 = vld [vmem:[%s5076_s3 + $0xe0] sm:$0xff] }
  0x87   :  { %2969 = vmatpush3.bf16.msra.mxu0 %v2968_v14 }
  0x88   :  { %2971 = vmatprep.subr.bf16.mxu0 %v2970_v22 }
  0x89   :  { %367 = vmatmul.mubr.f32.gmra.mrb[48].mxu0 %v81_v16  ;;  %v560_v16 = vld [vmem:[%s5076_s3 + $0xe8] sm:$0xff] }
  0x8a   :  { %v2850_v18 = vpack.c.bf16 %v560_v16, %v559_v15 }
  0x8b   :  { %2973 = vmatpush3.bf16.msra.mxu0 %v2972_v26 }
  0x8c   :  { %2851 = vmatprep.subr.bf16.mxu1 %v2850_v18  ;;  %2975 = vmatprep.subr.bf16.mxu0 %v2974_v35 }
  0x8d   :  { %2853 = vmatpush3.bf16.msra.mxu1 %v2852_v23 }
  0x8e   :  { %2855 = vmatprep.subr.bf16.mxu1 %v2854_v31 }
  0x8f   :  { %2977 = vmatpush3.bf16.msra.mxu0 %v2976_v39 }
  0x90   :  { %2979 = vmatprep.subr.bf16.mxu0 %v2978_v45  ;;  %v3831_v45 = vld [vmem:[%s5075_s2] ss:$0 sm:$0xff] }
  0x91   :  { %2857 = vmatpush3.bf16.msra.mxu1 %v2856_v36 }
  0x92   :  { %2859 = vmatprep.subr.bf16.mxu1 %v2858_v43 }
  0x93   :  { %2981 = vmatpush3.bf16.msra.mxu0 %v2980_v48 }
  0x94   :  { %2983 = vmatprep.subr.bf16.mxu0 %v2982_v51 }
  0x97   :  { %2985 = vmatpush3.bf16.msra.mxu0 %v2984_v54 }
  0x98   :  { %3019 = vmatprep.subr.bf16.mxu0 %v3018_v57 }
  0xfc   :  { %v248_v58 = vpop.f32.mrb[0].mxu0 }
  0xfd   :  { %v250_v59 = vpop.f32.mrb[1].mxu0 }
 0x100   :  { %v3818_v60 = vpop.f32.mrb[2].mxu0 }
 0x101   :  { %v255_v61 = vpop.f32.mrb[3].mxu0 }
 0x104   :  { %v3820_v62 = vpop.f32.mrb[4].mxu0 }
 0x105   :  { %v260_v63 = vpop.f32.mrb[5].mxu0 }
 0x108   :  { %v3822_v0 = vpop.f32.mrb[6].mxu0 }
 0x109   :  { %v265_v1 = vpop.f32.mrb[7].mxu0 }
 0x10c   :  { %v3824_v2 = vpop.f32.mrb[8].mxu0 }
 0x10d   :  { %v270_v4 = vpop.f32.mrb[9].mxu0 }
 0x110   :  { %v3826_v5 = vpop.f32.mrb[10].mxu0 }
 0x111   :  { %v275_v6 = vpop.f32.mrb[11].mxu0 }
 0x114   :  { %v278_v7 = vpop.f32.mrb[12].mxu0 }
 0x115   :  { %378 = vst [vmem:[#allocation2 + $0x30] sm:$0xff] %v278_v7  ;;  %v280_v8 = vpop.f32.mrb[13].mxu0 }
 0x118   :  { %v283_v9 = vpop.f32.mrb[14].mxu0 }
 0x119   :  { %379 = vst [vmem:[#allocation2 + $0x38] sm:$0xff] %v283_v9  ;;  %v285_v10 = vpop.f32.mrb[15].mxu0 }
 0x11c   :  { %v288_v11 = vpop.f32.mrb[16].mxu0 }
 0x11d   :  { %380 = vst [vmem:[#allocation2 + $0x40] sm:$0xff] %v288_v11  ;;  %v290_v12 = vpop.f32.mrb[17].mxu0 }
 0x120   :  { %v293_v13 = vpop.f32.mrb[18].mxu0  ;;  %v404_v36 = vld [vmem:[#allocation2 + $0x32] sm:$0xff] }
 0x121   :  { %381 = vst [vmem:[#allocation2 + $0x48] sm:$0xff] %v293_v13  ;;  %v295_v14 = vpop.f32.mrb[19].mxu0  ;;  %v411_v39 = vmax.f32 %v248_v58, %v404_v36  ;;  %v3319_v13 = vmov 1983009808  }
 0x122   :  { %v947_v14 = vunpack.c.l.s4 %v3319_v13 }
 0x124   :  { %v298_v15 = vpop.f32.mrb[20].mxu0  ;;  %v405_v41 = vld [vmem:[#allocation2 + $0x3a] sm:$0xff] }
 0x125   :  { %382 = vst [vmem:[#allocation2 + $0x50] sm:$0xff] %v298_v15  ;;  %v300_v16 = vpop.f32.mrb[21].mxu0  ;;  %v412_v47 = vmax.f32 %v3818_v60, %v405_v41  ;;  %v949_v15 = vlaneseq }
 0x128   :  { %v303_v17 = vpop.f32.mrb[22].mxu0  ;;  %v406_v50 = vld [vmem:[#allocation2 + $0x42] sm:$0xff] }
 0x129   :  { %383 = vst [vmem:[#allocation2 + $0x58] sm:$0xff] %v303_v17  ;;  %v305_v18 = vpop.f32.mrb[23].mxu0  ;;  %v413_v56 = vmax.f32 %v3820_v62, %v406_v50 }
 0x12c   :  { %v308_v19 = vpop.f32.mrb[24].mxu0  ;;  %v407_v61 = vld [vmem:[#allocation2 + $0x4a] sm:$0xff] }
 0x12d   :  { %384 = vst [vmem:[#allocation2 + $0x60] sm:$0xff] %v308_v19  ;;  %v310_v20 = vpop.f32.mrb[25].mxu0  ;;  %v414_v7 = vmax.f32 %v3822_v0, %v407_v61 }
 0x130   :  { %v313_v21 = vpop.f32.mrb[26].mxu0  ;;  %v408_v11 = vld [vmem:[#allocation2 + $0x52] sm:$0xff] }
 0x131   :  { %385 = vst [vmem:[#allocation2 + $0x68] sm:$0xff] %v313_v21  ;;  %v315_v22 = vpop.f32.mrb[27].mxu0  ;;  %v415_v19 = vmax.f32 %v3824_v2, %v408_v11  ;;  %v568_v11 = vld [vmem:[%s5076_s3 + $0x128] sm:$0xff] }
 0x134   :  { %v318_v23 = vpop.f32.mrb[28].mxu0  ;;  %v409_v22 = vld [vmem:[#allocation2 + $0x5a] sm:$0xff] }
 0x135   :  { %386 = vst [vmem:[#allocation2 + $0x70] sm:$0xff] %v318_v23  ;;  %v320_v24 = vpop.f32.mrb[29].mxu0  ;;  %v410_v23 = vld [vmem:[#allocation2 + $0x62] sm:$0x3]  ;;  %v416_v2 = vmax.f32 %v3826_v5, %v409_v22  ;;  %v570_v22 = vld [vmem:[%s5076_s3 + $0x138] sm:$0xff] }
 0x136   :  { %v563_v5 = vld [vmem:[%s5076_s3 + $0x100] sm:$0xff] }
 0x138   :  { %v323_v25 = vpop.f32.mrb[30].mxu0  ;;  %v418_v37 = vld [vmem:[#allocation2 + $0x64] sm:$0xff] }
 0x139   :  { %387 = vst [vmem:[#allocation2 + $0x78] sm:$0xff] %v323_v25  ;;  %v325_v26 = vpop.f32.mrb[31].mxu0  ;;  %v425_v42 = vmax.f32 %v411_v39, %v418_v37  ;;  %v403_v25 = vld [vmem:[#allocation2 + $0x30] sm:$0x3] }
 0x13c   :  { %v328_v27 = vpop.f32.mrb[32].mxu0  ;;  %v419_v43 = vld [vmem:[#allocation2 + $0x6c] sm:$0xff] }
 0x13d   :  { %388 = vst [vmem:[#allocation2 + $0x80] sm:$0xff] %v328_v27  ;;  %v330_v28 = vpop.f32.mrb[33].mxu0  ;;  %v426_v51 = vmax.f32 %v412_v47, %v419_v43 }
 0x13e   :  { %v948_v28 = vunpack.c.0.s8 %v947_v14 }
 0x140   :  { %v333_v30 = vpop.f32.mrb[34].mxu0  ;;  %v420_v53 = vld [vmem:[#allocation2 + $0x74] sm:$0xff] }
 0x141   :  { %389 = vst [vmem:[#allocation2 + $0x88] sm:$0xff] %v333_v30  ;;  %v335_v31 = vpop.f32.mrb[35].mxu0  ;;  %v427_v63 = vmax.f32 %v413_v56, %v420_v53  ;;  %v950_v30 = vshrl.u32 %v949_v15, 7  ;;  %v582_v56 = vld [vmem:[%s5076_s3 + $0x198] sm:$0xff]  ;;  %v585_v15 = vld [vmem:[%s5076_s3 + $0x1b0] sm:$0xff] }
 0x143   :  { %v3843_v41 = vsub.s32 %v948_v28, %v950_v30  ;;  %v587_v28 = vld [vmem:[%s5076_s3 + $0x1c0] sm:$0xff] }
 0x144   :  { %v338_v32 = vpop.f32.mrb[36].mxu0  ;;  %v421_v1 = vld [vmem:[#allocation2 + $0x7c] sm:$0xff] }
 0x145   :  { %390 = vst [vmem:[#allocation2 + $0x90] sm:$0xff] %v338_v32  ;;  %v340_v33 = vpop.f32.mrb[37].mxu0  ;;  %v428_v62 = vmax.f32 %v414_v7, %v421_v1  ;;  %v566_v1 = vld [vmem:[%s5076_s3 + $0x118] sm:$0xff]  ;;  %v583_v7 = vld [vmem:[%s5076_s3 + $0x1a0] sm:$0xff] }
 0x148   :  { %v343_v34 = vpop.f32.mrb[38].mxu0  ;;  %v422_v16 = vld [vmem:[#allocation2 + $0x84] sm:$0xff] }
 0x149   :  { %391 = vst [vmem:[#allocation2 + $0x98] sm:$0xff] %v343_v34  ;;  %v345_v35 = vpop.f32.mrb[39].mxu0  ;;  %v429_v26 = vmax.f32 %v415_v19, %v422_v16  ;;  %v417_v34 = vmax.f32 %v403_v25, %v410_v23  ;;  %v741_v19 = vld [vmem:[%s5076_s3 + $0x690] sm:$0xff] }
 0x14c   :  { %v348_v38 = vpop.f32.mrb[40].mxu0  ;;  %v423_v31 = vld [vmem:[#allocation2 + $0x8c] sm:$0xff]  ;;  %v424_v32 = vld [vmem:[#allocation2 + $0x94] sm:$0x3] }
 0x14d   :  { %392 = vst [vmem:[#allocation2 + $0xa0] sm:$0xff] %v348_v38  ;;  %v350_v40 = vpop.f32.mrb[41].mxu0  ;;  %v430_v38 = vmax.f32 %v416_v2, %v423_v31  ;;  %v431_v39 = vmax.f32 %v417_v34, %v424_v32  ;;  %v588_v2 = vld [vmem:[%s5076_s3 + $0x1c8] sm:$0xff] }
 0x150   :  { %v432_v44 = vld [vmem:[#allocation2 + $0x96] sm:$0xff]  ;;  %v353_v46 = vpop.f32.mrb[42].mxu0 }
 0x151   :  { %v439_v48 = vmax.f32 %v425_v42, %v432_v44  ;;  %393 = vst [vmem:[#allocation2 + $0xa8] sm:$0xff] %v353_v46  ;;  %v355_v49 = vpop.f32.mrb[43].mxu0 }
 0x153   :  { %v453_v52 = vadd.f32 %v3831_v45, %v439_v48  ;;  %v564_v48 = vld [vmem:[%s5076_s3 + $0x108] sm:$0xff] }
 0x154   :  { %v433_v54 = vld [vmem:[#allocation2 + $0x9e] sm:$0xff]  ;;  %v358_v55 = vpop.f32.mrb[44].mxu0 }
 0x155   :  { %v460_v57 = vmax.f32 %v453_v52, 0.0  ;;  %v440_v58 = vmax.f32 %v426_v51, %v433_v54  ;;  %394 = vst [vmem:[#allocation2 + $0xb0] sm:$0xff] %v358_v55  ;;  %v360_v59 = vpop.f32.mrb[45].mxu0  ;;  %v581_v55 = vld [vmem:[%s5076_s3 + $0x190] sm:$0xff] }
 0x157   :  { %467 = vst [vmem:[#allocation3] sm:$0xff] %v460_v57  ;;  %v454_v60 = vadd.f32 %v3831_v45, %v440_v58  ;;  %v2860_v57 = vpack.c.bf16 %v564_v48, %v563_v5  ;;  %v2874_v48 = vpack.c.bf16 %v588_v2, %v587_v28  ;;  %v611_v2 = vld [vmem:[%s5076_s3 + $0x280] sm:$0xff] }
 0x158   :  { %v434_v4 = vld [vmem:[#allocation2 + $0xa6] sm:$0xff]  ;;  %v363_v6 = vpop.f32.mrb[46].mxu0 }
 0x159   :  { %v461_v8 = vmax.f32 %v454_v60, 0.0  ;;  %v441_v9 = vmax.f32 %v427_v63, %v434_v4  ;;  %395 = vst [vmem:[#allocation2 + $0xb8] sm:$0xff] %v363_v6  ;;  %v365_v10 = vpop.f32.mrb[47].mxu0  ;;  %v565_v60 = vld [vmem:[%s5076_s3 + $0x110] sm:$0xff] }
 0x15a   :  { %v2864_v10 = vpack.c.bf16 %v566_v1, %v565_v60 }
 0x15b   :  { %468 = vst [vmem:[#allocation3 + $0x8] sm:$0xff] %v461_v8  ;;  %v455_v12 = vadd.f32 %v3831_v45, %v441_v9  ;;  %v584_v8 = vld [vmem:[%s5076_s3 + $0x1a8] sm:$0xff]  ;;  %v567_v9 = vld [vmem:[%s5076_s3 + $0x120] sm:$0xff] }
 0x15c   :  { %v435_v17 = vld [vmem:[#allocation2 + $0xae] sm:$0xff]  ;;  %v368_v18 = vpop.f32.mrb[48].mxu0  ;;  %v2866_v13 = vpack.c.bf16 %v584_v8, %v583_v7  ;;  %v591_v7 = vld [vmem:[%s5076_s3 + $0x1e0] sm:$0xff] }
 0x15d   :  { %v462_v20 = vmax.f32 %v455_v12, 0.0  ;;  %v442_v21 = vmax.f32 %v428_v62, %v435_v17  ;;  %396 = vst [vmem:[#allocation2 + $0xc0] sm:$0xff] %v368_v18  ;;  %v370_v0 = vpop.f32.mrb[49].mxu0  ;;  %v723_v62 = vld [vmem:[%s5076_s3 + $0x600] sm:$0xff]  ;;  %v724_v12 = vld [vmem:[%s5076_s3 + $0x608] sm:$0xff]  ;;  %v586_v18 = vld [vmem:[%s5076_s3 + $0x1b8] sm:$0xff] }
 0x15e   :  { %v474_v24 = vld [vmem:[#allocation3] sm:$0xff]   ;;  %v569_v0 = vld [vmem:[%s5076_s3 + $0x130] sm:$0xff]  ;;  %v3020_v25 = vpack.c.bf16 %v724_v12, %v723_v62  ;;  %v2870_v31 = vpack.c.bf16 %v586_v18, %v585_v15 }
 0x15f   :  { %469 = vst [vmem:[#allocation3 + $0x10] sm:$0xff] %v462_v20  ;;  %v456_v27 = vadd.f32 %v3831_v45, %v442_v21  ;;  %475 = vst [vmem:[#allocation4] sm:$0xff] %v474_v24   ;;  %v742_v20 = vld [vmem:[%s5076_s3 + $0x698] sm:$0xff]  ;;  %v2868_v24 = vpack.c.bf16 %v568_v11, %v567_v9  ;;  %v592_v9 = vld [vmem:[%s5076_s3 + $0x1e8] sm:$0xff] }
 0x160   :  { %v436_v33 = vld [vmem:[#allocation2 + $0xb6] sm:$0xff]  ;;  %v3022_v32 = vpack.c.bf16 %v742_v20, %v741_v19  ;;  %v748_v11 = vld [vmem:[%s5076_s3 + $0x6c8] sm:$0xff]  ;;  %v731_v19 = vld [vmem:[%s5076_s3 + $0x640] sm:$0xff] }
 0x161   :  { %v463_v35 = vmax.f32 %v456_v27, 0.0  ;;  %v443_v36 = vmax.f32 %v429_v26, %v436_v33  ;;  %v725_v26 = vld [vmem:[%s5076_s3 + $0x610] sm:$0xff]  ;;  %v726_v27 = vld [vmem:[%s5076_s3 + $0x618] sm:$0xff]  ;;  %v576_v15 = vld [vmem:[%s5076_s3 + $0x168] sm:$0xff] }
 0x162   :  { %v482_v37 = vld [vmem:[#allocation3 + $0x8] sm:$0xff]   ;;  %v732_v20 = vld [vmem:[%s5076_s3 + $0x648] sm:$0xff] }
 0x163   :  { %470 = vst [vmem:[#allocation3 + $0x18] sm:$0xff] %v463_v35  ;;  %v457_v40 = vadd.f32 %v3831_v45, %v443_v36  ;;  %483 = vst [vmem:[#allocation4 + $0x8] sm:$0xff] %v482_v37   ;;  %v743_v36 = vld [vmem:[%s5076_s3 + $0x6a0] sm:$0xff]  ;;  %v744_v37 = vld [vmem:[%s5076_s3 + $0x6a8] sm:$0xff] }
 0x164   :  { %v437_v42 = vld [vmem:[#allocation2 + $0xbe] sm:$0xff]  ;;  %v438_v43 = vld [vmem:[#allocation2 + $0xc6] sm:$0x3] }
 0x165   :  { %v464_v44 = vmax.f32 %v457_v40, 0.0  ;;  %v444_v46 = vmax.f32 %v430_v38, %v437_v42  ;;  %v445_v47 = vmax.f32 %v431_v39, %v438_v43  ;;  %v2872_v40 = vpack.c.bf16 %v570_v22, %v569_v0  ;;  %v594_v0 = vld [vmem:[%s5076_s3 + $0x1f8] sm:$0xff]  ;;  %v749_v22 = vld [vmem:[%s5076_s3 + $0x6d0] sm:$0xff] }
 0x166   :  { %v524_v49 = vld [vmem:[#allocation4] sm:$0xff]  ;;  %v490_v50 = vld [vmem:[#allocation3 + $0x10] sm:$0xff]   ;;  %v3024_v43 = vpack.c.bf16 %v726_v27, %v725_v26  ;;  %v577_v26 = vld [vmem:[%s5076_s3 + $0x170] sm:$0xff] }
 0x167   :  { %471 = vst [vmem:[#allocation3 + $0x20] sm:$0xff] %v464_v44  ;;  %v458_v51 = vadd.f32 %v3831_v45, %v444_v46  ;;  %v459_v52 = vadd.f32 %v3831_v45, %v445_v47  ;;  %v945_v53 = vcombine.high %v524_v49, %v524_v49  ;;  %v952_v54 = vrot.slane %v524_v49, %v3843_v41  ;;  %v571_v44 = vld [vmem:[%s5076_s3 + $0x140] sm:$0xff]  ;;  %v572_v46 = vld [vmem:[%s5076_s3 + $0x148] sm:$0xff]  ;;  %v578_v27 = vld [vmem:[%s5076_s3 + $0x178] sm:$0xff] }
 0x168   :  { %491 = vst [vmem:[#allocation4 + $0x10] sm:$0xff] %v490_v50   ;;  %v2862_v45 = vpack.c.bf16 %v582_v56, %v581_v55  ;;  %v727_v47 = vld [vmem:[%s5076_s3 + $0x620] sm:$0xff]  ;;  %v3026_v49 = vpack.c.bf16 %v744_v37, %v743_v36  ;;  %v728_v50 = vld [vmem:[%s5076_s3 + $0x628] sm:$0xff]  ;;  %v746_v55 = vld [vmem:[%s5076_s3 + $0x6b8] sm:$0xff] }
 0x169   :  { %v465_v58 = vmax.f32 %v458_v51, 0.0  ;;  %v466_v59 = vmax.f32 %v459_v52, 0.0  ;;  %v960_v61 = vcombine.high %v952_v54, %v952_v54  ;;  %v3861_v63 = vrot.slane %v945_v53, %v3843_v41  ;;  %v589_v51 = vld [vmem:[%s5076_s3 + $0x1d0] sm:$0xff]  ;;  %v590_v53 = vld [vmem:[%s5076_s3 + $0x1d8] sm:$0xff]  ;;  %v751_v36 = vld [vmem:[%s5076_s3 + $0x6e0] sm:$0xff] }
 0x16a   :  { %v498_v4 = vld [vmem:[#allocation3 + $0x18] sm:$0xff]   ;;  %v2878_v1 = vpack.c.bf16 %v590_v53, %v589_v51  ;;  %v752_v37 = vld [vmem:[%s5076_s3 + $0x6e8] sm:$0xff]  ;;  %v614_v51 = vld [vmem:[%s5076_s3 + $0x298] sm:$0xff] }
 0x16b   :  { %472 = vst [vmem:[#allocation3 + $0x28] sm:$0xff] %v465_v58  ;;  %473 = vst [vmem:[#allocation3 + $0x30] sm:$0x3] %v466_v59  ;;  %1143 = vmatprep.mubr.f32.mxu1 %v960_v61  ;;  %v961_v6 = vcombine.high %v3861_v63, %v3861_v63  ;;  %v3028_v58 = vpack.c.bf16 %v728_v50, %v727_v47  ;;  %v573_v59 = vld [vmem:[%s5076_s3 + $0x150] sm:$0xff]  ;;  %v574_v61 = vld [vmem:[%s5076_s3 + $0x158] sm:$0xff] }
 0x16c   :  { %499 = vst [vmem:[#allocation4 + $0x18] sm:$0xff] %v498_v4   ;;  %1144 = vmatmul.mubr.f32.vlgmr.msra.gmra.mrb[0].mxu1 %v952_v54  ;;  %v745_v54 = vld [vmem:[%s5076_s3 + $0x6b0] sm:$0xff]  ;;  %v2880_v12 = vpack.c.bf16 %v574_v61, %v573_v59  ;;  %v735_v47 = vld [vmem:[%s5076_s3 + $0x660] sm:$0xff]  ;;  %v598_v59 = vld [vmem:[%s5076_s3 + $0x218] sm:$0xff] }
 0x16d   :  { %2861 = vmatpush3.bf16.msra.mxu1 %v2860_v57  ;;  %1213 = vmatprep.mubr.f32.mxu1 %v961_v6  ;;  %v2876_v57 = vpack.c.bf16 %v572_v46, %v571_v44  ;;  %v3030_v4 = vpack.c.bf16 %v746_v55, %v745_v54  ;;  %v730_v6 = vld [vmem:[%s5076_s3 + $0x638] sm:$0xff]  ;;  %v595_v44 = vld [vmem:[%s5076_s3 + $0x200] sm:$0xff]  ;;  %v596_v46 = vld [vmem:[%s5076_s3 + $0x208] sm:$0xff] }
 0x16e   :  { %2863 = vmatprep.subr.bf16.mxu1 %v2862_v45  ;;  %v506_v16 = vld [vmem:[#allocation3 + $0x20] sm:$0xff]   ;;  %v729_v45 = vld [vmem:[%s5076_s3 + $0x630] sm:$0xff]  ;;  %v754_v54 = vld [vmem:[%s5076_s3 + $0x6f8] sm:$0xff]  ;;  %v2892_v55 = vpack.c.bf16 %v596_v46, %v595_v44 }
 0x16f   :  { %v526_v14 = vld [vmem:[#allocation4 + $0x10] sm:$0xff]  ;;  %507 = vst [vmem:[#allocation4 + $0x20] sm:$0xff] %v506_v16   ;;  %v792_v44 = vld [vmem:[%s5076_s3 + $0x828] sm:$0xff] }
 0x170   :  { %v986_v17 = vrot.slane %v526_v14, %v3843_v41  ;;  %v979_v21 = vcombine.high %v526_v14, %v526_v14  ;;  %v575_v14 = vld [vmem:[%s5076_s3 + $0x160] sm:$0xff]  ;;  %v613_v50 = vld [vmem:[%s5076_s3 + $0x290] sm:$0xff] }
 0x171   :  { %2865 = vmatpush3.bf16.msra.mxu1 %v2864_v10  ;;  %v747_v10 = vld [vmem:[%s5076_s3 + $0x6c0] sm:$0xff]  ;;  %v753_v53 = vld [vmem:[%s5076_s3 + $0x6f0] sm:$0xff] }
 0x172   :  { %v994_v23 = vcombine.high %v986_v17, %v986_v17  ;;  %v3918_v30 = vrot.slane %v979_v21, %v3843_v41  ;;  %2867 = vmatprep.subr.bf16.mxu1 %v2866_v13  ;;  %v514_v34 = vld [vmem:[#allocation3 + $0x28] sm:$0xff]   ;;  %v522_v39 = vld [vmem:[#allocation3 + $0x30] sm:$0x3]  ;;  %v3032_v13 = vpack.c.bf16 %v730_v6, %v729_v45  ;;  %v3034_v18 = vpack.c.bf16 %v748_v11, %v747_v10  ;;  %v615_v6 = vld [vmem:[%s5076_s3 + $0x2a0] sm:$0xff] }
 0x173   :  { %v527_v33 = vld [vmem:[#allocation4 + $0x18] sm:$0xff]  ;;  %515 = vst [vmem:[#allocation4 + $0x28] sm:$0xff] %v514_v34   ;;  %523 = vst [vmem:[#allocation4 + $0x30] sm:$0x3] %v522_v39  ;;  %v593_v21 = vld [vmem:[%s5076_s3 + $0x1f0] sm:$0xff]  ;;  %v2888_v39 = vpack.c.bf16 %v578_v27, %v577_v26 }
 0x174   :  { %1423 = vmatprep.mubr.f32.mxu0 %v994_v23  ;;  %v3924_v35 = vrot.slane %v527_v33, %v3843_v41  ;;  %v996_v38 = vcombine.high %v527_v33, %v527_v33  ;;  %v750_v23 = vld [vmem:[%s5076_s3 + $0x6d8] sm:$0xff]  ;;  %v2886_v28 = vpack.c.bf16 %v594_v0, %v593_v21  ;;  %v612_v34 = vld [vmem:[%s5076_s3 + $0x288] sm:$0xff]  ;;  %v737_v61 = vld [vmem:[%s5076_s3 + $0x670] sm:$0xff] }
 0x175   :  { %1424 = vmatmul.mubr.f32.vlgmr.msra.gmra.mrb[50].mxu0 %v986_v17  ;;  %2869 = vmatpush3.bf16.msra.mxu1 %v2868_v24  ;;  %v2882_v17 = vpack.c.bf16 %v592_v9, %v591_v7  ;;  %v2884_v24 = vpack.c.bf16 %v576_v15, %v575_v14  ;;  %v734_v33 = vld [vmem:[%s5076_s3 + $0x658] sm:$0xff]  ;;  %v616_v7 = vld [vmem:[%s5076_s3 + $0x2a8] sm:$0xff]  ;;  %v803_v9 = vld [vmem:[%s5076_s3 + $0x880] sm:$0xff] }
 0x176   :  { %3021 = vmatpush3.bf16.msra.mxu0 %v3020_v25  ;;  %v1011_v42 = vcombine.high %v3924_v35, %v3924_v35  ;;  %v3944_v5 = vrot.slane %v996_v38, %v3843_v41  ;;  %2871 = vmatprep.subr.bf16.mxu1 %v2870_v31  ;;  %v3952_v52 = vld [vmem:[#allocation4 + $0x20] sm:$0xff]  ;;  %v3036_v25 = vpack.c.bf16 %v732_v20, %v731_v19  ;;  %v4047_v38 = vld [vmem:[#allocation4 + $0x8] sm:$0xff]  ;;  %v618_v20 = vld [vmem:[%s5076_s3 + $0x2b8] sm:$0xff] }
 0x177   :  { %3023 = vmatprep.subr.bf16.mxu0 %v3022_v32  ;;  %v1013_v56 = vcombine.high %v3952_v52, %v3952_v52  ;;  %v3038_v31 = vpack.c.bf16 %v750_v23, %v749_v22  ;;  %v733_v32 = vld [vmem:[%s5076_s3 + $0x650] sm:$0xff]  ;;  %v804_v10 = vld [vmem:[%s5076_s3 + $0x888] sm:$0xff]  ;;  %v787_v15 = vld [vmem:[%s5076_s3 + $0x800] sm:$0xff]  ;;  %v4121_v19 = vrot.slane %v3952_v52, %v3843_v41 }
 0x178   :  { %1563 = vmatprep.mubr.f32.mxu0 %v1011_v42  ;;  %v2890_v42 = vpack.c.bf16 %v612_v34, %v611_v2  ;;  %v3082_v14 = vpack.c.bf16 %v804_v10, %v803_v9  ;;  %v805_v21 = vld [vmem:[%s5076_s3 + $0x890] sm:$0xff]  ;;  %v806_v0 = vld [vmem:[%s5076_s3 + $0x898] sm:$0xff]  ;;  %v807_v2 = vld [vmem:[%s5076_s3 + $0x8a0] sm:$0xff] }
 0x179   :  { %2873 = vmatpush3.bf16.msra.mxu1 %v2872_v40  ;;  %v3975_v60 = vrot.slane %v1013_v56, %v3843_v41  ;;  %v3040_v40 = vpack.c.bf16 %v734_v33, %v733_v32  ;;  %v601_v52 = vld [vmem:[%s5076_s3 + $0x230] sm:$0xff]  ;;  %v3086_v27 = vpack.c.bf16 %v806_v0, %v805_v21  ;;  %v620_v32 = vld [vmem:[%s5076_s3 + $0x2c8] sm:$0xff]  ;;  %v1028_v33 = vcombine.high %v4121_v19, %v4121_v19  ;;  %v607_v10 = vld [vmem:[%s5076_s3 + $0x260] sm:$0xff] }
 0x17a   :  { %3025 = vmatpush3.bf16.msra.mxu0 %v3024_v43  ;;  %2875 = vmatprep.subr.bf16.mxu1 %v2874_v48  ;;  %v3983_v8 = vld [vmem:[#allocation4 + $0x28] sm:$0xff]  ;;  %v3042_v43 = vpack.c.bf16 %v752_v37, %v751_v36  ;;  %v4060_v48 = vrot.slane %v4047_v38, %v3843_v41  ;;  %v621_v46 = vld [vmem:[%s5076_s3 + $0x2d0] sm:$0xff] }
 0x17b   :  { %3027 = vmatprep.subr.bf16.mxu0 %v3026_v49  ;;  %v1030_v62 = vcombine.high %v3983_v8, %v3983_v8  ;;  %v736_v49 = vld [vmem:[%s5076_s3 + $0x668] sm:$0xff]  ;;  %v609_v0 = vld [vmem:[%s5076_s3 + $0x270] sm:$0xff] }
 0x17c   :  { %v3044_v56 = vpack.c.bf16 %v736_v49, %v735_v47  ;;  %v977_v45 = vcombine.high %v4060_v48, %v4060_v48  ;;  %v808_v34 = vld [vmem:[%s5076_s3 + $0x8a8] sm:$0xff]  ;;  %v622_v47 = vld [vmem:[%s5076_s3 + $0x2d8] sm:$0xff]  ;;  %v809_v49 = vld [vmem:[%s5076_s3 + $0x8b0] sm:$0xff] }
 0x17d   :  { %2877 = vmatpush3.bf16.msra.mxu1 %v2876_v57  ;;  %v4003_v16 = vrot.slane %v1030_v62, %v3843_v41  ;;  %v2894_v57 = vpack.c.bf16 %v614_v51, %v613_v50  ;;  %v810_v50 = vld [vmem:[%s5076_s3 + $0x8b8] sm:$0xff] }
 0x17e   :  { %3029 = vmatpush3.bf16.msra.mxu0 %v3028_v58  ;;  %2879 = vmatprep.subr.bf16.mxu1 %v2878_v1  ;;  %v597_v58 = vld [vmem:[%s5076_s3 + $0x210] sm:$0xff]  ;;  %v3046_v1 = vpack.c.bf16 %v754_v54, %v753_v53  ;;  %v2910_v54 = vpack.c.bf16 %v622_v47, %v621_v46 }
 0x17f   :  { %3031 = vmatprep.subr.bf16.mxu0 %v3030_v4  ;;  %v738_v4 = vld [vmem:[%s5076_s3 + $0x678] sm:$0xff]  ;;  %v2896_v11 = vpack.c.bf16 %v598_v59, %v597_v58  ;;  %v3094_v58 = vpack.c.bf16 %v810_v50, %v809_v49  ;;  %v629_v50 = vld [vmem:[%s5076_s3 + $0x310] sm:$0xff] }
 0x180   :  { %v3048_v62 = vpack.c.bf16 %v738_v4, %v737_v61  ;;  %v794_v59 = vld [vmem:[%s5076_s3 + $0x838] sm:$0xff]  ;;  %v623_v61 = vld [vmem:[%s5076_s3 + $0x2e0] sm:$0xff]  ;;  %v812_v4 = vld [vmem:[%s5076_s3 + $0x8c8] sm:$0xff] }
 0x181   :  { %2881 = vmatpush3.bf16.msra.mxu1 %v2880_v12  ;;  %v2898_v12 = vpack.c.bf16 %v616_v7, %v615_v6 }
 0x182   :  { %3033 = vmatpush3.bf16.msra.mxu0 %v3032_v13  ;;  %2883 = vmatprep.subr.bf16.mxu1 %v2882_v17  ;;  %v599_v13 = vld [vmem:[%s5076_s3 + $0x220] sm:$0xff]  ;;  %v788_v17 = vld [vmem:[%s5076_s3 + $0x808] sm:$0xff] }
 0x183   :  { %3035 = vmatprep.subr.bf16.mxu0 %v3034_v18  ;;  %v617_v18 = vld [vmem:[%s5076_s3 + $0x2b0] sm:$0xff]  ;;  %v3084_v23 = vpack.c.bf16 %v788_v17, %v787_v15  ;;  %v814_v17 = vld [vmem:[%s5076_s3 + $0x8d8] sm:$0xff] }
 0x184   :  { %v2902_v26 = vpack.c.bf16 %v618_v20, %v617_v18  ;;  %v813_v15 = vld [vmem:[%s5076_s3 + $0x8d0] sm:$0xff] }
 0x185   :  { %2885 = vmatpush3.bf16.msra.mxu1 %v2884_v24  ;;  %v602_v24 = vld [vmem:[%s5076_s3 + $0x238] sm:$0xff] }
 0x186   :  { %3037 = vmatpush3.bf16.msra.mxu0 %v3036_v25  ;;  %2887 = vmatprep.subr.bf16.mxu1 %v2886_v28  ;;  %v789_v25 = vld [vmem:[%s5076_s3 + $0x810] sm:$0xff]  ;;  %v790_v28 = vld [vmem:[%s5076_s3 + $0x818] sm:$0xff]  ;;  %v2904_v36 = vpack.c.bf16 %v602_v24, %v601_v52  ;;  %v3102_v52 = vpack.c.bf16 %v814_v17, %v813_v15 }
 0x187   :  { %3039 = vmatprep.subr.bf16.mxu0 %v3038_v31  ;;  %v619_v31 = vld [vmem:[%s5076_s3 + $0x2c0] sm:$0xff]  ;;  %v3088_v37 = vpack.c.bf16 %v790_v28, %v789_v25  ;;  %v798_v24 = vld [vmem:[%s5076_s3 + $0x858] sm:$0xff]  ;;  %v853_v17 = vld [vmem:[%s5076_s3 + $0xa10] sm:$0xff] }
 0x188   :  { %v643_v25 = vld [vmem:[%s5076_s3 + $0x380] sm:$0xff] }
 0x189   :  { %2889 = vmatpush3.bf16.msra.mxu1 %v2888_v39  ;;  %v2906_v39 = vpack.c.bf16 %v620_v32, %v619_v31  ;;  %v815_v28 = vld [vmem:[%s5076_s3 + $0x8e0] sm:$0xff]  ;;  %v816_v31 = vld [vmem:[%s5076_s3 + $0x8e8] sm:$0xff] }
 0x18a   :  { %3041 = vmatpush3.bf16.msra.mxu0 %v3040_v40  ;;  %2891 = vmatprep.subr.bf16.mxu1 %v2890_v42  ;;  %v603_v40 = vld [vmem:[%s5076_s3 + $0x240] sm:$0xff]  ;;  %v604_v42 = vld [vmem:[%s5076_s3 + $0x248] sm:$0xff] }
 0x18b   :  { %3043 = vmatprep.subr.bf16.mxu0 %v3042_v43  ;;  %v791_v43 = vld [vmem:[%s5076_s3 + $0x820] sm:$0xff]  ;;  %v2908_v51 = vpack.c.bf16 %v604_v42, %v603_v40  ;;  %v800_v40 = vld [vmem:[%s5076_s3 + $0x868] sm:$0xff]  ;;  %v645_v42 = vld [vmem:[%s5076_s3 + $0x390] sm:$0xff] }
 0x18c   :  { %1214 = vmatmul.mubr.f32.vlgmr.msra.gmra.mrb[2].mxu1 %v3861_v63  ;;  %v600_v63 = vld [vmem:[%s5076_s3 + $0x228] sm:$0xff]  ;;  %v3092_v53 = vpack.c.bf16 %v792_v44, %v791_v43  ;;  %v646_v43 = vld [vmem:[%s5076_s3 + $0x398] sm:$0xff] }
 0x18d   :  { %2893 = vmatpush3.bf16.msra.mxu1 %v2892_v55  ;;  %1283 = vmatprep.mubr.f32.mxu1 %v977_v45  ;;  %v2900_v22 = vpack.c.bf16 %v600_v63, %v599_v13  ;;  %v605_v55 = vld [vmem:[%s5076_s3 + $0x250] sm:$0xff]  ;;  %v624_v45 = vld [vmem:[%s5076_s3 + $0x2e8] sm:$0xff]  ;;  %v818_v44 = vld [vmem:[%s5076_s3 + $0x8f8] sm:$0xff]  ;;  %v2926_v49 = vpack.c.bf16 %v646_v43, %v645_v42 }
 0x18e   :  { %3045 = vmatpush3.bf16.msra.mxu0 %v3044_v56  ;;  %2895 = vmatprep.subr.bf16.mxu1 %v2894_v57  ;;  %v606_v56 = vld [vmem:[%s5076_s3 + $0x258] sm:$0xff]  ;;  %v793_v57 = vld [vmem:[%s5076_s3 + $0x830] sm:$0xff]  ;;  %v2914_v9 = vpack.c.bf16 %v624_v45, %v623_v61  ;;  %v796_v13 = vld [vmem:[%s5076_s3 + $0x848] sm:$0xff] }
 0x18f   :  { %3047 = vmatprep.subr.bf16.mxu0 %v3046_v1  ;;  %v811_v1 = vld [vmem:[%s5076_s3 + $0x8c0] sm:$0xff]  ;;  %v2912_v6 = vpack.c.bf16 %v606_v56, %v605_v55  ;;  %v3096_v7 = vpack.c.bf16 %v794_v59, %v793_v57  ;;  %v625_v63 = vld [vmem:[%s5076_s3 + $0x2f0] sm:$0xff]  ;;  %v802_v56 = vld [vmem:[%s5076_s3 + $0x878] sm:$0xff] }
 0x190   :  { %v647_v57 = vld [vmem:[%s5076_s3 + $0x3a0] sm:$0xff]  ;;  %v868_v61 = vld [vmem:[%s5076_s3 + $0xa88] sm:$0xff]  ;;  %v637_v43 = vld [vmem:[%s5076_s3 + $0x350] sm:$0xff] }
 0x191   :  { %2897 = vmatpush3.bf16.msra.mxu1 %v2896_v11  ;;  %v608_v11 = vld [vmem:[%s5076_s3 + $0x268] sm:$0xff]  ;;  %v867_v59 = vld [vmem:[%s5076_s3 + $0xa80] sm:$0xff] }
 0x192   :  { %3049 = vmatpush3.bf16.msra.mxu0 %v3048_v62  ;;  %2899 = vmatprep.subr.bf16.mxu1 %v2898_v12  ;;  %v795_v62 = vld [vmem:[%s5076_s3 + $0x840] sm:$0xff]  ;;  %v3098_v12 = vpack.c.bf16 %v812_v4, %v811_v1  ;;  %v2916_v18 = vpack.c.bf16 %v608_v11, %v607_v10  ;;  %v852_v10 = vld [vmem:[%s5076_s3 + $0xa08] sm:$0xff]  ;;  %v649_v11 = vld [vmem:[%s5076_s3 + $0x3b0] sm:$0xff] }
 0x193   :  { %3083 = vmatprep.subr.bf16.mxu0 %v3082_v14  ;;  %v626_v14 = vld [vmem:[%s5076_s3 + $0x2f8] sm:$0xff]  ;;  %v3100_v20 = vpack.c.bf16 %v796_v13, %v795_v62  ;;  %v4328_v62 = vrot.slane %v3983_v8, %v3843_v41  ;;  %v869_v13 = vld [vmem:[%s5076_s3 + $0xa90] sm:$0xff] }
 0x194   :  { %v2918_v21 = vpack.c.bf16 %v626_v14, %v625_v63  ;;  %v870_v63 = vld [vmem:[%s5076_s3 + $0xa98] sm:$0xff] }
 0x195   :  { %1564 = vmatmul.mubr.f32.vlgmr.msra.gmra.mrb[52].mxu0 %v3924_v35  ;;  %2901 = vmatpush3.bf16.msra.mxu1 %v2900_v22  ;;  %v3090_v35 = vpack.c.bf16 %v808_v34, %v807_v2  ;;  %v610_v22 = vld [vmem:[%s5076_s3 + $0x278] sm:$0xff]  ;;  %v627_v34 = vld [vmem:[%s5076_s3 + $0x300] sm:$0xff] }
 0x196   :  { %3085 = vmatpush3.bf16.msra.mxu0 %v3084_v23  ;;  %1703 = vmatprep.mubr.f32.mxu0 %v1028_v33  ;;  %v797_v23 = vld [vmem:[%s5076_s3 + $0x850] sm:$0xff]  ;;  %v2920_v32 = vpack.c.bf16 %v610_v22, %v609_v0  ;;  %v634_v8 = vld [vmem:[%s5076_s3 + $0x338] sm:$0xff]  ;;  %v651_v0 = vld [vmem:[%s5076_s3 + $0x3c0] sm:$0xff] }
 0x197   :  { %2903 = vmatprep.subr.bf16.mxu1 %v2902_v26  ;;  %3087 = vmatprep.subr.bf16.mxu0 %v3086_v27  ;;  %v644_v26 = vld [vmem:[%s5076_s3 + $0x388] sm:$0xff]  ;;  %v962_v27 = vcombine.high %v4047_v38, %v4047_v38  ;;  %v3104_v33 = vpack.c.bf16 %v798_v24, %v797_v23  ;;  %v1045_v23 = vcombine.high %v4328_v62, %v4328_v62 }
 0x198   :  { %v2922_v2 = vpack.c.bf16 %v644_v26, %v643_v25  ;;  %v628_v38 = vld [vmem:[%s5076_s3 + $0x308] sm:$0xff] }
 0x199   :  { %2905 = vmatpush3.bf16.msra.mxu1 %v2904_v36  ;;  %v799_v36 = vld [vmem:[%s5076_s3 + $0x860] sm:$0xff]  ;;  %v2924_v46 = vpack.c.bf16 %v628_v38, %v627_v34  ;;  %v652_v22 = vld [vmem:[%s5076_s3 + $0x3c8] sm:$0xff]  ;;  %v654_v34 = vld [vmem:[%s5076_s3 + $0x3d8] sm:$0xff] }
 0x19a   :  { %3089 = vmatpush3.bf16.msra.mxu0 %v3088_v37  ;;  %2907 = vmatprep.subr.bf16.mxu1 %v2906_v39  ;;  %v3106_v37 = vpack.c.bf16 %v816_v31, %v815_v28  ;;  %v4267_v39 = vrot.slane %v962_v27, %v3843_v41  ;;  %v3108_v47 = vpack.c.bf16 %v800_v40, %v799_v36  ;;  %v633_v41 = vld [vmem:[%s5076_s3 + $0x330] sm:$0xff]  ;;  %v872_v24 = vld [vmem:[%s5076_s3 + $0xaa8] sm:$0xff]  ;;  %v635_v28 = vld [vmem:[%s5076_s3 + $0x340] sm:$0xff] }
 0x19b   :  { %3091 = vmatprep.subr.bf16.mxu0 %v3090_v35  ;;  %v817_v35 = vld [vmem:[%s5076_s3 + $0x8f0] sm:$0xff]  ;;  %v2936_v25 = vpack.c.bf16 %v634_v8, %v633_v41  ;;  %v2938_v27 = vpack.c.bf16 %v652_v22, %v651_v0  ;;  %v636_v31 = vld [vmem:[%s5076_s3 + $0x348] sm:$0xff]  ;;  %v874_v36 = vld [vmem:[%s5076_s3 + $0xab8] sm:$0xff] }
 0x19c   :  { %v3110_v55 = vpack.c.bf16 %v818_v44, %v817_v35  ;;  %v873_v38 = vld [vmem:[%s5076_s3 + $0xab0] sm:$0xff]  ;;  %v638_v35 = vld [vmem:[%s5076_s3 + $0x358] sm:$0xff]  ;;  %v708_v41 = vld [vmem:[%s5076_s3 + $0x588] sm:$0xff] }
 0x19d   :  { %2909 = vmatpush3.bf16.msra.mxu1 %v2908_v51  ;;  %v630_v51 = vld [vmem:[%s5076_s3 + $0x318] sm:$0xff]  ;;  %v857_v44 = vld [vmem:[%s5076_s3 + $0xa30] sm:$0xff]  ;;  %v879_v8 = vld [vmem:[%s5076_s3 + $0xae0] sm:$0xff] }
 0x19e   :  { %3093 = vmatpush3.bf16.msra.mxu0 %v3092_v53  ;;  %2911 = vmatprep.subr.bf16.mxu1 %v2910_v54  ;;  %v801_v53 = vld [vmem:[%s5076_s3 + $0x870] sm:$0xff]  ;;  %v978_v54 = vcombine.high %v4267_v39, %v4267_v39  ;;  %v2928_v45 = vpack.c.bf16 %v630_v51, %v629_v50  ;;  %v656_v50 = vld [vmem:[%s5076_s3 + $0x3e8] sm:$0xff]  ;;  %v875_v51 = vld [vmem:[%s5076_s3 + $0xac0] sm:$0xff] }
 0x19f   :  { %3095 = vmatprep.subr.bf16.mxu0 %v3094_v58  ;;  %v648_v58 = vld [vmem:[%s5076_s3 + $0x3a8] sm:$0xff]  ;;  %v3112_v1 = vpack.c.bf16 %v802_v56, %v801_v53  ;;  %v691_v0 = vld [vmem:[%s5076_s3 + $0x500] sm:$0xff] }
 0x1a0   :  { %v2930_v4 = vpack.c.bf16 %v648_v58, %v647_v57  ;;  %v876_v53 = vld [vmem:[%s5076_s3 + $0xac8] sm:$0xff]  ;;  %v639_v57 = vld [vmem:[%s5076_s3 + $0x360] sm:$0xff] }
 0x1a1   :  { %2913 = vmatpush3.bf16.msra.mxu1 %v2912_v6  ;;  %v631_v6 = vld [vmem:[%s5076_s3 + $0x320] sm:$0xff]  ;;  %v640_v58 = vld [vmem:[%s5076_s3 + $0x368] sm:$0xff] }
 0x1a2   :  { %3097 = vmatpush3.bf16.msra.mxu0 %v3096_v7  ;;  %2915 = vmatprep.subr.bf16.mxu1 %v2914_v9  ;;  %v3146_v7 = vpack.c.bf16 %v868_v61, %v867_v59  ;;  %v851_v9 = vld [vmem:[%s5076_s3 + $0xa00] sm:$0xff]  ;;  %v3162_v61 = vpack.c.bf16 %v876_v53, %v875_v51  ;;  %v692_v22 = vld [vmem:[%s5076_s3 + $0x508] sm:$0xff]  ;;  %v714_v51 = vld [vmem:[%s5076_s3 + $0x5b8] sm:$0xff] }
 0x1a3   :  { %3099 = vmatprep.subr.bf16.mxu0 %v3098_v12  ;;  %v650_v12 = vld [vmem:[%s5076_s3 + $0x3b8] sm:$0xff]  ;;  %v3148_v15 = vpack.c.bf16 %v852_v10, %v851_v9  ;;  %v859_v59 = vld [vmem:[%s5076_s3 + $0xa40] sm:$0xff] }
 0x1a5   :  { %2917 = vmatpush3.bf16.msra.mxu1 %v2916_v18  ;;  %v2934_v18 = vpack.c.bf16 %v650_v12, %v649_v11  ;;  %v641_v11 = vld [vmem:[%s5076_s3 + $0x370] sm:$0xff]  ;;  %v642_v12 = vld [vmem:[%s5076_s3 + $0x378] sm:$0xff] }
 0x1a6   :  { %3101 = vmatpush3.bf16.msra.mxu0 %v3100_v20  ;;  %2919 = vmatprep.subr.bf16.mxu1 %v2918_v21  ;;  %v3150_v20 = vpack.c.bf16 %v870_v63, %v869_v13  ;;  %v854_v21 = vld [vmem:[%s5076_s3 + $0xa18] sm:$0xff]  ;;  %v861_v13 = vld [vmem:[%s5076_s3 + $0xa50] sm:$0xff] }
 0x1a7   :  { %3103 = vmatprep.subr.bf16.mxu0 %v3102_v52  ;;  %v871_v52 = vld [vmem:[%s5076_s3 + $0xaa0] sm:$0xff]  ;;  %v3152_v26 = vpack.c.bf16 %v854_v21, %v853_v17  ;;  %v880_v17 = vld [vmem:[%s5076_s3 + $0xae8] sm:$0xff] }
 0x1a9   :  { %2921 = vmatpush3.bf16.msra.mxu1 %v2920_v32  ;;  %v855_v32 = vld [vmem:[%s5076_s3 + $0xa20] sm:$0xff] }
 0x1aa   :  { %3105 = vmatpush3.bf16.msra.mxu0 %v3104_v33  ;;  %2923 = vmatprep.subr.bf16.mxu1 %v2922_v2  ;;  %v856_v33 = vld [vmem:[%s5076_s3 + $0xa28] sm:$0xff]  ;;  %v653_v2 = vld [vmem:[%s5076_s3 + $0x3d0] sm:$0xff] }
 0x1ab   :  { %3107 = vmatprep.subr.bf16.mxu0 %v3106_v37  ;;  %v2940_v37 = vpack.c.bf16 %v636_v31, %v635_v28  ;;  %v3156_v40 = vpack.c.bf16 %v856_v33, %v855_v32  ;;  %v2942_v42 = vpack.c.bf16 %v654_v34, %v653_v2  ;;  %v882_v28 = vld [vmem:[%s5076_s3 + $0xaf8] sm:$0xff]  ;;  %v2988_v31 = vpack.c.bf16 %v692_v22, %v691_v0  ;;  %v693_v33 = vld [vmem:[%s5076_s3 + $0x510] sm:$0xff]  ;;  %v703_v22 = vld [vmem:[%s5076_s3 + $0x560] sm:$0xff] }
 0x1ac   :  { %1284 = vmatmul.mubr.f32.vlgmr.msra.gmra.mrb[4].mxu1 %v4060_v48  ;;  %v632_v48 = vld [vmem:[%s5076_s3 + $0x328] sm:$0xff]  ;;  %v694_v2 = vld [vmem:[%s5076_s3 + $0x518] sm:$0xff]  ;;  %v865_v34 = vld [vmem:[%s5076_s3 + $0xa70] sm:$0xff] }
 0x1ad   :  { %2925 = vmatpush3.bf16.msra.mxu1 %v2924_v46  ;;  %1353 = vmatprep.mubr.f32.mxu1 %v978_v54  ;;  %v2932_v14 = vpack.c.bf16 %v632_v48, %v631_v6  ;;  %v3158_v46 = vpack.c.bf16 %v874_v36, %v873_v38  ;;  %v2944_v54 = vpack.c.bf16 %v638_v35, %v637_v43  ;;  %v877_v6 = vld [vmem:[%s5076_s3 + $0xad0] sm:$0xff]  ;;  %v878_v48 = vld [vmem:[%s5076_s3 + $0xad8] sm:$0xff] }
 0x1ae   :  { %3109 = vmatpush3.bf16.msra.mxu0 %v3108_v47  ;;  %2927 = vmatprep.subr.bf16.mxu1 %v2926_v49  ;;  %v858_v47 = vld [vmem:[%s5076_s3 + $0xa38] sm:$0xff]  ;;  %v655_v49 = vld [vmem:[%s5076_s3 + $0x3e0] sm:$0xff]  ;;  %v3166_v63 = vpack.c.bf16 %v878_v48, %v877_v6  ;;  %v995_v38 = vcombine.high %v3918_v30, %v3918_v30  ;;  %v2992_v43 = vpack.c.bf16 %v694_v2, %v693_v33  ;;  %v925_v33 = vld [vmem:[%s5076_s3 + $0xc50] sm:$0xff] }
 0x1af   :  { %3111 = vmatprep.subr.bf16.mxu0 %v3110_v55  ;;  %v3160_v55 = vpack.c.bf16 %v858_v47, %v857_v44  ;;  %v2946_v56 = vpack.c.bf16 %v656_v50, %v655_v49  ;;  %v696_v47 = vld [vmem:[%s5076_s3 + $0x528] sm:$0xff]  ;;  %v915_v49 = vld [vmem:[%s5076_s3 + $0xc00] sm:$0xff]  ;;  %v713_v50 = vld [vmem:[%s5076_s3 + $0x5b0] sm:$0xff] }
 0x1b0   :  { %v699_v48 = vld [vmem:[%s5076_s3 + $0x540] sm:$0xff]  ;;  %v926_v2 = vld [vmem:[%s5076_s3 + $0xc58] sm:$0xff] }
 0x1b1   :  { %2929 = vmatpush3.bf16.msra.mxu1 %v2928_v45  ;;  %v860_v45 = vld [vmem:[%s5076_s3 + $0xa48] sm:$0xff] }
 0x1b2   :  { %3113 = vmatpush3.bf16.msra.mxu0 %v3112_v1  ;;  %2931 = vmatprep.subr.bf16.mxu1 %v2930_v4  ;;  %v657_v1 = vld [vmem:[%s5076_s3 + $0x3f0] sm:$0xff]  ;;  %v658_v4 = vld [vmem:[%s5076_s3 + $0x3f8] sm:$0xff]  ;;  %v3164_v9 = vpack.c.bf16 %v860_v45, %v859_v59  ;;  %v716_v45 = vld [vmem:[%s5076_s3 + $0x5c8] sm:$0xff] }
 0x1b3   :  { %3147 = vmatprep.subr.bf16.mxu0 %v3146_v7  ;;  %v2948_v7 = vpack.c.bf16 %v640_v58, %v639_v57  ;;  %v2950_v10 = vpack.c.bf16 %v658_v4, %v657_v1  ;;  %v698_v57 = vld [vmem:[%s5076_s3 + $0x538] sm:$0xff]  ;;  %v917_v58 = vld [vmem:[%s5076_s3 + $0xc10] sm:$0xff] }
 0x1b4   :  { %v918_v59 = vld [vmem:[%s5076_s3 + $0xc18] sm:$0xff] }
 0x1b5   :  { %1704 = vmatmul.mubr.f32.vlgmr.msra.gmra.mrb[54].mxu0 %v4121_v19  ;;  %2933 = vmatpush3.bf16.msra.mxu1 %v2932_v14  ;;  %v3154_v19 = vpack.c.bf16 %v872_v24, %v871_v52  ;;  %v862_v14 = vld [vmem:[%s5076_s3 + $0xa58] sm:$0xff]  ;;  %v3170_v52 = vpack.c.bf16 %v880_v17, %v879_v8  ;;  %v864_v24 = vld [vmem:[%s5076_s3 + $0xa68] sm:$0xff]  ;;  %v3214_v4 = vpack.c.bf16 %v918_v59, %v917_v58  ;;  %v719_v17 = vld [vmem:[%s5076_s3 + $0x5e0] sm:$0xff] }
 0x1b6   :  { %3149 = vmatpush3.bf16.msra.mxu0 %v3148_v15  ;;  %1843 = vmatprep.mubr.f32.mxu0 %v1045_v23  ;;  %v707_v15 = vld [vmem:[%s5076_s3 + $0x580] sm:$0xff]  ;;  %v922_v8 = vld [vmem:[%s5076_s3 + $0xc38] sm:$0xff]  ;;  %v776_v58 = vld [vmem:[%s5076_s3 + $0x7a8] sm:$0xff] }
 0x1b7   :  { %2935 = vmatprep.subr.bf16.mxu1 %v2934_v18  ;;  %3151 = vmatprep.subr.bf16.mxu0 %v3150_v20  ;;  %v2952_v18 = vpack.c.bf16 %v642_v12, %v641_v11  ;;  %v3168_v20 = vpack.c.bf16 %v862_v14, %v861_v13  ;;  %v2986_v21 = vpack.c.bf16 %v708_v41, %v707_v15  ;;  %v863_v23 = vld [vmem:[%s5076_s3 + $0xa60] sm:$0xff]  ;;  %v718_v11 = vld [vmem:[%s5076_s3 + $0x5d8] sm:$0xff]  ;;  %v701_v14 = vld [vmem:[%s5076_s3 + $0x550] sm:$0xff] }
 0x1b8   :  { %v3172_v32 = vpack.c.bf16 %v864_v24, %v863_v23  ;;  %v702_v15 = vld [vmem:[%s5076_s3 + $0x558] sm:$0xff]  ;;  %v921_v41 = vld [vmem:[%s5076_s3 + $0xc30] sm:$0xff]  ;;  %v704_v23 = vld [vmem:[%s5076_s3 + $0x568] sm:$0xff] }
 0x1b9   :  { %2937 = vmatpush3.bf16.msra.mxu1 %v2936_v25  ;;  %v709_v25 = vld [vmem:[%s5076_s3 + $0x590] sm:$0xff]  ;;  %v924_v24 = vld [vmem:[%s5076_s3 + $0xc48] sm:$0xff] }
 0x1ba   :  { %3153 = vmatpush3.bf16.msra.mxu0 %v3152_v26  ;;  %2939 = vmatprep.subr.bf16.mxu1 %v2938_v27  ;;  %v710_v26 = vld [vmem:[%s5076_s3 + $0x598] sm:$0xff]  ;;  %v881_v27 = vld [vmem:[%s5076_s3 + $0xaf0] sm:$0xff] }
 0x1bb   :  { %3155 = vmatprep.subr.bf16.mxu0 %v3154_v19  ;;  %v2990_v19 = vpack.c.bf16 %v710_v26, %v709_v25  ;;  %v3174_v36 = vpack.c.bf16 %v882_v28, %v881_v27  ;;  %v721_v25 = vld [vmem:[%s5076_s3 + $0x5f0] sm:$0xff]  ;;  %v722_v26 = vld [vmem:[%s5076_s3 + $0x5f8] sm:$0xff]  ;;  %v3012_v27 = vpack.c.bf16 %v704_v23, %v703_v22  ;;  %v784_v22 = vld [vmem:[%s5076_s3 + $0x7e8] sm:$0xff] }
 0x1bd   :  { %2941 = vmatpush3.bf16.msra.mxu1 %v2940_v37  ;;  %v866_v37 = vld [vmem:[%s5076_s3 + $0xa78] sm:$0xff] }
 0x1be   :  { %3157 = vmatpush3.bf16.msra.mxu0 %v3156_v40  ;;  %2943 = vmatprep.subr.bf16.mxu1 %v2942_v42  ;;  %v711_v40 = vld [vmem:[%s5076_s3 + $0x5a0] sm:$0xff]  ;;  %v712_v42 = vld [vmem:[%s5076_s3 + $0x5a8] sm:$0xff]  ;;  %v3176_v35 = vpack.c.bf16 %v866_v37, %v865_v34  ;;  %v3226_v37 = vpack.c.bf16 %v926_v2, %v925_v33 }
 0x1bf   :  { %3159 = vmatprep.subr.bf16.mxu0 %v3158_v46  ;;  %v2994_v44 = vpack.c.bf16 %v712_v42, %v711_v40  ;;  %v695_v46 = vld [vmem:[%s5076_s3 + $0x520] sm:$0xff]  ;;  %v836_v2 = vld [vmem:[%s5076_s3 + $0x988] sm:$0xff] }
 0x1c0   :  { %v2996_v53 = vpack.c.bf16 %v696_v47, %v695_v46  ;;  %v771_v34 = vld [vmem:[%s5076_s3 + $0x780] sm:$0xff]  ;;  %v773_v46 = vld [vmem:[%s5076_s3 + $0x790] sm:$0xff]  ;;  %v774_v47 = vld [vmem:[%s5076_s3 + $0x798] sm:$0xff] }
 0x1c1   :  { %2945 = vmatpush3.bf16.msra.mxu1 %v2944_v54  ;;  %v755_v42 = vld [vmem:[%s5076_s3 + $0x700] sm:$0xff] }
 0x1c2   :  { %3161 = vmatpush3.bf16.msra.mxu0 %v3160_v55  ;;  %2947 = vmatprep.subr.bf16.mxu1 %v2946_v56  ;;  %v2998_v55 = vpack.c.bf16 %v714_v51, %v713_v50  ;;  %v697_v56 = vld [vmem:[%s5076_s3 + $0x530] sm:$0xff]  ;;  %v3054_v50 = vpack.c.bf16 %v774_v47, %v773_v46  ;;  %v835_v33 = vld [vmem:[%s5076_s3 + $0x980] sm:$0xff]  ;;  %v822_v46 = vld [vmem:[%s5076_s3 + $0x918] sm:$0xff]  ;;  %v1029_v47 = vcombine.high %v3975_v60, %v3975_v60 }
 0x1c3   :  { %3163 = vmatprep.subr.bf16.mxu0 %v3162_v61  ;;  %v715_v61 = vld [vmem:[%s5076_s3 + $0x5c0] sm:$0xff]  ;;  %v3000_v1 = vpack.c.bf16 %v698_v57, %v697_v56  ;;  %v757_v51 = vld [vmem:[%s5076_s3 + $0x710] sm:$0xff]  ;;  %v930_v56 = vld [vmem:[%s5076_s3 + $0xc78] sm:$0xff] }
 0x1c4   :  { %v3002_v6 = vpack.c.bf16 %v716_v45, %v715_v61  ;;  %v775_v57 = vld [vmem:[%s5076_s3 + $0x7a0] sm:$0xff] }
 0x1c5   :  { %2949 = vmatpush3.bf16.msra.mxu1 %v2948_v7  ;;  %v700_v7 = vld [vmem:[%s5076_s3 + $0x548] sm:$0xff]  ;;  %v3058_v45 = vpack.c.bf16 %v776_v58, %v775_v57  ;;  %v825_v58 = vld [vmem:[%s5076_s3 + $0x930] sm:$0xff] }
 0x1c6   :  { %3165 = vmatpush3.bf16.msra.mxu0 %v3164_v9  ;;  %2951 = vmatprep.subr.bf16.mxu1 %v2950_v10  ;;  %v919_v9 = vld [vmem:[%s5076_s3 + $0xc20] sm:$0xff]  ;;  %v717_v10 = vld [vmem:[%s5076_s3 + $0x5d0] sm:$0xff]  ;;  %v3004_v12 = vpack.c.bf16 %v700_v7, %v699_v48 }
 0x1c7   :  { %3167 = vmatprep.subr.bf16.mxu0 %v3166_v63  ;;  %v3006_v63 = vpack.c.bf16 %v718_v11, %v717_v10  ;;  %v779_v10 = vld [vmem:[%s5076_s3 + $0x7c0] sm:$0xff]  ;;  %v780_v11 = vld [vmem:[%s5076_s3 + $0x7c8] sm:$0xff] }
 0x1c9   :  { %2953 = vmatpush3.bf16.msra.mxu1 %v2952_v18  ;;  %v720_v18 = vld [vmem:[%s5076_s3 + $0x5e8] sm:$0xff] }
 0x1ca   :  { %3169 = vmatpush3.bf16.msra.mxu0 %v3168_v20  ;;  %2987 = vmatprep.subr.bf16.mxu1 %v2986_v21  ;;  %v3008_v20 = vpack.c.bf16 %v702_v15, %v701_v14  ;;  %v3220_v21 = vpack.c.bf16 %v922_v8, %v921_v41  ;;  %v3010_v0 = vpack.c.bf16 %v720_v18, %v719_v17  ;;  %v763_v14 = vld [vmem:[%s5076_s3 + $0x740] sm:$0xff]  ;;  %v764_v15 = vld [vmem:[%s5076_s3 + $0x748] sm:$0xff]  ;;  %v781_v41 = vld [vmem:[%s5076_s3 + $0x7d0] sm:$0xff] }
 0x1cb   :  { %3171 = vmatprep.subr.bf16.mxu0 %v3170_v52  ;;  %v923_v52 = vld [vmem:[%s5076_s3 + $0xc40] sm:$0xff]  ;;  %v782_v8 = vld [vmem:[%s5076_s3 + $0x7d8] sm:$0xff]  ;;  %v3068_v17 = vpack.c.bf16 %v764_v15, %v763_v14 }
 0x1cc   :  { %1354 = vmatmul.mubr.f32.vlgmr.msra.gmra.mrb[6].mxu1 %v4267_v39  ;;  %v916_v39 = vld [vmem:[%s5076_s3 + $0xc08] sm:$0xff]  ;;  %v3223_v28 = vpack.c.bf16 %v924_v24, %v923_v52  ;;  %v3070_v18 = vpack.c.bf16 %v782_v8, %v781_v41  ;;  %v767_v24 = vld [vmem:[%s5076_s3 + $0x760] sm:$0xff]  ;;  %v849_v8 = vld [vmem:[%s5076_s3 + $0x9f0] sm:$0xff] }
 0x1cd   :  { %2989 = vmatpush3.bf16.msra.mxu1 %v2988_v31  ;;  %1493 = vmatprep.mubr.f32.mxu1 %v995_v38  ;;  %v3211_v54 = vpack.c.bf16 %v916_v39, %v915_v49  ;;  %v3014_v31 = vpack.c.bf16 %v722_v26, %v721_v25  ;;  %v772_v38 = vld [vmem:[%s5076_s3 + $0x788] sm:$0xff]  ;;  %v785_v26 = vld [vmem:[%s5076_s3 + $0x7f0] sm:$0xff]  ;;  %v831_v15 = vld [vmem:[%s5076_s3 + $0x960] sm:$0xff] }
 0x1ce   :  { %3173 = vmatpush3.bf16.msra.mxu0 %v3172_v32  ;;  %2991 = vmatprep.subr.bf16.mxu1 %v2990_v19  ;;  %v705_v32 = vld [vmem:[%s5076_s3 + $0x570] sm:$0xff]  ;;  %v706_v19 = vld [vmem:[%s5076_s3 + $0x578] sm:$0xff]  ;;  %v3050_v40 = vpack.c.bf16 %v772_v38, %v771_v34  ;;  %v768_v25 = vld [vmem:[%s5076_s3 + $0x768] sm:$0xff]  ;;  %v3114_v38 = vpack.c.bf16 %v836_v2, %v835_v33  ;;  %v1046_v2 = vcombine.high %v4003_v16, %v4003_v16 }
 0x1cf   :  { %3175 = vmatprep.subr.bf16.mxu0 %v3174_v36  ;;  %v3016_v36 = vpack.c.bf16 %v706_v19, %v705_v32  ;;  %v769_v32 = vld [vmem:[%s5076_s3 + $0x770] sm:$0xff]  ;;  %v770_v19 = vld [vmem:[%s5076_s3 + $0x778] sm:$0xff]  ;;  %v832_v41 = vld [vmem:[%s5076_s3 + $0x968] sm:$0xff] }
 0x1d0   :  { %v3080_v34 = vpack.c.bf16 %v770_v19, %v769_v32  ;;  %v885_v19 = vld [vmem:[%s5076_s3 + $0xb10] sm:$0xff]  ;;  %v886_v33 = vld [vmem:[%s5076_s3 + $0xb18] sm:$0xff] }
 0x1d1   :  { %2993 = vmatpush3.bf16.msra.mxu1 %v2992_v43  ;;  %v756_v43 = vld [vmem:[%s5076_s3 + $0x708] sm:$0xff] }
 0x1d2   :  { %3177 = vmatpush3.bf16.msra.mxu0 %v3176_v35  ;;  %2995 = vmatprep.subr.bf16.mxu1 %v2994_v44  ;;  %v927_v35 = vld [vmem:[%s5076_s3 + $0xc60] sm:$0xff]  ;;  %v928_v44 = vld [vmem:[%s5076_s3 + $0xc68] sm:$0xff]  ;;  %v3052_v49 = vpack.c.bf16 %v756_v43, %v755_v42  ;;  %v838_v42 = vld [vmem:[%s5076_s3 + $0x998] sm:$0xff] }
 0x1d3   :  { %3210 = vmatprep.subr.bf16.mxu0 %v3317_v3  ;;  %v3229_v39 = vpack.c.bf16 %v928_v44, %v927_v35  ;;  %v821_v44 = vld [vmem:[%s5076_s3 + $0x910] sm:$0xff] }
 0x1d5   :  { %1844 = vmatmul.mubr.f32.vlgmr.msra.gmra.mrb[56].mxu0 %v4328_v62  ;;  %2997 = vmatpush3.bf16.msra.mxu1 %v2996_v53  ;;  %v920_v62 = vld [vmem:[%s5076_s3 + $0xc28] sm:$0xff]  ;;  %v758_v53 = vld [vmem:[%s5076_s3 + $0x718] sm:$0xff] }
 0x1d6   :  { %3212 = vmatpush3.bf16.msra.mxu0 %v3211_v54  ;;  %2999 = vmatprep.subr.bf16.mxu1 %v2998_v55  ;;  %v3217_v13 = vpack.c.bf16 %v920_v62, %v919_v9  ;;  %v929_v54 = vld [vmem:[%s5076_s3 + $0xc70] sm:$0xff]  ;;  %v1012_v55 = vcombine.high %v3944_v5, %v3944_v5  ;;  %v3056_v59 = vpack.c.bf16 %v758_v53, %v757_v51  ;;  %v762_v62 = vld [vmem:[%s5076_s3 + $0x738] sm:$0xff]  ;;  %v823_v53 = vld [vmem:[%s5076_s3 + $0x920] sm:$0xff] }
 0x1d7   :  { %3213 = vmatprep.subr.bf16.mxu0 %v3317_v3  ;;  %2726 = vmatprep.mubr.msk.f32.mxu0 %vm3320_vm2, %v3318_v29  ;;  %v3232_v61 = vpack.c.bf16 %v930_v56, %v929_v54  ;;  %v761_v9 = vld [vmem:[%s5076_s3 + $0x730] sm:$0xff]  ;;  %v824_v54 = vld [vmem:[%s5076_s3 + $0x928] sm:$0xff] }
 0x1d8   :  { %v3124_v56 = vpack.c.bf16 %v824_v54, %v823_v53  ;;  %v891_v53 = vld [vmem:[%s5076_s3 + $0xb40] sm:$0xff]  ;;  %v892_v54 = vld [vmem:[%s5076_s3 + $0xb48] sm:$0xff] }
 0x1d9   :  { %3001 = vmatpush3.bf16.msra.mxu1 %v3000_v1  ;;  %v759_v1 = vld [vmem:[%s5076_s3 + $0x720] sm:$0xff] }
 0x1da   :  { %3215 = vmatpush3.bf16.msra.mxu0 %v3214_v4  ;;  %3003 = vmatprep.subr.bf16.mxu1 %v3002_v6  ;;  %v760_v4 = vld [vmem:[%s5076_s3 + $0x728] sm:$0xff]  ;;  %v778_v6 = vld [vmem:[%s5076_s3 + $0x7b8] sm:$0xff] }
 0x1db   :  { %3216 = vmatprep.subr.bf16.mxu0 %v3317_v3  ;;  %v3060_v48 = vpack.c.bf16 %v760_v4, %v759_v1 }
 0x1dd   :  { %3005 = vmatpush3.bf16.msra.mxu1 %v3004_v12  ;;  %v2220_v12 = vld.sshfl [vmem:[#allocation4 + $0x30] sm:$0x3 pattern:$0x76325410] }
 0x1de   :  { %3218 = vmatpush3.bf16.msra.mxu0 %v3217_v13  ;;  %3007 = vmatprep.subr.bf16.mxu1 %v3006_v63  ;;  %v3064_v13 = vpack.c.bf16 %v762_v62, %v761_v9  ;;  %v3066_v63 = vpack.c.bf16 %v780_v11, %v779_v10  ;;  %v829_v10 = vld [vmem:[%s5076_s3 + $0x950] sm:$0xff]  ;;  %v830_v11 = vld [vmem:[%s5076_s3 + $0x958] sm:$0xff] }
 0x1df   :  { %3219 = vmatprep.subr.bf16.mxu0 %v3317_v3 }
 0x1e1   :  { %3009 = vmatpush3.bf16.msra.mxu1 %v3008_v20  ;;  %v765_v20 = vld [vmem:[%s5076_s3 + $0x750] sm:$0xff] }
 0x1e2   :  { %3221 = vmatpush3.bf16.msra.mxu0 %v3220_v21  ;;  %3011 = vmatprep.subr.bf16.mxu1 %v3010_v0  ;;  %v766_v21 = vld [vmem:[%s5076_s3 + $0x758] sm:$0xff]  ;;  %v783_v0 = vld [vmem:[%s5076_s3 + $0x7e0] sm:$0xff] }
 0x1e3   :  { %3222 = vmatprep.subr.bf16.mxu0 %v3317_v3  ;;  %v3072_v23 = vpack.c.bf16 %v766_v21, %v765_v20  ;;  %v3074_v52 = vpack.c.bf16 %v784_v22, %v783_v0  ;;  %v833_v21 = vld [vmem:[%s5076_s3 + $0x970] sm:$0xff]  ;;  %v834_v0 = vld [vmem:[%s5076_s3 + $0x978] sm:$0xff]  ;;  %v899_v22 = vld [vmem:[%s5076_s3 + $0xb80] sm:$0xff] }
 0x1e5   :  { %3013 = vmatpush3.bf16.msra.mxu1 %v3012_v27  ;;  %v786_v27 = vld [vmem:[%s5076_s3 + $0x7f8] sm:$0xff] }
 0x1e6   :  { %3224 = vmatpush3.bf16.msra.mxu0 %v3223_v28  ;;  %3015 = vmatprep.subr.bf16.mxu1 %v3014_v31  ;;  %v3076_v28 = vpack.c.bf16 %v768_v25, %v767_v24  ;;  %v3078_v31 = vpack.c.bf16 %v786_v27, %v785_v26  ;;  %v883_v25 = vld [vmem:[%s5076_s3 + $0xb00] sm:$0xff]  ;;  %v884_v26 = vld [vmem:[%s5076_s3 + $0xb08] sm:$0xff]  ;;  %v901_v27 = vld [vmem:[%s5076_s3 + $0xb90] sm:$0xff] }
 0x1e7   :  { %3225 = vmatprep.subr.bf16.mxu0 %v3317_v3 }
 0x1e9   :  { %3017 = vmatpush3.bf16.msra.mxu1 %v3016_v36  ;;  %v819_v36 = vld [vmem:[%s5076_s3 + $0x900] sm:$0xff] }
 0x1ea   :  { %3227 = vmatpush3.bf16.msra.mxu0 %v3226_v37  ;;  %3051 = vmatprep.subr.bf16.mxu1 %v3050_v40  ;;  %v820_v37 = vld [vmem:[%s5076_s3 + $0x908] sm:$0xff]  ;;  %v837_v40 = vld [vmem:[%s5076_s3 + $0x990] sm:$0xff] }
 0x1eb   :  { %3228 = vmatprep.subr.bf16.mxu0 %v3317_v3  ;;  %v3116_v43 = vpack.c.bf16 %v820_v37, %v819_v36  ;;  %v3118_v35 = vpack.c.bf16 %v838_v42, %v837_v40  ;;  %v3184_v36 = vpack.c.bf16 %v886_v33, %v885_v19  ;;  %v887_v40 = vld [vmem:[%s5076_s3 + $0xb20] sm:$0xff]  ;;  %v888_v42 = vld [vmem:[%s5076_s3 + $0xb28] sm:$0xff]  ;;  %v1993_v19 = vld [vmem:[%s5078_s5 + $0x18] sm:$0xff] }
 0x1ec   :  { %1494 = vmatmul.mubr.f32.vlgmr.msra.gmra.mrb[8].mxu1 %v3918_v30  ;;  %v777_v30 = vld [vmem:[%s5076_s3 + $0x7b0] sm:$0xff] }
 0x1ed   :  { %3053 = vmatpush3.bf16.msra.mxu1 %v3052_v49  ;;  %1633 = vmatprep.mubr.f32.mxu1 %v1012_v55  ;;  %v3062_v7 = vpack.c.bf16 %v778_v6, %v777_v30  ;;  %v839_v49 = vld [vmem:[%s5076_s3 + $0x9a0] sm:$0xff]  ;;  %v841_v55 = vld [vmem:[%s5076_s3 + $0x9b0] sm:$0xff]  ;;  %v828_v6 = vld [vmem:[%s5076_s3 + $0x948] sm:$0xff] }
 0x1ee   :  { %3230 = vmatpush3.bf16.msra.mxu0 %v3229_v39  ;;  %3055 = vmatprep.subr.bf16.mxu1 %v3054_v50  ;;  %v840_v39 = vld [vmem:[%s5076_s3 + $0x9a8] sm:$0xff]  ;;  %v3120_v50 = vpack.c.bf16 %v822_v46, %v821_v44  ;;  %v827_v30 = vld [vmem:[%s5076_s3 + $0x940] sm:$0xff]  ;;  %v889_v46 = vld [vmem:[%s5076_s3 + $0xb30] sm:$0xff] }
 0x1ef   :  { %3231 = vmatprep.subr.bf16.mxu0 %v3317_v3  ;;  %v3122_v51 = vpack.c.bf16 %v840_v39, %v839_v49  ;;  %v3132_v9 = vpack.c.bf16 %v828_v6, %v827_v30  ;;  %v907_v49 = vld [vmem:[%s5076_s3 + $0xbc0] sm:$0xff]  ;;  %v908_v39 = vld [vmem:[%s5076_s3 + $0xbc8] sm:$0xff] }
 0x1f0   :  { %v895_v30 = vld [vmem:[%s5076_s3 + $0xb60] sm:$0xff]  ;;  %v896_v6 = vld [vmem:[%s5076_s3 + $0xb68] sm:$0xff] }
 0x1f1   :  { %3057 = vmatpush3.bf16.msra.mxu1 %v3056_v59  ;;  %v826_v59 = vld [vmem:[%s5076_s3 + $0x938] sm:$0xff] }
 0x1f2   :  { %3233 = vmatpush3.bf16.msra.mxu0 %v3232_v61  ;;  %3059 = vmatprep.subr.bf16.mxu1 %v3058_v45  ;;  %v843_v61 = vld [vmem:[%s5076_s3 + $0x9c0] sm:$0xff]  ;;  %v844_v45 = vld [vmem:[%s5076_s3 + $0x9c8] sm:$0xff]  ;;  %v3128_v1 = vpack.c.bf16 %v826_v59, %v825_v58  ;;  %v893_v58 = vld [vmem:[%s5076_s3 + $0xb50] sm:$0xff] }
 0x1f3   :  { %3258 = vmatprep.subr.bf16.mxu0 %v3317_v3  ;;  %v3130_v4 = vpack.c.bf16 %v844_v45, %v843_v61  ;;  %v894_v59 = vld [vmem:[%s5076_s3 + $0xb58] sm:$0xff]  ;;  %v911_v61 = vld [vmem:[%s5076_s3 + $0xbe0] sm:$0xff]  ;;  %v912_v45 = vld [vmem:[%s5076_s3 + $0xbe8] sm:$0xff] }
 0x1f5   :  { %2727 = vmatmul.mubr.f32.vlgmr.msra.gmra.mrb[58].mxu0 %v2220_v12  ;;  %3061 = vmatpush3.bf16.msra.mxu1 %v3060_v48  ;;  %v845_v48 = vld [vmem:[%s5076_s3 + $0x9d0] sm:$0xff]  ;;  %v847_v12 = vld [vmem:[%s5076_s3 + $0x9e0] sm:$0xff] }
 0x1f6   :  { %3063 = vmatprep.subr.bf16.mxu1 %v3062_v7  ;;  %2796 = vmatprep.mubr.msk.f32.mxu0 %vm3320_vm2, %v3318_v29  ;;  %v846_v7 = vld [vmem:[%s5076_s3 + $0x9d8] sm:$0xff] }
 0x1f7   :  { %v3134_v62 = vpack.c.bf16 %v846_v7, %v845_v48  ;;  %v913_v7 = vld [vmem:[%s5076_s3 + $0xbf0] sm:$0xff] }
 0x1f9   :  { %3065 = vmatpush3.bf16.msra.mxu1 %v3064_v13  ;;  %v848_v13 = vld [vmem:[%s5076_s3 + $0x9e8] sm:$0xff] }
 0x1fa   :  { %3067 = vmatprep.subr.bf16.mxu1 %v3066_v63  ;;  %v3136_v63 = vpack.c.bf16 %v830_v11, %v829_v10  ;;  %v3138_v14 = vpack.c.bf16 %v848_v13, %v847_v12  ;;  %v3204_v11 = vpack.c.bf16 %v896_v6, %v895_v30  ;;  %v897_v13 = vld [vmem:[%s5076_s3 + $0xb70] sm:$0xff]  ;;  %v2085_v30 = vld [vmem:[%s5080_s7 + $0x8] sm:$0xff] }
 0x1fb   :  { %v2086_v6 = vld [vmem:[%s5080_s7 + $0x10] sm:$0xff] }
 0x1fd   :  { %3069 = vmatpush3.bf16.msra.mxu1 %v3068_v17  ;;  %v850_v17 = vld [vmem:[%s5076_s3 + $0x9f8] sm:$0xff] }
 0x1fe   :  { %3071 = vmatprep.subr.bf16.mxu1 %v3070_v18  ;;  %v3140_v18 = vpack.c.bf16 %v832_v41, %v831_v15  ;;  %v3142_v20 = vpack.c.bf16 %v850_v17, %v849_v8  ;;  %v2219_v17 = vld [vmem:[%s5077_s4] ss:$0 sm:$0xff] }
 0x201   :  { %3073 = vmatpush3.bf16.msra.mxu1 %v3072_v23  ;;  %v900_v23 = vld [vmem:[%s5076_s3 + $0xb88] sm:$0xff] }
 0x202   :  { %3075 = vmatprep.subr.bf16.mxu1 %v3074_v52  ;;  %v3144_v52 = vpack.c.bf16 %v834_v0, %v833_v21  ;;  %v3178_v24 = vpack.c.bf16 %v900_v23, %v899_v22 }
 0x205   :  { %3077 = vmatpush3.bf16.msra.mxu1 %v3076_v28  ;;  %v902_v28 = vld [vmem:[%s5076_s3 + $0xb98] sm:$0xff] }
 0x206   :  { %3079 = vmatprep.subr.bf16.mxu1 %v3078_v31  ;;  %v3180_v31 = vpack.c.bf16 %v884_v26, %v883_v25  ;;  %v3182_v32 = vpack.c.bf16 %v902_v28, %v901_v27  ;;  %v1991_v28 = vld [vmem:[%s5078_s5 + $0x8] sm:$0xff] }
 0x209   :  { %3081 = vmatpush3.bf16.msra.mxu1 %v3080_v34  ;;  %v903_v34 = vld [vmem:[%s5076_s3 + $0xba0] sm:$0xff] }
 0x20a   :  { %3115 = vmatprep.subr.bf16.mxu1 %v3114_v38  ;;  %v904_v38 = vld [vmem:[%s5076_s3 + $0xba8] sm:$0xff] }
 0x20b   :  { %v3186_v37 = vpack.c.bf16 %v904_v38, %v903_v34  ;;  %v1995_v34 = vld [vmem:[%s5078_s5 + $0x28] sm:$0xff] }
 0x20c   :  { %1634 = vmatmul.mubr.f32.vlgmr.msra.gmra.mrb[10].mxu1 %v3944_v5  ;;  %v842_v5 = vld [vmem:[%s5076_s3 + $0x9b8] sm:$0xff] }
 0x20d   :  { %3117 = vmatpush3.bf16.msra.mxu1 %v3116_v43  ;;  %1773 = vmatprep.mubr.f32.mxu1 %v1029_v47  ;;  %v3126_v57 = vpack.c.bf16 %v842_v5, %v841_v55  ;;  %v905_v43 = vld [vmem:[%s5076_s3 + $0xbb0] sm:$0xff]  ;;  %v890_v47 = vld [vmem:[%s5076_s3 + $0xb38] sm:$0xff] }
 0x20e   :  { %3119 = vmatprep.subr.bf16.mxu1 %v3118_v35  ;;  %v3188_v35 = vpack.c.bf16 %v888_v42, %v887_v40  ;;  %v909_v55 = vld [vmem:[%s5076_s3 + $0xbd0] sm:$0xff]  ;;  %v910_v5 = vld [vmem:[%s5076_s3 + $0xbd8] sm:$0xff] }
 0x20f   :  { %v1996_v42 = vld [vmem:[%s5078_s5 + $0x30] sm:$0xff] }
 0x211   :  { %3121 = vmatpush3.bf16.msra.mxu1 %v3120_v50  ;;  %v3192_v50 = vpack.c.bf16 %v890_v47, %v889_v46  ;;  %v2000_v47 = vld [vmem:[%s5078_s5 + $0x50] sm:$0xff] }
 0x212   :  { %3123 = vmatprep.subr.bf16.mxu1 %v3122_v51  ;;  %v3194_v51 = vpack.c.bf16 %v908_v39, %v907_v49  ;;  %v2001_v49 = vld [vmem:[%s5078_s5 + $0x58] sm:$0xff] }
 0x213   :  { %v3250_v39 = vpack.c.bf16 %v2001_v49, %v2000_v47  ;;  %v2221_v47 = vld [vmem:[%s5079_s6] ss:$0 sm:$0xff] }
 0x215   :  { %3125 = vmatpush3.bf16.msra.mxu1 %v3124_v56  ;;  %v3196_v56 = vpack.c.bf16 %v892_v54, %v891_v53  ;;  %v2002_v53 = vld [vmem:[%s5078_s5 + $0x60] sm:$0xff]  ;;  %v2003_v54 = vld [vmem:[%s5078_s5 + $0x68] sm:$0xff] }
 0x216   :  { %3127 = vmatprep.subr.bf16.mxu1 %v3126_v57  ;;  %v3198_v57 = vpack.c.bf16 %v910_v5, %v909_v55  ;;  %v3253_v5 = vpack.c.bf16 %v2003_v54, %v2002_v53  ;;  %v2222_v53 = vld [vmem:[%s5081_s8] ss:$0 sm:$0xff] }
 0x219   :  { %3129 = vmatpush3.bf16.msra.mxu1 %v3128_v1  ;;  %v3200_v1 = vpack.c.bf16 %v894_v59, %v893_v58  ;;  %v2005_v58 = vld [vmem:[%s5078_s5 + $0x78] sm:$0xff] }
 0x21a   :  { %3131 = vmatprep.subr.bf16.mxu1 %v3130_v4  ;;  %v3202_v4 = vpack.c.bf16 %v912_v45, %v911_v61 }
 0x21d   :  { %3133 = vmatpush3.bf16.msra.mxu1 %v3132_v9  ;;  %v914_v9 = vld [vmem:[%s5076_s3 + $0xbf8] sm:$0xff] }
 0x21e   :  { %3135 = vmatprep.subr.bf16.mxu1 %v3134_v62  ;;  %v3206_v12 = vpack.c.bf16 %v914_v9, %v913_v7  ;;  %v2087_v9 = vld [vmem:[%s5080_s7 + $0x18] sm:$0xff] }
 0x221   :  { %3137 = vmatpush3.bf16.msra.mxu1 %v3136_v63  ;;  %v898_v63 = vld [vmem:[%s5076_s3 + $0xb78] sm:$0xff] }
 0x222   :  { %3139 = vmatprep.subr.bf16.mxu1 %v3138_v14  ;;  %v3208_v14 = vpack.c.bf16 %v898_v63, %v897_v13  ;;  %v2090_v13 = vld [vmem:[%s5080_s7 + $0x30] sm:$0xff]  ;;  %v2091_v63 = vld [vmem:[%s5080_s7 + $0x38] sm:$0xff] }
 0x225   :  { %3141 = vmatpush3.bf16.msra.mxu1 %v3140_v18 }
 0x226   :  { %3143 = vmatprep.subr.bf16.mxu1 %v3142_v20 }
 0x229   :  { %3145 = vmatpush3.bf16.msra.mxu1 %v3144_v52 }
 0x22a   :  { %3179 = vmatprep.subr.bf16.mxu1 %v3178_v24 }
 0x22c   :  { %1774 = vmatmul.mubr.f32.vlgmr.msra.gmra.mrb[12].mxu1 %v3975_v60  ;;  %v906_v60 = vld [vmem:[%s5076_s3 + $0xbb8] sm:$0xff] }
 0x22d   :  { %3181 = vmatpush3.bf16.msra.mxu1 %v3180_v31  ;;  %1913 = vmatprep.mubr.f32.mxu1 %v1046_v2  ;;  %v3190_v44 = vpack.c.bf16 %v906_v60, %v905_v43  ;;  %v1992_v31 = vld [vmem:[%s5078_s5 + $0x10] sm:$0xff]  ;;  %v1994_v2 = vld [vmem:[%s5078_s5 + $0x20] sm:$0xff]  ;;  %v1997_v43 = vld [vmem:[%s5078_s5 + $0x38] sm:$0xff] }
 0x22e   :  { %3183 = vmatprep.subr.bf16.mxu1 %v3182_v32  ;;  %v3238_v33 = vpack.c.bf16 %v1993_v19, %v1992_v31  ;;  %v3241_v40 = vpack.c.bf16 %v1995_v34, %v1994_v2  ;;  %v3244_v60 = vpack.c.bf16 %v1997_v43, %v1996_v42 }
 0x231   :  { %3185 = vmatpush3.bf16.msra.mxu1 %v3184_v36 }
 0x232   :  { %3187 = vmatprep.subr.bf16.mxu1 %v3186_v37 }
 0x235   :  { %3189 = vmatpush3.bf16.msra.mxu1 %v3188_v35  ;;  %v1998_v35 = vld [vmem:[%s5078_s5 + $0x40] sm:$0xff] }
 0x236   :  { %3191 = vmatprep.subr.bf16.mxu1 %v3190_v44  ;;  %v1999_v44 = vld [vmem:[%s5078_s5 + $0x48] sm:$0xff] }
 0x237   :  { %v3247_v46 = vpack.c.bf16 %v1999_v44, %v1998_v35 }
 0x239   :  { %3193 = vmatpush3.bf16.msra.mxu1 %v3192_v50 }
 0x23a   :  { %3195 = vmatprep.subr.bf16.mxu1 %v3194_v51 }
 0x23d   :  { %3197 = vmatpush3.bf16.msra.mxu1 %v3196_v56 }
 0x23e   :  { %3199 = vmatprep.subr.bf16.mxu1 %v3198_v57  ;;  %v2004_v57 = vld [vmem:[%s5078_s5 + $0x70] sm:$0xff] }
 0x23f   :  { %v2255_v48 = vpop.f32.mrb[0].mxu1  ;;  %v3256_v61 = vpack.c.bf16 %v2005_v58, %v2004_v57 }
 0x240   :  { %v2256_v62 = vpop.f32.mrb[1].mxu1 }
 0x241   :  { %v2257_v10 = vadd.f32 %v2256_v62, %v2255_v48  ;;  %3201 = vmatpush3.bf16.msra.mxu1 %v3200_v1  ;;  %v3262_v62 = vpack.c.bf16 %v2087_v9, %v2086_v6 }
 0x242   :  { %3203 = vmatprep.subr.bf16.mxu1 %v3202_v4  ;;  %v2084_v4 = vld [vmem:[%s5080_s7] sm:$0xff] }
 0x243   :  { %v1146_v21 = vadd.f32 %v2257_v10, %v2219_v17  ;;  %v3259_v7 = vpack.c.bf16 %v2085_v30, %v2084_v4  ;;  %v2088_v10 = vld [vmem:[%s5080_s7 + $0x20] sm:$0xff]  ;;  %v2094_v17 = vld [vmem:[%s5080_s7 + $0x50] sm:$0xff] }
 0x245   :  { %3205 = vmatpush3.bf16.msra.mxu1 %v3204_v11  ;;  %3260 = vmatpush3.bf16.msra.mxu0 %v3259_v7  ;;  %v2089_v11 = vld [vmem:[%s5080_s7 + $0x28] sm:$0xff] }
 0x246   :  { %3207 = vmatprep.subr.bf16.mxu1 %v3206_v12  ;;  %3261 = vmatprep.subr.bf16.mxu0 %v3317_v3  ;;  %v3265_v12 = vpack.c.bf16 %v2089_v11, %v2088_v10 }
 0x248   :  { %v2395_v15 = vpop.f32.mrb[50].mxu0 }
 0x249   :  { %v2396_v41 = vpop.f32.mrb[51].mxu0  ;;  %3209 = vmatpush3.bf16.msra.mxu1 %v3208_v14  ;;  %3263 = vmatpush3.bf16.msra.mxu0 %v3262_v62  ;;  %v3268_v14 = vpack.c.bf16 %v2091_v63, %v2090_v13 }
 0x24a   :  { %v2397_v8 = vadd.f32 %v2396_v41, %v2395_v15  ;;  %3234 = vmatprep.subr.bf16.mxu1 %v3317_v3  ;;  %3264 = vmatprep.subr.bf16.mxu0 %v3317_v3  ;;  %v2092_v15 = vld [vmem:[%s5080_s7 + $0x40] sm:$0xff]  ;;  %v2093_v41 = vld [vmem:[%s5080_s7 + $0x48] sm:$0xff] }
 0x24c   :  { %1914 = vmatmul.mubr.f32.vlgmr.msra.gmra.mrb[14].mxu1 %v4003_v16 }
 0x24d   :  { %2761 = vmatprep.mubr.msk.f32.mxu1 %vm3320_vm2, %v3318_v29  ;;  %v1990_v29 = vld [vmem:[%s5078_s5] sm:$0xff]  ;;  %3266 = vmatpush3.bf16.msra.mxu0 %v3265_v12 }
 0x24e   :  { %v3235_v32 = vpack.c.bf16 %v1991_v28, %v1990_v29  ;;  %3267 = vmatprep.subr.bf16.mxu0 %v3317_v3 }
 0x250   :  { %3236 = vmatpush3.bf16.msra.mxu1 %v3235_v32 }
 0x251   :  { %3237 = vmatprep.subr.bf16.mxu1 %v3317_v3  ;;  %3269 = vmatpush3.bf16.msra.mxu0 %v3268_v14 }
 0x252   :  { %3270 = vmatprep.subr.bf16.mxu0 %v3317_v3 }
 0x254   :  { %3239 = vmatpush3.bf16.msra.mxu1 %v3238_v33 }
 0x255   :  { %3240 = vmatprep.subr.bf16.mxu1 %v3317_v3 }
 0x258   :  { %3242 = vmatpush3.bf16.msra.mxu1 %v3241_v40 }
 0x259   :  { %3243 = vmatprep.subr.bf16.mxu1 %v3317_v3 }
 0x25c   :  { %3245 = vmatpush3.bf16.msra.mxu1 %v3244_v60 }
 0x25d   :  { %3246 = vmatprep.subr.bf16.mxu1 %v3317_v3 }
 0x25f   :  { %v2290_v18 = vpop.f32.mrb[2].mxu1 }
 0x260   :  { %v2291_v20 = vpop.f32.mrb[3].mxu1  ;;  %3248 = vmatpush3.bf16.msra.mxu1 %v3247_v46 }
 0x261   :  { %v2292_v0 = vadd.f32 %v2291_v20, %v2290_v18  ;;  %3249 = vmatprep.subr.bf16.mxu1 %v3317_v3  ;;  %v2095_v18 = vld [vmem:[%s5080_s7 + $0x58] sm:$0xff] }
 0x262   :  { %v3274_v20 = vpack.c.bf16 %v2095_v18, %v2094_v17 }
 0x263   :  { %v1216_v22 = vadd.f32 %v2292_v0, %v1146_v21  ;;  %v2096_v21 = vld [vmem:[%s5080_s7 + $0x60] sm:$0xff]  ;;  %v2097_v0 = vld [vmem:[%s5080_s7 + $0x68] sm:$0xff] }
 0x264   :  { %3251 = vmatpush3.bf16.msra.mxu1 %v3250_v39 }
 0x265   :  { %3252 = vmatprep.subr.bf16.mxu1 %v3317_v3 }
 0x268   :  { %v2465_v23 = vpop.f32.mrb[52].mxu0  ;;  %3254 = vmatpush3.bf16.msra.mxu1 %v3253_v5 }
 0x269   :  { %v2466_v52 = vpop.f32.mrb[53].mxu0  ;;  %3255 = vmatprep.subr.bf16.mxu1 %v3317_v3 }
 0x26a   :  { %v4939_v24 = vadd.f32 %v2466_v52, %v2465_v23  ;;  %v3277_v52 = vpack.c.bf16 %v2097_v0, %v2096_v21 }
 0x26c   :  { %3257 = vmatpush3.bf16.msra.mxu1 %v3256_v61 }
 0x27f   :  { %v2325_v25 = vpop.f32.mrb[4].mxu1 }
 0x280   :  { %v2326_v26 = vpop.f32.mrb[5].mxu1 }
 0x281   :  { %v2327_v27 = vadd.f32 %v2326_v26, %v2325_v25 }
 0x283   :  { %v1286_v16 = vadd.f32 %v2327_v27, %v1216_v22 }
 0x288   :  { %v2535_v38 = vpop.f32.mrb[54].mxu0 }
 0x289   :  { %v2536_v36 = vpop.f32.mrb[55].mxu0 }
 0x28a   :  { %v4960_v37 = vadd.f32 %v2536_v36, %v2535_v38 }
 0x29f   :  { %v2360_v50 = vpop.f32.mrb[6].mxu1 }
 0x2a0   :  { %v2361_v51 = vpop.f32.mrb[7].mxu1 }
 0x2a1   :  { %v2362_v55 = vadd.f32 %v2361_v51, %v2360_v50 }
 0x2a3   :  { %v1356_v56 = vadd.f32 %v2362_v55, %v1286_v16 }
 0x2a5   :  { %v1426_v59 = vadd.f32 %v2397_v8, %v1356_v56  ;;  %v3271_v8 = vpack.c.bf16 %v2093_v41, %v2092_v15 }
 0x2a7   :  { %3272 = vmatpush3.bf16.msra.mxu0 %v3271_v8 }
 0x2a8   :  { %v2605_v45 = vpop.f32.mrb[56].mxu0  ;;  %3273 = vmatprep.subr.bf16.mxu0 %v3317_v3 }
 0x2a9   :  { %v2606_v1 = vpop.f32.mrb[57].mxu0 }
 0x2aa   :  { %v2607_v48 = vadd.f32 %v2606_v1, %v2605_v45 }
 0x2ab   :  { %3275 = vmatpush3.bf16.msra.mxu0 %v3274_v20 }
 0x2ac   :  { %3276 = vmatprep.subr.bf16.mxu0 %v3317_v3 }
 0x2af   :  { %3278 = vmatpush3.bf16.msra.mxu0 %v3277_v52 }
 0x2b0   :  { %3279 = vmatprep.subr.bf16.mxu0 %v3317_v3  ;;  %v2098_v3 = vld [vmem:[%s5080_s7 + $0x70] sm:$0xff] }
 0x2bf   :  { %v2430_v22 = vpop.f32.mrb[8].mxu1 }
 0x2c0   :  { %v2431_v23 = vpop.f32.mrb[9].mxu1 }
 0x2c1   :  { %v2432_v25 = vadd.f32 %v2431_v23, %v2430_v22 }
 0x2c3   :  { %v1496_v26 = vadd.f32 %v2432_v25, %v1426_v59 }
 0x2c5   :  { %v1566_v27 = vadd.f32 %v4939_v24, %v1496_v26 }
 0x2c8   :  { %v1985_v16 = vpop.f32.mrb[58].mxu0 }
 0x2c9   :  { %v2728_v29 = vpop.f32.mrb[59].mxu0 }
 0x2df   :  { %v2500_v28 = vpop.f32.mrb[10].mxu1 }
 0x2e0   :  { %v2501_v31 = vpop.f32.mrb[11].mxu1 }
 0x2e1   :  { %v2502_v32 = vadd.f32 %v2501_v31, %v2500_v28 }
 0x2e3   :  { %v1636_v19 = vadd.f32 %v2502_v32, %v1566_v27 }
 0x2e5   :  { %v1706_v33 = vadd.f32 %v4960_v37, %v1636_v19  ;;  %v2099_v37 = vld [vmem:[%s5080_s7 + $0x78] sm:$0xff]  ;;  %s3293_s7 = scalar_lea.vmem %s2185_s22, 32 }
 0x2e6   :  { %v3280_v46 = vpack.c.bf16 %v2099_v37, %v2098_v3  ;;  %p3294_p0 = scmp.ne.s32.totalorder %s2185_s22, %s3293_s7  ;;  %p3299_p2 = scmp.lt.s32.totalorder %s3293_s7, %s3293_s7 }
 0x2e8   :  { %3281 = vmatpush3.bf16.msra.mxu0 %v3280_v46  ;;  %p3300_p3 = por %p3299_p2, %p3298_p1 }
 0x2ea   :  { %p3301_p4 = pnand %p3300_p3, %p3294_p0 }
 0x2ff   :  { %v2570_v2 = vpop.f32.mrb[12].mxu1 }
 0x300   :  { %v2571_v34 = vpop.f32.mrb[13].mxu1 }
 0x301   :  { %v2572_v38 = vadd.f32 %v2571_v34, %v2570_v2 }
 0x303   :  { %v1776_v36 = vadd.f32 %v2572_v38, %v1706_v33 }
 0x305   :  { %v1846_v40 = vadd.f32 %v2607_v48, %v1776_v36 }
 0x31f   :  { %v2640_v42 = vpop.f32.mrb[14].mxu1 }
 0x320   :  { %v2641_v43 = vpop.f32.mrb[15].mxu1 }
 0x321   :  { %v2642_v60 = vadd.f32 %v2641_v43, %v2640_v42 }
 0x323   :  { %v1916_v35 = vadd.f32 %v2642_v60, %v1846_v40 }
 0x325   :  { %v1986_v24 = vadd.f32 %v1985_v16, %v1916_v35 }
 0x327   :  { %v1989_v44 = vmax.f32 %v1986_v24, 0.0 }
 0x329   :  { %2762 = vmatmul.mubr.f32.vlgmr.msra.gmra.mrb[16].mxu1 %v1989_v44 }
 0x3fc   :  { %v2079_v49 = vpop.f32.mrb[16].mxu1 }
 0x3fd   :  { %v2080_v39 = vadd.f32 %v2221_v47, %v2079_v49  ;;  %v2763_v50 = vpop.f32.mrb[17].mxu1 }
 0x3ff   :  { %v2083_v51 = vmax.f32 %v2080_v39, 0.0 }
 0x401   :  { %2797 = vmatmul.mubr.f32.vlgmr.msra.gmra.mrb[60].mxu0 %v2083_v51 }
 0x4d4   :  { %v2173_v54 = vpop.f32.mrb[60].mxu0 }
 0x4d5   :  { %v2174_v55 = vadd.f32 %v2222_v53, %v2173_v54  ;;  %v2798_v5 = vpop.f32.mrb[61].mxu0 }
 0x4d7   :  { %2177 = vst [vmem:[#allocation5] sm:$0x3] %v2174_v55 }
 0x4d8   :  { %3304 = shalt.err (!%p3301_p4)
}
 0x4d9   :  { %s3305_s0 = scalar_lea.hbm %s5082_s9, 32 }
 0x4da   :  { %p3306_p5 = scmp.ne.s32.totalorder %s5082_s9, %s3305_s0  ;;  %p3309_p6 = scmp.lt.u32.totalorder %s3305_s0, %s5082_s9 }
 0x4dc   :  { %p3311_p7 = pnand %p3309_p6, %p3306_p5 }
 0x4de   :  { %3314 = shalt.err (!%p3311_p7)
}
 0x4df   :  { %2187 = dma.vmem_to_hbm [thread:$0]  %s2185_s22, 32, %s5082_s9, [#allocation6]  }
 0x4e0   :  { %3315 = dma.done.wait [#allocation6], 32  }
 0x4e1   :  { %3316 = vsyncadd [#allocation6], 4294967264 }
 0x4e2   :  { %2191 = vsyncpa [#allocation6], 1 }

</bundles_post_ra>
